<compile_context>
chip_gen: v5e
topology: v5e:2x2
jax: 0.10.0
libtpu: 0.0.40
codegen_flags: <defaults>
</compile_context>

<pallas_src>
import functools
import math

import jax
import jax.numpy as jnp
from jax.experimental import pallas as pl
from jax.experimental.pallas import tpu as pltpu

# ------------------------- toy model configuration ---------------------------
VOCAB = 50
MAX_POS = 16
HIDDEN = 32          # toy stand-in for DistilBERT's 768 (== text_mlp_dim)
N_HEADS = 4
HEAD_DIM = HIDDEN // N_HEADS
FFN = 64
N_LAYERS = 2
IMG_FEAT = 32        # toy stand-in for ResNet18's 512-dim backbone features
PROJ = 16            # toy stand-in for proj_dim=256
LN_EPS = 1e-12
LAYER_PARAM_NAMES = ("Wqkv", "bqkv", "Wo", "bo", "ln1_g", "ln1_b",
                     "W1", "b1", "W2", "b2", "ln2_g", "ln2_b")


def _vmem_spec():
    return pl.BlockSpec(memory_space=pltpu.MemorySpace.VMEM)


# ------------------------- fused CLIP forward kernel --------------------------
def _layernorm(y, gamma, beta):
    mu = jnp.mean(y, axis=-1, keepdims=True)
    var = jnp.mean((y - mu) ** 2, axis=-1, keepdims=True)
    return (y - mu) * jax.lax.rsqrt(var + LN_EPS) * gamma + beta


def _gelu(y):
    # TODO(synk): BERT/DistilBERT use exact erf-GELU; tanh approximation used
    # here (EUP-friendly on TPU, |diff| < 1e-3).
    c = math.sqrt(2.0 / math.pi)
    return 0.5 * y * (1.0 + jnp.tanh(c * (y + 0.044715 * y * y * y)))


def _clip_kernel(*refs, batch, seq, n_layers):
    B, S, H, NH, HD = batch, seq, HIDDEN, N_HEADS, HEAD_DIM
    x_ref, mask_ref, eg_ref, eb_ref = refs[:4]
    layer_refs = refs[4:4 + 12 * n_layers]
    (wt1_ref, wt2_ref, img_ref, wi1_ref, wi2_ref, t_ref,
     logits_ref, temb_ref, iemb_ref) = refs[4 + 12 * n_layers:]

    scale = 1.0 / math.sqrt(HD)

    # ---- embedding LayerNorm (no residual, no zeros tensor) -----------------
    x = _layernorm(x_ref[...], eg_ref[...], eb_ref[...])          # [B*S, H]

    # ---- additive attention-mask bias: computed once, reused by all layers --
    mask = mask_ref[...]                                          # [B, S]
    bias_b = (1.0 - mask)[:, None, :] * -1e9                      # [B, 1, S]
    bias = jnp.concatenate([bias_b] * NH, axis=0)                 # [NH*B, 1, S]

    for li in range(n_layers):
        (wqkv, bqkv, wo, bo, g1, be1, w1, bb1, w2, bb2, g2, be2) = \
            layer_refs[12 * li:12 * (li + 1)]

        # fused Q|K|V projection: one MXU pass, 96-wide output
        qkv = (jnp.dot(x, wqkv[...], preferred_element_type=jnp.float32)
               + bqkv[...])                                       # [B*S, 3H]

        # gather heads into a [NH*B, S, HD] batch (static slices + leading-axis
        # concat: Pallas-safe head split, index = h*B + b)
        def heads(off):
            blocks = [qkv[bi * S:(bi + 1) * S,
                          off + h * HD: off + (h + 1) * HD][None]
                      for h in range(NH) for bi in range(B)]
            return jnp.concatenate(blocks, axis=0)                # [NH*B, S, HD]

        qh, kh, vh = heads(0), heads(H), heads(2 * H)

        # one batched contraction over all heads, one softmax stream
        s = jnp.einsum("bqd,bkd->bqk", qh, kh,
                       preferred_element_type=jnp.float32) * scale + bias
        m = jnp.max(s, axis=-1, keepdims=True)
        e = jnp.exp(s - m)
        p = e * pl.reciprocal(jnp.sum(e, axis=-1, keepdims=True), approx=True)
        ctx = jnp.einsum("bqk,bkd->bqd", p, vh,
                         preferred_element_type=jnp.float32)      # [NH*B, S, HD]

        # merge heads back to [B*S, H] (row order matches x)
        ctx_flat = jnp.concatenate(
            [jnp.concatenate([ctx[h * B + bi] for h in range(NH)], axis=-1)
             for bi in range(B)], axis=0)                         # [B*S, H]

        # attention output projection + residual + LayerNorm (fused)
        attn = (jnp.dot(ctx_flat, wo[...],
                        preferred_element_type=jnp.float32) + bo[...])
        x = _layernorm(attn + x, g1[...], be1[...])

        # FFN (GELU) + residual + LayerNorm (fused)
        h1 = jnp.dot(x, w1[...], preferred_element_type=jnp.float32) + bb1[...]
        h1 = _gelu(h1)
        h2 = jnp.dot(h1, w2[...], preferred_element_type=jnp.float32) + bb2[...]
        x = _layernorm(h2 + x, g2[...], be2[...])

    # ---- mean pool over sequence (== last_hidden_state.mean(dim=1)) ---------
    pooled = jnp.concatenate(
        [jnp.mean(x[bi * S:(bi + 1) * S, :], axis=0, keepdims=True)
         for bi in range(B)], axis=0)                             # [B, H]

    # ---- projection heads: Linear -> ReLU -> Linear (bias-free, per spec) ---
    t1 = jnp.maximum(jnp.dot(pooled, wt1_ref[...],
                             preferred_element_type=jnp.float32), 0.0)
    temb = jnp.dot(t1, wt2_ref[...], preferred_element_type=jnp.float32)

    i1 = jnp.maximum(jnp.dot(img_ref[...], wi1_ref[...],
                             preferred_element_type=jnp.float32), 0.0)
    iemb = jnp.dot(i1, wi2_ref[...], preferred_element_type=jnp.float32)

    # ---- L2 normalize + CLIP logits ------------------------------------------
    temb = temb * jax.lax.rsqrt(jnp.sum(temb * temb, axis=-1, keepdims=True))
    iemb = iemb * jax.lax.rsqrt(jnp.sum(iemb * iemb, axis=-1, keepdims=True))
    logits_per_text = jnp.einsum("tp,ip->ti", temb, iemb,
                                 preferred_element_type=jnp.float32)
    logits_per_text = logits_per_text * jnp.exp(t_ref[...])       # * t_prime.exp()

    logits_ref[...] = logits_per_text
    temb_ref[...] = temb
    iemb_ref[...] = iemb


# ------------------------------- wrapper --------------------------------------
def clip_forward(params, input_ids, attention_mask, image_features):
    """Fused Pallas equivalent of CLIP.forward (text encoder + projections +
    normalized embeds + logits).  `image_features` stands in for the image
    backbone output (ResNet/ViT not translated)."""
    B, S = input_ids.shape
    # embedding gathers are data-dependent -> plain JAX glue
    we = params["word_emb"][input_ids]                    # [B, S, H]
    pe = params["pos_emb"][:S][None, :, :]                # [1, S, H]
    x2 = (we + pe).reshape(B * S, HIDDEN).astype(jnp.float32)
    mask = attention_mask.astype(jnp.float32)

    flat = [params["emb_ln_g"], params["emb_ln_b"]]
    for layer in params["layers"]:
        flat += [layer[name] for name in LAYER_PARAM_NAMES]
    flat += [params["Wt1"], params["Wt2"], image_features,
             params["Wi1"], params["Wi2"], params["t_prime"]]

    n_in = 2 + len(flat)
    logits_per_text, text_embeds, image_embeds = pl.pallas_call(
        functools.partial(_clip_kernel, batch=B, seq=S, n_layers=N_LAYERS),
        out_shape=(
            jax.ShapeDtypeStruct((B, B), jnp.float32),
            jax.ShapeDtypeStruct((B, PROJ), jnp.float32),
            jax.ShapeDtypeStruct((B, PROJ), jnp.float32),
        ),
        in_specs=[_vmem_spec()] * n_in,
        out_specs=(_vmem_spec(), _vmem_spec(), _vmem_spec()),
    )(x2, mask, *flat)

    logits_per_image = logits_per_text.T                  # cheap JAX glue
    return logits_per_image, logits_per_text, text_embeds, image_embeds


# ------------------------------ parameters ------------------------------------
def init_params(key):
    std = 0.02
    keys = jax.random.split(key, 4 + N_LAYERS)
    params = {
        "word_emb": std * jax.random.normal(keys[0], (VOCAB, HIDDEN), jnp.float32),
        "pos_emb": std * jax.random.normal(keys[1], (MAX_POS, HIDDEN), jnp.float32),
        "emb_ln_g": jnp.ones((1, HIDDEN), jnp.float32),
        "emb_ln_b": jnp.zeros((1, HIDDEN), jnp.float32),
        "layers": [],
        # projection heads: Linear -> ReLU -> Linear, bias-free (per spec)
        "Wt1": std * jax.random.normal(keys[2], (HIDDEN, HIDDEN), jnp.float32),
        "Wt2": std * jax.random.normal(jax.random.fold_in(keys[2], 1),
                                       (HIDDEN, PROJ), jnp.float32),
        "Wi1": std * jax.random.normal(keys[3], (IMG_FEAT, IMG_FEAT), jnp.float32),
        "Wi2": std * jax.random.normal(jax.random.fold_in(keys[3], 1),
                                       (IMG_FEAT, PROJ), jnp.float32),
        "t_prime": jnp.full((1, 1), math.log(1.0), jnp.float32),  # init_tau
        # note: self.b is only used in contrastive_loss (not in forward's logits)
    }
    for l in range(N_LAYERS):
        lk = jax.random.split(keys[4 + l], 4)
        params["layers"].append({
            "Wqkv": std * jax.random.normal(lk[0], (HIDDEN, 3 * HIDDEN), jnp.float32),
            "bqkv": jnp.zeros((1, 3 * HIDDEN), jnp.float32),
            "Wo": std * jax.random.normal(lk[1], (HIDDEN, HIDDEN), jnp.float32),
            "bo": jnp.zeros((1, HIDDEN), jnp.float32),
            "ln1_g": jnp.ones((1, HIDDEN), jnp.float32),
            "ln1_b": jnp.zeros((1, HIDDEN), jnp.float32),
            "W1": std * jax.random.normal(lk[2], (HIDDEN, FFN), jnp.float32),
            "b1": jnp.zeros((1, FFN), jnp.float32),
            "W2": std * jax.random.normal(lk[3], (FFN, HIDDEN), jnp.float32),
            "b2": jnp.zeros((1, HIDDEN), jnp.float32),
            "ln2_g": jnp.ones((1, HIDDEN), jnp.float32),
            "ln2_b": jnp.zeros((1, HIDDEN), jnp.float32),
        })
    return params


# --------------------------------- main ----------------------------------------
if __name__ == "__main__":
    key = jax.random.PRNGKey(0)
    pkey, ikey, imkey = jax.random.split(key, 3)
    params = init_params(pkey)

    B, S = 2, 8
    input_ids = jax.random.randint(ikey, (B, S), 0, VOCAB, dtype=jnp.int32)
    attention_mask = jnp.array([[1, 1, 1, 1, 1, 1, 1, 1],
                                [1, 1, 1, 1, 1, 0, 0, 0]], dtype=jnp.float32)
    # TODO(synk): the ResNet18/34/50 / ViT image backbone has no toy Pallas
    # translation here; its [B, feature_dim] output is stood in by fixed random
    # features (the image projection head IS implemented in the fused kernel).
    image_features = jax.random.normal(imkey, (B, IMG_FEAT), jnp.float32)

    outs = clip_forward(params, input_ids, attention_mask, image_features)
    outs = jax.block_until_ready(outs)
    logits_per_image, logits_per_text, text_embeds, image_embeds = outs

    assert logits_per_text.shape == (B, B), logits_per_text.shape
    assert logits_per_image.shape == (B, B), logits_per_image.shape
    assert text_embeds.shape == (B, PROJ), text_embeds.shape
    assert image_embeds.shape == (B, PROJ), image_embeds.shape
    for a in outs:
        assert bool(jnp.all(jnp.isfinite(a)))
    print("KERNEL_OK")
</pallas_src>

<mosaic_0001>
module attributes {stable_mosaic.version = 11 : i64} {
  func.func @_clip_kernel(%arg0: memref<16x32xf32, #tpu.memory_space<vmem>>, %arg1: memref<2x8xf32, #tpu.memory_space<vmem>>, %arg2: memref<1x32xf32, #tpu.memory_space<vmem>>, %arg3: memref<1x32xf32, #tpu.memory_space<vmem>>, %arg4: memref<32x96xf32, #tpu.memory_space<vmem>>, %arg5: memref<1x96xf32, #tpu.memory_space<vmem>>, %arg6: memref<32x32xf32, #tpu.memory_space<vmem>>, %arg7: memref<1x32xf32, #tpu.memory_space<vmem>>, %arg8: memref<1x32xf32, #tpu.memory_space<vmem>>, %arg9: memref<1x32xf32, #tpu.memory_space<vmem>>, %arg10: memref<32x64xf32, #tpu.memory_space<vmem>>, %arg11: memref<1x64xf32, #tpu.memory_space<vmem>>, %arg12: memref<64x32xf32, #tpu.memory_space<vmem>>, %arg13: memref<1x32xf32, #tpu.memory_space<vmem>>, %arg14: memref<1x32xf32, #tpu.memory_space<vmem>>, %arg15: memref<1x32xf32, #tpu.memory_space<vmem>>, %arg16: memref<32x96xf32, #tpu.memory_space<vmem>>, %arg17: memref<1x96xf32, #tpu.memory_space<vmem>>, %arg18: memref<32x32xf32, #tpu.memory_space<vmem>>, %arg19: memref<1x32xf32, #tpu.memory_space<vmem>>, %arg20: memref<1x32xf32, #tpu.memory_space<vmem>>, %arg21: memref<1x32xf32, #tpu.memory_space<vmem>>, %arg22: memref<32x64xf32, #tpu.memory_space<vmem>>, %arg23: memref<1x64xf32, #tpu.memory_space<vmem>>, %arg24: memref<64x32xf32, #tpu.memory_space<vmem>>, %arg25: memref<1x32xf32, #tpu.memory_space<vmem>>, %arg26: memref<1x32xf32, #tpu.memory_space<vmem>>, %arg27: memref<1x32xf32, #tpu.memory_space<vmem>>, %arg28: memref<32x32xf32, #tpu.memory_space<vmem>>, %arg29: memref<32x16xf32, #tpu.memory_space<vmem>>, %arg30: memref<2x32xf32, #tpu.memory_space<vmem>>, %arg31: memref<32x32xf32, #tpu.memory_space<vmem>>, %arg32: memref<32x16xf32, #tpu.memory_space<vmem>>, %arg33: memref<1x1xf32, #tpu.memory_space<vmem>>, %arg34: memref<2x2xf32, #tpu.memory_space<vmem>>, %arg35: memref<2x16xf32, #tpu.memory_space<vmem>>, %arg36: memref<2x16xf32, #tpu.memory_space<vmem>>) attributes {dimension_semantics = [], scalar_prefetch = 0 : i64, scratch_operands = 0 : i64, tpu.core_type = #tpu.core_type<tc>} {
    %c0 = arith.constant 0 : index
    %c0_0 = arith.constant 0 : index
    %0 = vector.load %arg0[%c0, %c0_0] : memref<16x32xf32, #tpu.memory_space<vmem>>, vector<16x32xf32>
    %c0_1 = arith.constant 0 : index
    %c0_2 = arith.constant 0 : index
    %1 = vector.load %arg2[%c0_1, %c0_2] : memref<1x32xf32, #tpu.memory_space<vmem>>, vector<1x32xf32>
    %c0_3 = arith.constant 0 : index
    %c0_4 = arith.constant 0 : index
    %2 = vector.load %arg3[%c0_3, %c0_4] : memref<1x32xf32, #tpu.memory_space<vmem>>, vector<1x32xf32>
    %cst = arith.constant dense<0.000000e+00> : vector<16xf32>
    %3 = vector.multi_reduction <add>, %0, %cst [1] : vector<16x32xf32> to vector<16xf32>
    %4 = vector.shape_cast %3 : vector<16xf32> to vector<16x1xf32>
    %cst_5 = arith.constant 3.200000e+01 : f32
    %5 = vector.broadcast %cst_5 : f32 to vector<16x1xf32>
    %6 = arith.divf %4, %5 : vector<16x1xf32>
    %7 = vector.broadcast %6 : vector<16x1xf32> to vector<16x32xf32>
    %8 = arith.subf %0, %7 : vector<16x32xf32>
    %9 = arith.mulf %8, %8 : vector<16x32xf32>
    %cst_6 = arith.constant dense<0.000000e+00> : vector<16xf32>
    %10 = vector.multi_reduction <add>, %9, %cst_6 [1] : vector<16x32xf32> to vector<16xf32>
    %11 = vector.shape_cast %10 : vector<16xf32> to vector<16x1xf32>
    %cst_7 = arith.constant 3.200000e+01 : f32
    %12 = vector.broadcast %cst_7 : f32 to vector<16x1xf32>
    %13 = arith.divf %11, %12 : vector<16x1xf32>
    %14 = vector.broadcast %6 : vector<16x1xf32> to vector<16x32xf32>
    %15 = arith.subf %0, %14 : vector<16x32xf32>
    %cst_8 = arith.constant 9.99999996E-13 : f32
    %16 = vector.broadcast %cst_8 : f32 to vector<16x1xf32>
    %17 = arith.addf %13, %16 : vector<16x1xf32>
    %18 = math.rsqrt %17 : vector<16x1xf32>
    %19 = vector.broadcast %18 : vector<16x1xf32> to vector<16x32xf32>
    %20 = arith.mulf %15, %19 : vector<16x32xf32>
    %21 = vector.broadcast %1 : vector<1x32xf32> to vector<16x32xf32>
    %22 = arith.mulf %20, %21 : vector<16x32xf32>
    %23 = vector.broadcast %2 : vector<1x32xf32> to vector<16x32xf32>
    %24 = arith.addf %22, %23 : vector<16x32xf32>
    %c0_9 = arith.constant 0 : index
    %c0_10 = arith.constant 0 : index
    %25 = vector.load %arg1[%c0_9, %c0_10] : memref<2x8xf32, #tpu.memory_space<vmem>>, vector<2x8xf32>
    %cst_11 = arith.constant 1.000000e+00 : f32
    %26 = vector.broadcast %cst_11 : f32 to vector<2x8xf32>
    %27 = arith.subf %26, %25 : vector<2x8xf32>
    %28 = vector.shape_cast %27 : vector<2x8xf32> to vector<2x1x8xf32>
    %cst_12 = arith.constant -1.000000e+09 : f32
    %29 = vector.broadcast %cst_12 : f32 to vector<2x1x8xf32>
    %30 = arith.mulf %28, %29 : vector<2x1x8xf32>
    %31 = tpu.concatenate %30, %30, %30, %30 in 0 : vector<2x1x8xf32>, vector<2x1x8xf32>, vector<2x1x8xf32>, vector<2x1x8xf32> -> vector<8x1x8xf32>
    %c0_13 = arith.constant 0 : index
    %c0_14 = arith.constant 0 : index
    %32 = vector.load %arg4[%c0_13, %c0_14] : memref<32x96xf32, #tpu.memory_space<vmem>>, vector<32x96xf32>
    %cst_15 = arith.constant dense<0.000000e+00> : vector<16x96xf32>
    %33 = tpu.matmul %24, %32, %cst_15 {dimension_numbers = #tpu.dot_dimension_numbers<[1], [0], [0], [1], [0, 0, 1, 1], [], []>} : vector<16x32xf32>, vector<32x96xf32>, vector<16x96xf32> -> vector<16x96xf32>
    %c0_16 = arith.constant 0 : index
    %c0_17 = arith.constant 0 : index
    %34 = vector.load %arg5[%c0_16, %c0_17] : memref<1x96xf32, #tpu.memory_space<vmem>>, vector<1x96xf32>
    %35 = vector.broadcast %34 : vector<1x96xf32> to vector<16x96xf32>
    %36 = arith.addf %33, %35 : vector<16x96xf32>
    %37 = vector.extract_strided_slice %36 {offsets = [0, 0], sizes = [8, 8], strides = [1, 1]} : vector<16x96xf32> to vector<8x8xf32>
    %38 = vector.shape_cast %37 : vector<8x8xf32> to vector<1x8x8xf32>
    %39 = vector.extract_strided_slice %36 {offsets = [8, 0], sizes = [8, 8], strides = [1, 1]} : vector<16x96xf32> to vector<8x8xf32>
    %40 = vector.shape_cast %39 : vector<8x8xf32> to vector<1x8x8xf32>
    %41 = vector.extract_strided_slice %36 {offsets = [0, 8], sizes = [8, 8], strides = [1, 1]} : vector<16x96xf32> to vector<8x8xf32>
    %42 = vector.shape_cast %41 : vector<8x8xf32> to vector<1x8x8xf32>
    %43 = vector.extract_strided_slice %36 {offsets = [8, 8], sizes = [8, 8], strides = [1, 1]} : vector<16x96xf32> to vector<8x8xf32>
    %44 = vector.shape_cast %43 : vector<8x8xf32> to vector<1x8x8xf32>
    %45 = vector.extract_strided_slice %36 {offsets = [0, 16], sizes = [8, 8], strides = [1, 1]} : vector<16x96xf32> to vector<8x8xf32>
    %46 = vector.shape_cast %45 : vector<8x8xf32> to vector<1x8x8xf32>
    %47 = vector.extract_strided_slice %36 {offsets = [8, 16], sizes = [8, 8], strides = [1, 1]} : vector<16x96xf32> to vector<8x8xf32>
    %48 = vector.shape_cast %47 : vector<8x8xf32> to vector<1x8x8xf32>
    %49 = vector.extract_strided_slice %36 {offsets = [0, 24], sizes = [8, 8], strides = [1, 1]} : vector<16x96xf32> to vector<8x8xf32>
    %50 = vector.shape_cast %49 : vector<8x8xf32> to vector<1x8x8xf32>
    %51 = vector.extract_strided_slice %36 {offsets = [8, 24], sizes = [8, 8], strides = [1, 1]} : vector<16x96xf32> to vector<8x8xf32>
    %52 = vector.shape_cast %51 : vector<8x8xf32> to vector<1x8x8xf32>
    %53 = tpu.concatenate %38, %40, %42, %44, %46, %48, %50, %52 in 0 : vector<1x8x8xf32>, vector<1x8x8xf32>, vector<1x8x8xf32>, vector<1x8x8xf32>, vector<1x8x8xf32>, vector<1x8x8xf32>, vector<1x8x8xf32>, vector<1x8x8xf32> -> vector<8x8x8xf32>
    %54 = vector.extract_strided_slice %36 {offsets = [0, 32], sizes = [8, 8], strides = [1, 1]} : vector<16x96xf32> to vector<8x8xf32>
    %55 = vector.shape_cast %54 : vector<8x8xf32> to vector<1x8x8xf32>
    %56 = vector.extract_strided_slice %36 {offsets = [8, 32], sizes = [8, 8], strides = [1, 1]} : vector<16x96xf32> to vector<8x8xf32>
    %57 = vector.shape_cast %56 : vector<8x8xf32> to vector<1x8x8xf32>
    %58 = vector.extract_strided_slice %36 {offsets = [0, 40], sizes = [8, 8], strides = [1, 1]} : vector<16x96xf32> to vector<8x8xf32>
    %59 = vector.shape_cast %58 : vector<8x8xf32> to vector<1x8x8xf32>
    %60 = vector.extract_strided_slice %36 {offsets = [8, 40], sizes = [8, 8], strides = [1, 1]} : vector<16x96xf32> to vector<8x8xf32>
    %61 = vector.shape_cast %60 : vector<8x8xf32> to vector<1x8x8xf32>
    %62 = vector.extract_strided_slice %36 {offsets = [0, 48], sizes = [8, 8], strides = [1, 1]} : vector<16x96xf32> to vector<8x8xf32>
    %63 = vector.shape_cast %62 : vector<8x8xf32> to vector<1x8x8xf32>
    %64 = vector.extract_strided_slice %36 {offsets = [8, 48], sizes = [8, 8], strides = [1, 1]} : vector<16x96xf32> to vector<8x8xf32>
    %65 = vector.shape_cast %64 : vector<8x8xf32> to vector<1x8x8xf32>
    %66 = vector.extract_strided_slice %36 {offsets = [0, 56], sizes = [8, 8], strides = [1, 1]} : vector<16x96xf32> to vector<8x8xf32>
    %67 = vector.shape_cast %66 : vector<8x8xf32> to vector<1x8x8xf32>
    %68 = vector.extract_strided_slice %36 {offsets = [8, 56], sizes = [8, 8], strides = [1, 1]} : vector<16x96xf32> to vector<8x8xf32>
    %69 = vector.shape_cast %68 : vector<8x8xf32> to vector<1x8x8xf32>
    %70 = tpu.concatenate %55, %57, %59, %61, %63, %65, %67, %69 in 0 : vector<1x8x8xf32>, vector<1x8x8xf32>, vector<1x8x8xf32>, vector<1x8x8xf32>, vector<1x8x8xf32>, vector<1x8x8xf32>, vector<1x8x8xf32>, vector<1x8x8xf32> -> vector<8x8x8xf32>
    %71 = vector.extract_strided_slice %36 {offsets = [0, 64], sizes = [8, 8], strides = [1, 1]} : vector<16x96xf32> to vector<8x8xf32>
    %72 = vector.shape_cast %71 : vector<8x8xf32> to vector<1x8x8xf32>
    %73 = vector.extract_strided_slice %36 {offsets = [8, 64], sizes = [8, 8], strides = [1, 1]} : vector<16x96xf32> to vector<8x8xf32>
    %74 = vector.shape_cast %73 : vector<8x8xf32> to vector<1x8x8xf32>
    %75 = vector.extract_strided_slice %36 {offsets = [0, 72], sizes = [8, 8], strides = [1, 1]} : vector<16x96xf32> to vector<8x8xf32>
    %76 = vector.shape_cast %75 : vector<8x8xf32> to vector<1x8x8xf32>
    %77 = vector.extract_strided_slice %36 {offsets = [8, 72], sizes = [8, 8], strides = [1, 1]} : vector<16x96xf32> to vector<8x8xf32>
    %78 = vector.shape_cast %77 : vector<8x8xf32> to vector<1x8x8xf32>
    %79 = vector.extract_strided_slice %36 {offsets = [0, 80], sizes = [8, 8], strides = [1, 1]} : vector<16x96xf32> to vector<8x8xf32>
    %80 = vector.shape_cast %79 : vector<8x8xf32> to vector<1x8x8xf32>
    %81 = vector.extract_strided_slice %36 {offsets = [8, 80], sizes = [8, 8], strides = [1, 1]} : vector<16x96xf32> to vector<8x8xf32>
    %82 = vector.shape_cast %81 : vector<8x8xf32> to vector<1x8x8xf32>
    %83 = vector.extract_strided_slice %36 {offsets = [0, 88], sizes = [8, 8], strides = [1, 1]} : vector<16x96xf32> to vector<8x8xf32>
    %84 = vector.shape_cast %83 : vector<8x8xf32> to vector<1x8x8xf32>
    %85 = vector.extract_strided_slice %36 {offsets = [8, 88], sizes = [8, 8], strides = [1, 1]} : vector<16x96xf32> to vector<8x8xf32>
    %86 = vector.shape_cast %85 : vector<8x8xf32> to vector<1x8x8xf32>
    %87 = tpu.concatenate %72, %74, %76, %78, %80, %82, %84, %86 in 0 : vector<1x8x8xf32>, vector<1x8x8xf32>, vector<1x8x8xf32>, vector<1x8x8xf32>, vector<1x8x8xf32>, vector<1x8x8xf32>, vector<1x8x8xf32>, vector<1x8x8xf32> -> vector<8x8x8xf32>
    "tpu.trace_start"() <{level = 10 : i32, message = "bqd,bkd->bqk"}> : () -> ()
    %cst_18 = arith.constant dense<0.000000e+00> : vector<8x8x8xf32>
    %88 = tpu.matmul %53, %70, %cst_18 {dimension_numbers = #tpu.dot_dimension_numbers<[2], [2], [1], [1], [0, 0, 0, 1, 1, 1], [0], [0]>} : vector<8x8x8xf32>, vector<8x8x8xf32>, vector<8x8x8xf32> -> vector<8x8x8xf32>
    "tpu.trace_stop"() : () -> ()
    %cst_19 = arith.constant 0.353553385 : f32
    %89 = vector.broadcast %cst_19 : f32 to vector<8x8x8xf32>
    %90 = arith.mulf %88, %89 : vector<8x8x8xf32>
    %91 = vector.broadcast %31 : vector<8x1x8xf32> to vector<8x8x8xf32>
    %92 = arith.addf %90, %91 : vector<8x8x8xf32>
    %cst_20 = arith.constant dense<0xFF800000> : vector<8x8xf32>
    %93 = vector.multi_reduction <maximumf>, %92, %cst_20 [2] : vector<8x8x8xf32> to vector<8x8xf32>
    %94 = vector.shape_cast %93 : vector<8x8xf32> to vector<8x8x1xf32>
    %95 = vector.broadcast %94 : vector<8x8x1xf32> to vector<8x8x8xf32>
    %96 = arith.subf %92, %95 : vector<8x8x8xf32>
    %97 = math.exp %96 : vector<8x8x8xf32>
    %cst_21 = arith.constant dense<0.000000e+00> : vector<8x8xf32>
    %98 = vector.multi_reduction <add>, %97, %cst_21 [2] : vector<8x8x8xf32> to vector<8x8xf32>
    %99 = vector.shape_cast %98 : vector<8x8xf32> to vector<8x8x1xf32>
    %100 = tpu.reciprocal %99 {approx = true} : vector<8x8x1xf32> -> vector<8x8x1xf32>
    %101 = vector.broadcast %100 : vector<8x8x1xf32> to vector<8x8x8xf32>
    %102 = arith.mulf %97, %101 : vector<8x8x8xf32>
    "tpu.trace_start"() <{level = 10 : i32, message = "bqk,bkd->bqd"}> : () -> ()
    %cst_22 = arith.constant dense<0.000000e+00> : vector<8x8x8xf32>
    %103 = tpu.matmul %102, %87, %cst_22 {dimension_numbers = #tpu.dot_dimension_numbers<[2], [1], [1], [2], [0, 0, 0, 1, 1, 2], [0], [0]>} : vector<8x8x8xf32>, vector<8x8x8xf32>, vector<8x8x8xf32> -> vector<8x8x8xf32>
    "tpu.trace_stop"() : () -> ()
    %104 = vector.extract_strided_slice %103 {offsets = [0, 0, 0], sizes = [1, 8, 8], strides = [1, 1, 1]} : vector<8x8x8xf32> to vector<1x8x8xf32>
    %105 = vector.shape_cast %104 : vector<1x8x8xf32> to vector<8x8xf32>
    %106 = vector.extract_strided_slice %103 {offsets = [2, 0, 0], sizes = [1, 8, 8], strides = [1, 1, 1]} : vector<8x8x8xf32> to vector<1x8x8xf32>
    %107 = vector.shape_cast %106 : vector<1x8x8xf32> to vector<8x8xf32>
    %108 = vector.extract_strided_slice %103 {offsets = [4, 0, 0], sizes = [1, 8, 8], strides = [1, 1, 1]} : vector<8x8x8xf32> to vector<1x8x8xf32>
    %109 = vector.shape_cast %108 : vector<1x8x8xf32> to vector<8x8xf32>
    %110 = vector.extract_strided_slice %103 {offsets = [6, 0, 0], sizes = [1, 8, 8], strides = [1, 1, 1]} : vector<8x8x8xf32> to vector<1x8x8xf32>
    %111 = vector.shape_cast %110 : vector<1x8x8xf32> to vector<8x8xf32>
    %112 = tpu.concatenate %105, %107, %109, %111 in 1 : vector<8x8xf32>, vector<8x8xf32>, vector<8x8xf32>, vector<8x8xf32> -> vector<8x32xf32>
    %113 = vector.extract_strided_slice %103 {offsets = [1, 0, 0], sizes = [1, 8, 8], strides = [1, 1, 1]} : vector<8x8x8xf32> to vector<1x8x8xf32>
    %114 = vector.shape_cast %113 : vector<1x8x8xf32> to vector<8x8xf32>
    %115 = vector.extract_strided_slice %103 {offsets = [3, 0, 0], sizes = [1, 8, 8], strides = [1, 1, 1]} : vector<8x8x8xf32> to vector<1x8x8xf32>
    %116 = vector.shape_cast %115 : vector<1x8x8xf32> to vector<8x8xf32>
    %117 = vector.extract_strided_slice %103 {offsets = [5, 0, 0], sizes = [1, 8, 8], strides = [1, 1, 1]} : vector<8x8x8xf32> to vector<1x8x8xf32>
    %118 = vector.shape_cast %117 : vector<1x8x8xf32> to vector<8x8xf32>
    %119 = vector.extract_strided_slice %103 {offsets = [7, 0, 0], sizes = [1, 8, 8], strides = [1, 1, 1]} : vector<8x8x8xf32> to vector<1x8x8xf32>
    %120 = vector.shape_cast %119 : vector<1x8x8xf32> to vector<8x8xf32>
    %121 = tpu.concatenate %114, %116, %118, %120 in 1 : vector<8x8xf32>, vector<8x8xf32>, vector<8x8xf32>, vector<8x8xf32> -> vector<8x32xf32>
    %122 = tpu.concatenate %112, %121 in 0 : vector<8x32xf32>, vector<8x32xf32> -> vector<16x32xf32>
    %c0_23 = arith.constant 0 : index
    %c0_24 = arith.constant 0 : index
    %123 = vector.load %arg6[%c0_23, %c0_24] : memref<32x32xf32, #tpu.memory_space<vmem>>, vector<32x32xf32>
    %cst_25 = arith.constant dense<0.000000e+00> : vector<16x32xf32>
    %124 = tpu.matmul %122, %123, %cst_25 {dimension_numbers = #tpu.dot_dimension_numbers<[1], [0], [0], [1], [0, 0, 1, 1], [], []>} : vector<16x32xf32>, vector<32x32xf32>, vector<16x32xf32> -> vector<16x32xf32>
    %c0_26 = arith.constant 0 : index
    %c0_27 = arith.constant 0 : index
    %125 = vector.load %arg7[%c0_26, %c0_27] : memref<1x32xf32, #tpu.memory_space<vmem>>, vector<1x32xf32>
    %126 = vector.broadcast %125 : vector<1x32xf32> to vector<16x32xf32>
    %127 = arith.addf %124, %126 : vector<16x32xf32>
    %128 = arith.addf %127, %24 : vector<16x32xf32>
    %c0_28 = arith.constant 0 : index
    %c0_29 = arith.constant 0 : index
    %129 = vector.load %arg8[%c0_28, %c0_29] : memref<1x32xf32, #tpu.memory_space<vmem>>, vector<1x32xf32>
    %c0_30 = arith.constant 0 : index
    %c0_31 = arith.constant 0 : index
    %130 = vector.load %arg9[%c0_30, %c0_31] : memref<1x32xf32, #tpu.memory_space<vmem>>, vector<1x32xf32>
    %cst_32 = arith.constant dense<0.000000e+00> : vector<16xf32>
    %131 = vector.multi_reduction <add>, %128, %cst_32 [1] : vector<16x32xf32> to vector<16xf32>
    %132 = vector.shape_cast %131 : vector<16xf32> to vector<16x1xf32>
    %cst_33 = arith.constant 3.200000e+01 : f32
    %133 = vector.broadcast %cst_33 : f32 to vector<16x1xf32>
    %134 = arith.divf %132, %133 : vector<16x1xf32>
    %135 = vector.broadcast %134 : vector<16x1xf32> to vector<16x32xf32>
    %136 = arith.subf %128, %135 : vector<16x32xf32>
    %137 = arith.mulf %136, %136 : vector<16x32xf32>
    %cst_34 = arith.constant dense<0.000000e+00> : vector<16xf32>
    %138 = vector.multi_reduction <add>, %137, %cst_34 [1] : vector<16x32xf32> to vector<16xf32>
    %139 = vector.shape_cast %138 : vector<16xf32> to vector<16x1xf32>
    %cst_35 = arith.constant 3.200000e+01 : f32
    %140 = vector.broadcast %cst_35 : f32 to vector<16x1xf32>
    %141 = arith.divf %139, %140 : vector<16x1xf32>
    %142 = vector.broadcast %134 : vector<16x1xf32> to vector<16x32xf32>
    %143 = arith.subf %128, %142 : vector<16x32xf32>
    %cst_36 = arith.constant 9.99999996E-13 : f32
    %144 = vector.broadcast %cst_36 : f32 to vector<16x1xf32>
    %145 = arith.addf %141, %144 : vector<16x1xf32>
    %146 = math.rsqrt %145 : vector<16x1xf32>
    %147 = vector.broadcast %146 : vector<16x1xf32> to vector<16x32xf32>
    %148 = arith.mulf %143, %147 : vector<16x32xf32>
    %149 = vector.broadcast %129 : vector<1x32xf32> to vector<16x32xf32>
    %150 = arith.mulf %148, %149 : vector<16x32xf32>
    %151 = vector.broadcast %130 : vector<1x32xf32> to vector<16x32xf32>
    %152 = arith.addf %150, %151 : vector<16x32xf32>
    %c0_37 = arith.constant 0 : index
    %c0_38 = arith.constant 0 : index
    %153 = vector.load %arg10[%c0_37, %c0_38] : memref<32x64xf32, #tpu.memory_space<vmem>>, vector<32x64xf32>
    %cst_39 = arith.constant dense<0.000000e+00> : vector<16x64xf32>
    %154 = tpu.matmul %152, %153, %cst_39 {dimension_numbers = #tpu.dot_dimension_numbers<[1], [0], [0], [1], [0, 0, 1, 1], [], []>} : vector<16x32xf32>, vector<32x64xf32>, vector<16x64xf32> -> vector<16x64xf32>
    %c0_40 = arith.constant 0 : index
    %c0_41 = arith.constant 0 : index
    %155 = vector.load %arg11[%c0_40, %c0_41] : memref<1x64xf32, #tpu.memory_space<vmem>>, vector<1x64xf32>
    %156 = vector.broadcast %155 : vector<1x64xf32> to vector<16x64xf32>
    %157 = arith.addf %154, %156 : vector<16x64xf32>
    %cst_42 = arith.constant 5.000000e-01 : f32
    %158 = vector.broadcast %cst_42 : f32 to vector<16x64xf32>
    %159 = arith.mulf %158, %157 : vector<16x64xf32>
    %cst_43 = arith.constant 4.471500e-02 : f32
    %160 = vector.broadcast %cst_43 : f32 to vector<16x64xf32>
    %161 = arith.mulf %160, %157 : vector<16x64xf32>
    %162 = arith.mulf %161, %157 : vector<16x64xf32>
    %163 = arith.mulf %162, %157 : vector<16x64xf32>
    %164 = arith.addf %157, %163 : vector<16x64xf32>
    %cst_44 = arith.constant 0.797884583 : f32
    %165 = vector.broadcast %cst_44 : f32 to vector<16x64xf32>
    %166 = arith.mulf %165, %164 : vector<16x64xf32>
    %167 = math.tanh %166 : vector<16x64xf32>
    %cst_45 = arith.constant 1.000000e+00 : f32
    %168 = vector.broadcast %cst_45 : f32 to vector<16x64xf32>
    %169 = arith.addf %168, %167 : vector<16x64xf32>
    %170 = arith.mulf %159, %169 : vector<16x64xf32>
    %c0_46 = arith.constant 0 : index
    %c0_47 = arith.constant 0 : index
    %171 = vector.load %arg12[%c0_46, %c0_47] : memref<64x32xf32, #tpu.memory_space<vmem>>, vector<64x32xf32>
    %cst_48 = arith.constant dense<0.000000e+00> : vector<16x32xf32>
    %172 = tpu.matmul %170, %171, %cst_48 {dimension_numbers = #tpu.dot_dimension_numbers<[1], [0], [0], [1], [0, 0, 1, 1], [], []>} : vector<16x64xf32>, vector<64x32xf32>, vector<16x32xf32> -> vector<16x32xf32>
    %c0_49 = arith.constant 0 : index
    %c0_50 = arith.constant 0 : index
    %173 = vector.load %arg13[%c0_49, %c0_50] : memref<1x32xf32, #tpu.memory_space<vmem>>, vector<1x32xf32>
    %174 = vector.broadcast %173 : vector<1x32xf32> to vector<16x32xf32>
    %175 = arith.addf %172, %174 : vector<16x32xf32>
    %176 = arith.addf %175, %152 : vector<16x32xf32>
    %c0_51 = arith.constant 0 : index
    %c0_52 = arith.constant 0 : index
    %177 = vector.load %arg14[%c0_51, %c0_52] : memref<1x32xf32, #tpu.memory_space<vmem>>, vector<1x32xf32>
    %c0_53 = arith.constant 0 : index
    %c0_54 = arith.constant 0 : index
    %178 = vector.load %arg15[%c0_53, %c0_54] : memref<1x32xf32, #tpu.memory_space<vmem>>, vector<1x32xf32>
    %cst_55 = arith.constant dense<0.000000e+00> : vector<16xf32>
    %179 = vector.multi_reduction <add>, %176, %cst_55 [1] : vector<16x32xf32> to vector<16xf32>
    %180 = vector.shape_cast %179 : vector<16xf32> to vector<16x1xf32>
    %cst_56 = arith.constant 3.200000e+01 : f32
    %181 = vector.broadcast %cst_56 : f32 to vector<16x1xf32>
    %182 = arith.divf %180, %181 : vector<16x1xf32>
    %183 = vector.broadcast %182 : vector<16x1xf32> to vector<16x32xf32>
    %184 = arith.subf %176, %183 : vector<16x32xf32>
    %185 = arith.mulf %184, %184 : vector<16x32xf32>
    %cst_57 = arith.constant dense<0.000000e+00> : vector<16xf32>
    %186 = vector.multi_reduction <add>, %185, %cst_57 [1] : vector<16x32xf32> to vector<16xf32>
    %187 = vector.shape_cast %186 : vector<16xf32> to vector<16x1xf32>
    %cst_58 = arith.constant 3.200000e+01 : f32
    %188 = vector.broadcast %cst_58 : f32 to vector<16x1xf32>
    %189 = arith.divf %187, %188 : vector<16x1xf32>
    %190 = vector.broadcast %182 : vector<16x1xf32> to vector<16x32xf32>
    %191 = arith.subf %176, %190 : vector<16x32xf32>
    %cst_59 = arith.constant 9.99999996E-13 : f32
    %192 = vector.broadcast %cst_59 : f32 to vector<16x1xf32>
    %193 = arith.addf %189, %192 : vector<16x1xf32>
    %194 = math.rsqrt %193 : vector<16x1xf32>
    %195 = vector.broadcast %194 : vector<16x1xf32> to vector<16x32xf32>
    %196 = arith.mulf %191, %195 : vector<16x32xf32>
    %197 = vector.broadcast %177 : vector<1x32xf32> to vector<16x32xf32>
    %198 = arith.mulf %196, %197 : vector<16x32xf32>
    %199 = vector.broadcast %178 : vector<1x32xf32> to vector<16x32xf32>
    %200 = arith.addf %198, %199 : vector<16x32xf32>
    %c0_60 = arith.constant 0 : index
    %c0_61 = arith.constant 0 : index
    %201 = vector.load %arg16[%c0_60, %c0_61] : memref<32x96xf32, #tpu.memory_space<vmem>>, vector<32x96xf32>
    %cst_62 = arith.constant dense<0.000000e+00> : vector<16x96xf32>
    %202 = tpu.matmul %200, %201, %cst_62 {dimension_numbers = #tpu.dot_dimension_numbers<[1], [0], [0], [1], [0, 0, 1, 1], [], []>} : vector<16x32xf32>, vector<32x96xf32>, vector<16x96xf32> -> vector<16x96xf32>
    %c0_63 = arith.constant 0 : index
    %c0_64 = arith.constant 0 : index
    %203 = vector.load %arg17[%c0_63, %c0_64] : memref<1x96xf32, #tpu.memory_space<vmem>>, vector<1x96xf32>
    %204 = vector.broadcast %203 : vector<1x96xf32> to vector<16x96xf32>
    %205 = arith.addf %202, %204 : vector<16x96xf32>
    %206 = vector.extract_strided_slice %205 {offsets = [0, 0], sizes = [8, 8], strides = [1, 1]} : vector<16x96xf32> to vector<8x8xf32>
    %207 = vector.shape_cast %206 : vector<8x8xf32> to vector<1x8x8xf32>
    %208 = vector.extract_strided_slice %205 {offsets = [8, 0], sizes = [8, 8], strides = [1, 1]} : vector<16x96xf32> to vector<8x8xf32>
    %209 = vector.shape_cast %208 : vector<8x8xf32> to vector<1x8x8xf32>
    %210 = vector.extract_strided_slice %205 {offsets = [0, 8], sizes = [8, 8], strides = [1, 1]} : vector<16x96xf32> to vector<8x8xf32>
    %211 = vector.shape_cast %210 : vector<8x8xf32> to vector<1x8x8xf32>
    %212 = vector.extract_strided_slice %205 {offsets = [8, 8], sizes = [8, 8], strides = [1, 1]} : vector<16x96xf32> to vector<8x8xf32>
    %213 = vector.shape_cast %212 : vector<8x8xf32> to vector<1x8x8xf32>
    %214 = vector.extract_strided_slice %205 {offsets = [0, 16], sizes = [8, 8], strides = [1, 1]} : vector<16x96xf32> to vector<8x8xf32>
    %215 = vector.shape_cast %214 : vector<8x8xf32> to vector<1x8x8xf32>
    %216 = vector.extract_strided_slice %205 {offsets = [8, 16], sizes = [8, 8], strides = [1, 1]} : vector<16x96xf32> to vector<8x8xf32>
    %217 = vector.shape_cast %216 : vector<8x8xf32> to vector<1x8x8xf32>
    %218 = vector.extract_strided_slice %205 {offsets = [0, 24], sizes = [8, 8], strides = [1, 1]} : vector<16x96xf32> to vector<8x8xf32>
    %219 = vector.shape_cast %218 : vector<8x8xf32> to vector<1x8x8xf32>
    %220 = vector.extract_strided_slice %205 {offsets = [8, 24], sizes = [8, 8], strides = [1, 1]} : vector<16x96xf32> to vector<8x8xf32>
    %221 = vector.shape_cast %220 : vector<8x8xf32> to vector<1x8x8xf32>
    %222 = tpu.concatenate %207, %209, %211, %213, %215, %217, %219, %221 in 0 : vector<1x8x8xf32>, vector<1x8x8xf32>, vector<1x8x8xf32>, vector<1x8x8xf32>, vector<1x8x8xf32>, vector<1x8x8xf32>, vector<1x8x8xf32>, vector<1x8x8xf32> -> vector<8x8x8xf32>
    %223 = vector.extract_strided_slice %205 {offsets = [0, 32], sizes = [8, 8], strides = [1, 1]} : vector<16x96xf32> to vector<8x8xf32>
    %224 = vector.shape_cast %223 : vector<8x8xf32> to vector<1x8x8xf32>
    %225 = vector.extract_strided_slice %205 {offsets = [8, 32], sizes = [8, 8], strides = [1, 1]} : vector<16x96xf32> to vector<8x8xf32>
    %226 = vector.shape_cast %225 : vector<8x8xf32> to vector<1x8x8xf32>
    %227 = vector.extract_strided_slice %205 {offsets = [0, 40], sizes = [8, 8], strides = [1, 1]} : vector<16x96xf32> to vector<8x8xf32>
    %228 = vector.shape_cast %227 : vector<8x8xf32> to vector<1x8x8xf32>
    %229 = vector.extract_strided_slice %205 {offsets = [8, 40], sizes = [8, 8], strides = [1, 1]} : vector<16x96xf32> to vector<8x8xf32>
    %230 = vector.shape_cast %229 : vector<8x8xf32> to vector<1x8x8xf32>
    %231 = vector.extract_strided_slice %205 {offsets = [0, 48], sizes = [8, 8], strides = [1, 1]} : vector<16x96xf32> to vector<8x8xf32>
    %232 = vector.shape_cast %231 : vector<8x8xf32> to vector<1x8x8xf32>
    %233 = vector.extract_strided_slice %205 {offsets = [8, 48], sizes = [8, 8], strides = [1, 1]} : vector<16x96xf32> to vector<8x8xf32>
    %234 = vector.shape_cast %233 : vector<8x8xf32> to vector<1x8x8xf32>
    %235 = vector.extract_strided_slice %205 {offsets = [0, 56], sizes = [8, 8], strides = [1, 1]} : vector<16x96xf32> to vector<8x8xf32>
    %236 = vector.shape_cast %235 : vector<8x8xf32> to vector<1x8x8xf32>
    %237 = vector.extract_strided_slice %205 {offsets = [8, 56], sizes = [8, 8], strides = [1, 1]} : vector<16x96xf32> to vector<8x8xf32>
    %238 = vector.shape_cast %237 : vector<8x8xf32> to vector<1x8x8xf32>
    %239 = tpu.concatenate %224, %226, %228, %230, %232, %234, %236, %238 in 0 : vector<1x8x8xf32>, vector<1x8x8xf32>, vector<1x8x8xf32>, vector<1x8x8xf32>, vector<1x8x8xf32>, vector<1x8x8xf32>, vector<1x8x8xf32>, vector<1x8x8xf32> -> vector<8x8x8xf32>
    %240 = vector.extract_strided_slice %205 {offsets = [0, 64], sizes = [8, 8], strides = [1, 1]} : vector<16x96xf32> to vector<8x8xf32>
    %241 = vector.shape_cast %240 : vector<8x8xf32> to vector<1x8x8xf32>
    %242 = vector.extract_strided_slice %205 {offsets = [8, 64], sizes = [8, 8], strides = [1, 1]} : vector<16x96xf32> to vector<8x8xf32>
    %243 = vector.shape_cast %242 : vector<8x8xf32> to vector<1x8x8xf32>
    %244 = vector.extract_strided_slice %205 {offsets = [0, 72], sizes = [8, 8], strides = [1, 1]} : vector<16x96xf32> to vector<8x8xf32>
    %245 = vector.shape_cast %244 : vector<8x8xf32> to vector<1x8x8xf32>
    %246 = vector.extract_strided_slice %205 {offsets = [8, 72], sizes = [8, 8], strides = [1, 1]} : vector<16x96xf32> to vector<8x8xf32>
    %247 = vector.shape_cast %246 : vector<8x8xf32> to vector<1x8x8xf32>
    %248 = vector.extract_strided_slice %205 {offsets = [0, 80], sizes = [8, 8], strides = [1, 1]} : vector<16x96xf32> to vector<8x8xf32>
    %249 = vector.shape_cast %248 : vector<8x8xf32> to vector<1x8x8xf32>
    %250 = vector.extract_strided_slice %205 {offsets = [8, 80], sizes = [8, 8], strides = [1, 1]} : vector<16x96xf32> to vector<8x8xf32>
    %251 = vector.shape_cast %250 : vector<8x8xf32> to vector<1x8x8xf32>
    %252 = vector.extract_strided_slice %205 {offsets = [0, 88], sizes = [8, 8], strides = [1, 1]} : vector<16x96xf32> to vector<8x8xf32>
    %253 = vector.shape_cast %252 : vector<8x8xf32> to vector<1x8x8xf32>
    %254 = vector.extract_strided_slice %205 {offsets = [8, 88], sizes = [8, 8], strides = [1, 1]} : vector<16x96xf32> to vector<8x8xf32>
    %255 = vector.shape_cast %254 : vector<8x8xf32> to vector<1x8x8xf32>
    %256 = tpu.concatenate %241, %243, %245, %247, %249, %251, %253, %255 in 0 : vector<1x8x8xf32>, vector<1x8x8xf32>, vector<1x8x8xf32>, vector<1x8x8xf32>, vector<1x8x8xf32>, vector<1x8x8xf32>, vector<1x8x8xf32>, vector<1x8x8xf32> -> vector<8x8x8xf32>
    "tpu.trace_start"() <{level = 10 : i32, message = "bqd,bkd->bqk"}> : () -> ()
    %cst_65 = arith.constant dense<0.000000e+00> : vector<8x8x8xf32>
    %257 = tpu.matmul %222, %239, %cst_65 {dimension_numbers = #tpu.dot_dimension_numbers<[2], [2], [1], [1], [0, 0, 0, 1, 1, 1], [0], [0]>} : vector<8x8x8xf32>, vector<8x8x8xf32>, vector<8x8x8xf32> -> vector<8x8x8xf32>
    "tpu.trace_stop"() : () -> ()
    %cst_66 = arith.constant 0.353553385 : f32
    %258 = vector.broadcast %cst_66 : f32 to vector<8x8x8xf32>
    %259 = arith.mulf %257, %258 : vector<8x8x8xf32>
    %260 = vector.broadcast %31 : vector<8x1x8xf32> to vector<8x8x8xf32>
    %261 = arith.addf %259, %260 : vector<8x8x8xf32>
    %cst_67 = arith.constant dense<0xFF800000> : vector<8x8xf32>
    %262 = vector.multi_reduction <maximumf>, %261, %cst_67 [2] : vector<8x8x8xf32> to vector<8x8xf32>
    %263 = vector.shape_cast %262 : vector<8x8xf32> to vector<8x8x1xf32>
    %264 = vector.broadcast %263 : vector<8x8x1xf32> to vector<8x8x8xf32>
    %265 = arith.subf %261, %264 : vector<8x8x8xf32>
    %266 = math.exp %265 : vector<8x8x8xf32>
    %cst_68 = arith.constant dense<0.000000e+00> : vector<8x8xf32>
    %267 = vector.multi_reduction <add>, %266, %cst_68 [2] : vector<8x8x8xf32> to vector<8x8xf32>
    %268 = vector.shape_cast %267 : vector<8x8xf32> to vector<8x8x1xf32>
    %269 = tpu.reciprocal %268 {approx = true} : vector<8x8x1xf32> -> vector<8x8x1xf32>
    %270 = vector.broadcast %269 : vector<8x8x1xf32> to vector<8x8x8xf32>
    %271 = arith.mulf %266, %270 : vector<8x8x8xf32>
    "tpu.trace_start"() <{level = 10 : i32, message = "bqk,bkd->bqd"}> : () -> ()
    %cst_69 = arith.constant dense<0.000000e+00> : vector<8x8x8xf32>
    %272 = tpu.matmul %271, %256, %cst_69 {dimension_numbers = #tpu.dot_dimension_numbers<[2], [1], [1], [2], [0, 0, 0, 1, 1, 2], [0], [0]>} : vector<8x8x8xf32>, vector<8x8x8xf32>, vector<8x8x8xf32> -> vector<8x8x8xf32>
    "tpu.trace_stop"() : () -> ()
    %273 = vector.extract_strided_slice %272 {offsets = [0, 0, 0], sizes = [1, 8, 8], strides = [1, 1, 1]} : vector<8x8x8xf32> to vector<1x8x8xf32>
    %274 = vector.shape_cast %273 : vector<1x8x8xf32> to vector<8x8xf32>
    %275 = vector.extract_strided_slice %272 {offsets = [2, 0, 0], sizes = [1, 8, 8], strides = [1, 1, 1]} : vector<8x8x8xf32> to vector<1x8x8xf32>
    %276 = vector.shape_cast %275 : vector<1x8x8xf32> to vector<8x8xf32>
    %277 = vector.extract_strided_slice %272 {offsets = [4, 0, 0], sizes = [1, 8, 8], strides = [1, 1, 1]} : vector<8x8x8xf32> to vector<1x8x8xf32>
    %278 = vector.shape_cast %277 : vector<1x8x8xf32> to vector<8x8xf32>
    %279 = vector.extract_strided_slice %272 {offsets = [6, 0, 0], sizes = [1, 8, 8], strides = [1, 1, 1]} : vector<8x8x8xf32> to vector<1x8x8xf32>
    %280 = vector.shape_cast %279 : vector<1x8x8xf32> to vector<8x8xf32>
    %281 = tpu.concatenate %274, %276, %278, %280 in 1 : vector<8x8xf32>, vector<8x8xf32>, vector<8x8xf32>, vector<8x8xf32> -> vector<8x32xf32>
    %282 = vector.extract_strided_slice %272 {offsets = [1, 0, 0], sizes = [1, 8, 8], strides = [1, 1, 1]} : vector<8x8x8xf32> to vector<1x8x8xf32>
    %283 = vector.shape_cast %282 : vector<1x8x8xf32> to vector<8x8xf32>
    %284 = vector.extract_strided_slice %272 {offsets = [3, 0, 0], sizes = [1, 8, 8], strides = [1, 1, 1]} : vector<8x8x8xf32> to vector<1x8x8xf32>
    %285 = vector.shape_cast %284 : vector<1x8x8xf32> to vector<8x8xf32>
    %286 = vector.extract_strided_slice %272 {offsets = [5, 0, 0], sizes = [1, 8, 8], strides = [1, 1, 1]} : vector<8x8x8xf32> to vector<1x8x8xf32>
    %287 = vector.shape_cast %286 : vector<1x8x8xf32> to vector<8x8xf32>
    %288 = vector.extract_strided_slice %272 {offsets = [7, 0, 0], sizes = [1, 8, 8], strides = [1, 1, 1]} : vector<8x8x8xf32> to vector<1x8x8xf32>
    %289 = vector.shape_cast %288 : vector<1x8x8xf32> to vector<8x8xf32>
    %290 = tpu.concatenate %283, %285, %287, %289 in 1 : vector<8x8xf32>, vector<8x8xf32>, vector<8x8xf32>, vector<8x8xf32> -> vector<8x32xf32>
    %291 = tpu.concatenate %281, %290 in 0 : vector<8x32xf32>, vector<8x32xf32> -> vector<16x32xf32>
    %c0_70 = arith.constant 0 : index
    %c0_71 = arith.constant 0 : index
    %292 = vector.load %arg18[%c0_70, %c0_71] : memref<32x32xf32, #tpu.memory_space<vmem>>, vector<32x32xf32>
    %cst_72 = arith.constant dense<0.000000e+00> : vector<16x32xf32>
    %293 = tpu.matmul %291, %292, %cst_72 {dimension_numbers = #tpu.dot_dimension_numbers<[1], [0], [0], [1], [0, 0, 1, 1], [], []>} : vector<16x32xf32>, vector<32x32xf32>, vector<16x32xf32> -> vector<16x32xf32>
    %c0_73 = arith.constant 0 : index
    %c0_74 = arith.constant 0 : index
    %294 = vector.load %arg19[%c0_73, %c0_74] : memref<1x32xf32, #tpu.memory_space<vmem>>, vector<1x32xf32>
    %295 = vector.broadcast %294 : vector<1x32xf32> to vector<16x32xf32>
    %296 = arith.addf %293, %295 : vector<16x32xf32>
    %297 = arith.addf %296, %200 : vector<16x32xf32>
    %c0_75 = arith.constant 0 : index
    %c0_76 = arith.constant 0 : index
    %298 = vector.load %arg20[%c0_75, %c0_76] : memref<1x32xf32, #tpu.memory_space<vmem>>, vector<1x32xf32>
    %c0_77 = arith.constant 0 : index
    %c0_78 = arith.constant 0 : index
    %299 = vector.load %arg21[%c0_77, %c0_78] : memref<1x32xf32, #tpu.memory_space<vmem>>, vector<1x32xf32>
    %cst_79 = arith.constant dense<0.000000e+00> : vector<16xf32>
    %300 = vector.multi_reduction <add>, %297, %cst_79 [1] : vector<16x32xf32> to vector<16xf32>
    %301 = vector.shape_cast %300 : vector<16xf32> to vector<16x1xf32>
    %cst_80 = arith.constant 3.200000e+01 : f32
    %302 = vector.broadcast %cst_80 : f32 to vector<16x1xf32>
    %303 = arith.divf %301, %302 : vector<16x1xf32>
    %304 = vector.broadcast %303 : vector<16x1xf32> to vector<16x32xf32>
    %305 = arith.subf %297, %304 : vector<16x32xf32>
    %306 = arith.mulf %305, %305 : vector<16x32xf32>
    %cst_81 = arith.constant dense<0.000000e+00> : vector<16xf32>
    %307 = vector.multi_reduction <add>, %306, %cst_81 [1] : vector<16x32xf32> to vector<16xf32>
    %308 = vector.shape_cast %307 : vector<16xf32> to vector<16x1xf32>
    %cst_82 = arith.constant 3.200000e+01 : f32
    %309 = vector.broadcast %cst_82 : f32 to vector<16x1xf32>
    %310 = arith.divf %308, %309 : vector<16x1xf32>
    %311 = vector.broadcast %303 : vector<16x1xf32> to vector<16x32xf32>
    %312 = arith.subf %297, %311 : vector<16x32xf32>
    %cst_83 = arith.constant 9.99999996E-13 : f32
    %313 = vector.broadcast %cst_83 : f32 to vector<16x1xf32>
    %314 = arith.addf %310, %313 : vector<16x1xf32>
    %315 = math.rsqrt %314 : vector<16x1xf32>
    %316 = vector.broadcast %315 : vector<16x1xf32> to vector<16x32xf32>
    %317 = arith.mulf %312, %316 : vector<16x32xf32>
    %318 = vector.broadcast %298 : vector<1x32xf32> to vector<16x32xf32>
    %319 = arith.mulf %317, %318 : vector<16x32xf32>
    %320 = vector.broadcast %299 : vector<1x32xf32> to vector<16x32xf32>
    %321 = arith.addf %319, %320 : vector<16x32xf32>
    %c0_84 = arith.constant 0 : index
    %c0_85 = arith.constant 0 : index
    %322 = vector.load %arg22[%c0_84, %c0_85] : memref<32x64xf32, #tpu.memory_space<vmem>>, vector<32x64xf32>
    %cst_86 = arith.constant dense<0.000000e+00> : vector<16x64xf32>
    %323 = tpu.matmul %321, %322, %cst_86 {dimension_numbers = #tpu.dot_dimension_numbers<[1], [0], [0], [1], [0, 0, 1, 1], [], []>} : vector<16x32xf32>, vector<32x64xf32>, vector<16x64xf32> -> vector<16x64xf32>
    %c0_87 = arith.constant 0 : index
    %c0_88 = arith.constant 0 : index
    %324 = vector.load %arg23[%c0_87, %c0_88] : memref<1x64xf32, #tpu.memory_space<vmem>>, vector<1x64xf32>
    %325 = vector.broadcast %324 : vector<1x64xf32> to vector<16x64xf32>
    %326 = arith.addf %323, %325 : vector<16x64xf32>
    %cst_89 = arith.constant 5.000000e-01 : f32
    %327 = vector.broadcast %cst_89 : f32 to vector<16x64xf32>
    %328 = arith.mulf %327, %326 : vector<16x64xf32>
    %cst_90 = arith.constant 4.471500e-02 : f32
    %329 = vector.broadcast %cst_90 : f32 to vector<16x64xf32>
    %330 = arith.mulf %329, %326 : vector<16x64xf32>
    %331 = arith.mulf %330, %326 : vector<16x64xf32>
    %332 = arith.mulf %331, %326 : vector<16x64xf32>
    %333 = arith.addf %326, %332 : vector<16x64xf32>
    %cst_91 = arith.constant 0.797884583 : f32
    %334 = vector.broadcast %cst_91 : f32 to vector<16x64xf32>
    %335 = arith.mulf %334, %333 : vector<16x64xf32>
    %336 = math.tanh %335 : vector<16x64xf32>
    %cst_92 = arith.constant 1.000000e+00 : f32
    %337 = vector.broadcast %cst_92 : f32 to vector<16x64xf32>
    %338 = arith.addf %337, %336 : vector<16x64xf32>
    %339 = arith.mulf %328, %338 : vector<16x64xf32>
    %c0_93 = arith.constant 0 : index
    %c0_94 = arith.constant 0 : index
    %340 = vector.load %arg24[%c0_93, %c0_94] : memref<64x32xf32, #tpu.memory_space<vmem>>, vector<64x32xf32>
    %cst_95 = arith.constant dense<0.000000e+00> : vector<16x32xf32>
    %341 = tpu.matmul %339, %340, %cst_95 {dimension_numbers = #tpu.dot_dimension_numbers<[1], [0], [0], [1], [0, 0, 1, 1], [], []>} : vector<16x64xf32>, vector<64x32xf32>, vector<16x32xf32> -> vector<16x32xf32>
    %c0_96 = arith.constant 0 : index
    %c0_97 = arith.constant 0 : index
    %342 = vector.load %arg25[%c0_96, %c0_97] : memref<1x32xf32, #tpu.memory_space<vmem>>, vector<1x32xf32>
    %343 = vector.broadcast %342 : vector<1x32xf32> to vector<16x32xf32>
    %344 = arith.addf %341, %343 : vector<16x32xf32>
    %345 = arith.addf %344, %321 : vector<16x32xf32>
    %c0_98 = arith.constant 0 : index
    %c0_99 = arith.constant 0 : index
    %346 = vector.load %arg26[%c0_98, %c0_99] : memref<1x32xf32, #tpu.memory_space<vmem>>, vector<1x32xf32>
    %c0_100 = arith.constant 0 : index
    %c0_101 = arith.constant 0 : index
    %347 = vector.load %arg27[%c0_100, %c0_101] : memref<1x32xf32, #tpu.memory_space<vmem>>, vector<1x32xf32>
    %cst_102 = arith.constant dense<0.000000e+00> : vector<16xf32>
    %348 = vector.multi_reduction <add>, %345, %cst_102 [1] : vector<16x32xf32> to vector<16xf32>
    %349 = vector.shape_cast %348 : vector<16xf32> to vector<16x1xf32>
    %cst_103 = arith.constant 3.200000e+01 : f32
    %350 = vector.broadcast %cst_103 : f32 to vector<16x1xf32>
    %351 = arith.divf %349, %350 : vector<16x1xf32>
    %352 = vector.broadcast %351 : vector<16x1xf32> to vector<16x32xf32>
    %353 = arith.subf %345, %352 : vector<16x32xf32>
    %354 = arith.mulf %353, %353 : vector<16x32xf32>
    %cst_104 = arith.constant dense<0.000000e+00> : vector<16xf32>
    %355 = vector.multi_reduction <add>, %354, %cst_104 [1] : vector<16x32xf32> to vector<16xf32>
    %356 = vector.shape_cast %355 : vector<16xf32> to vector<16x1xf32>
    %cst_105 = arith.constant 3.200000e+01 : f32
    %357 = vector.broadcast %cst_105 : f32 to vector<16x1xf32>
    %358 = arith.divf %356, %357 : vector<16x1xf32>
    %359 = vector.broadcast %351 : vector<16x1xf32> to vector<16x32xf32>
    %360 = arith.subf %345, %359 : vector<16x32xf32>
    %cst_106 = arith.constant 9.99999996E-13 : f32
    %361 = vector.broadcast %cst_106 : f32 to vector<16x1xf32>
    %362 = arith.addf %358, %361 : vector<16x1xf32>
    %363 = math.rsqrt %362 : vector<16x1xf32>
    %364 = vector.broadcast %363 : vector<16x1xf32> to vector<16x32xf32>
    %365 = arith.mulf %360, %364 : vector<16x32xf32>
    %366 = vector.broadcast %346 : vector<1x32xf32> to vector<16x32xf32>
    %367 = arith.mulf %365, %366 : vector<16x32xf32>
    %368 = vector.broadcast %347 : vector<1x32xf32> to vector<16x32xf32>
    %369 = arith.addf %367, %368 : vector<16x32xf32>
    %370 = vector.extract_strided_slice %369 {offsets = [0, 0], sizes = [8, 32], strides = [1, 1]} : vector<16x32xf32> to vector<8x32xf32>
    %cst_107 = arith.constant dense<0.000000e+00> : vector<32xf32>
    %371 = vector.multi_reduction <add>, %370, %cst_107 [0] : vector<8x32xf32> to vector<32xf32>
    %372 = vector.shape_cast %371 : vector<32xf32> to vector<1x32xf32>
    %cst_108 = arith.constant 8.000000e+00 : f32
    %373 = vector.broadcast %cst_108 : f32 to vector<1x32xf32>
    %374 = arith.divf %372, %373 : vector<1x32xf32>
    %375 = vector.extract_strided_slice %369 {offsets = [8, 0], sizes = [8, 32], strides = [1, 1]} : vector<16x32xf32> to vector<8x32xf32>
    %cst_109 = arith.constant dense<0.000000e+00> : vector<32xf32>
    %376 = vector.multi_reduction <add>, %375, %cst_109 [0] : vector<8x32xf32> to vector<32xf32>
    %377 = vector.shape_cast %376 : vector<32xf32> to vector<1x32xf32>
    %cst_110 = arith.constant 8.000000e+00 : f32
    %378 = vector.broadcast %cst_110 : f32 to vector<1x32xf32>
    %379 = arith.divf %377, %378 : vector<1x32xf32>
    %380 = tpu.concatenate %374, %379 in 0 : vector<1x32xf32>, vector<1x32xf32> -> vector<2x32xf32>
    %c0_111 = arith.constant 0 : index
    %c0_112 = arith.constant 0 : index
    %381 = vector.load %arg28[%c0_111, %c0_112] : memref<32x32xf32, #tpu.memory_space<vmem>>, vector<32x32xf32>
    %cst_113 = arith.constant dense<0.000000e+00> : vector<2x32xf32>
    %382 = tpu.matmul %380, %381, %cst_113 {dimension_numbers = #tpu.dot_dimension_numbers<[1], [0], [0], [1], [0, 0, 1, 1], [], []>} : vector<2x32xf32>, vector<32x32xf32>, vector<2x32xf32> -> vector<2x32xf32>
    %cst_114 = arith.constant 0.000000e+00 : f32
    %383 = vector.broadcast %cst_114 : f32 to vector<2x32xf32>
    %384 = arith.maximumf %382, %383 : vector<2x32xf32>
    %c0_115 = arith.constant 0 : index
    %c0_116 = arith.constant 0 : index
    %385 = vector.load %arg29[%c0_115, %c0_116] : memref<32x16xf32, #tpu.memory_space<vmem>>, vector<32x16xf32>
    %cst_117 = arith.constant dense<0.000000e+00> : vector<2x16xf32>
    %386 = tpu.matmul %384, %385, %cst_117 {dimension_numbers = #tpu.dot_dimension_numbers<[1], [0], [0], [1], [0, 0, 1, 1], [], []>} : vector<2x32xf32>, vector<32x16xf32>, vector<2x16xf32> -> vector<2x16xf32>
    %c0_118 = arith.constant 0 : index
    %c0_119 = arith.constant 0 : index
    %387 = vector.load %arg30[%c0_118, %c0_119] : memref<2x32xf32, #tpu.memory_space<vmem>>, vector<2x32xf32>
    %c0_120 = arith.constant 0 : index
    %c0_121 = arith.constant 0 : index
    %388 = vector.load %arg31[%c0_120, %c0_121] : memref<32x32xf32, #tpu.memory_space<vmem>>, vector<32x32xf32>
    %cst_122 = arith.constant dense<0.000000e+00> : vector<2x32xf32>
    %389 = tpu.matmul %387, %388, %cst_122 {dimension_numbers = #tpu.dot_dimension_numbers<[1], [0], [0], [1], [0, 0, 1, 1], [], []>} : vector<2x32xf32>, vector<32x32xf32>, vector<2x32xf32> -> vector<2x32xf32>
    %cst_123 = arith.constant 0.000000e+00 : f32
    %390 = vector.broadcast %cst_123 : f32 to vector<2x32xf32>
    %391 = arith.maximumf %389, %390 : vector<2x32xf32>
    %c0_124 = arith.constant 0 : index
    %c0_125 = arith.constant 0 : index
    %392 = vector.load %arg32[%c0_124, %c0_125] : memref<32x16xf32, #tpu.memory_space<vmem>>, vector<32x16xf32>
    %cst_126 = arith.constant dense<0.000000e+00> : vector<2x16xf32>
    %393 = tpu.matmul %391, %392, %cst_126 {dimension_numbers = #tpu.dot_dimension_numbers<[1], [0], [0], [1], [0, 0, 1, 1], [], []>} : vector<2x32xf32>, vector<32x16xf32>, vector<2x16xf32> -> vector<2x16xf32>
    %394 = arith.mulf %386, %386 : vector<2x16xf32>
    %cst_127 = arith.constant dense<0.000000e+00> : vector<2xf32>
    %395 = vector.multi_reduction <add>, %394, %cst_127 [1] : vector<2x16xf32> to vector<2xf32>
    %396 = vector.shape_cast %395 : vector<2xf32> to vector<2x1xf32>
    %397 = math.rsqrt %396 : vector<2x1xf32>
    %398 = vector.broadcast %397 : vector<2x1xf32> to vector<2x16xf32>
    %399 = arith.mulf %386, %398 : vector<2x16xf32>
    %400 = arith.mulf %393, %393 : vector<2x16xf32>
    %cst_128 = arith.constant dense<0.000000e+00> : vector<2xf32>
    %401 = vector.multi_reduction <add>, %400, %cst_128 [1] : vector<2x16xf32> to vector<2xf32>
    %402 = vector.shape_cast %401 : vector<2xf32> to vector<2x1xf32>
    %403 = math.rsqrt %402 : vector<2x1xf32>
    %404 = vector.broadcast %403 : vector<2x1xf32> to vector<2x16xf32>
    %405 = arith.mulf %393, %404 : vector<2x16xf32>
    "tpu.trace_start"() <{level = 10 : i32, message = "tp,ip->ti"}> : () -> ()
    %cst_129 = arith.constant dense<0.000000e+00> : vector<2x2xf32>
    %406 = tpu.matmul %399, %405, %cst_129 {dimension_numbers = #tpu.dot_dimension_numbers<[1], [1], [0], [0], [0, 0, 1, 0], [], []>} : vector<2x16xf32>, vector<2x16xf32>, vector<2x2xf32> -> vector<2x2xf32>
    "tpu.trace_stop"() : () -> ()
    %c0_130 = arith.constant 0 : index
    %c0_131 = arith.constant 0 : index
    %407 = vector.load %arg33[%c0_130, %c0_131] : memref<1x1xf32, #tpu.memory_space<vmem>>, vector<1x1xf32>
    %408 = math.exp %407 : vector<1x1xf32>
    %409 = vector.broadcast %408 : vector<1x1xf32> to vector<2x2xf32>
    %410 = arith.mulf %406, %409 : vector<2x2xf32>
    %c0_132 = arith.constant 0 : index
    %c0_133 = arith.constant 0 : index
    %411 = vector.load %arg34[%c0_132, %c0_133] : memref<2x2xf32, #tpu.memory_space<vmem>>, vector<2x2xf32>
    tpu.vector_store %arg34[%c0_132, %c0_133], %410 {strides = array<i32>} : memref<2x2xf32, #tpu.memory_space<vmem>>, vector<2x2xf32>,
    %c0_134 = arith.constant 0 : index
    %c0_135 = arith.constant 0 : index
    %412 = vector.load %arg35[%c0_134, %c0_135] : memref<2x16xf32, #tpu.memory_space<vmem>>, vector<2x16xf32>
    tpu.vector_store %arg35[%c0_134, %c0_135], %399 {strides = array<i32>} : memref<2x16xf32, #tpu.memory_space<vmem>>, vector<2x16xf32>,
    %c0_136 = arith.constant 0 : index
    %c0_137 = arith.constant 0 : index
    %413 = vector.load %arg36[%c0_136, %c0_137] : memref<2x16xf32, #tpu.memory_space<vmem>>, vector<2x16xf32>
    tpu.vector_store %arg36[%c0_136, %c0_137], %405 {strides = array<i32>} : memref<2x16xf32, #tpu.memory_space<vmem>>, vector<2x16xf32>,
    return
  }
}

</mosaic_0001>

<bundles_post_ra>
// kernel: tpu_custom_call.1
= control target key start
LH: loop header
LB: loop body
LE: loop exit
PB: predicated region body
PF: predicated region fallthrough
CT: control target
= control target key end

     0   :  { %s3018_s6 = smov 1   ;;  %s3019_s10 = smov 2   ;;  %s3758_s0 = inlined_call_operand.smem [shape: u32[37], index: -1, kind: input, shape index: {}] }
   0x1   :  { %s3088_s5 = sld [smem:[%s3758_s0]]   ;;  %s3020_s14 = smov 3  }
   0x2   :  { %s3093_s9 = sld [smem:[%s3758_s0 + %s3018_s6]]   ;;  %s3021_s18 = smov 4  }
   0x3   :  { %s3098_s13 = sld [smem:[%s3758_s0 + %s3019_s10]]   ;;  %s3022_s22 = smov 5  }
   0x4   :  { %s3103_s17 = sld [smem:[%s3758_s0 + %s3020_s14]]   ;;  %s3023_s26 = smov 6  }
   0x5   :  { %s3108_s21 = sld [smem:[%s3758_s0 + %s3021_s18]]   ;;  %s3024_s30 = smov 7  }
   0x6   :  { %s3113_s25 = sld [smem:[%s3758_s0 + %s3022_s22]]   ;;  %s3025_s4 = smov 8  }
   0x7   :  { %s3118_s29 = sld [smem:[%s3758_s0 + %s3023_s26]]   ;;  %s3026_s10 = smov 9  }
   0x8   :  { %3768 = sst [smem:[#allocation33_spill]] %s3093_s9  ;;  %s3027_s15 = smov 10  }
   0x9   :  { %s3123_s3 = sld [smem:[%s3758_s0 + %s3024_s30]]   ;;  %s3028_s20 = smov 11  }
   0xa   :  { %s3128_s8 = sld [smem:[%s3758_s0 + %s3025_s4]]   ;;  %s3029_s26 = smov 12  }
   0xb   :  { %s3133_s14 = sld [smem:[%s3758_s0 + %s3026_s10]]   ;;  %s3030_s1 = smov 13  }
   0xc   :  { %s3138_s19 = sld [smem:[%s3758_s0 + %s3027_s15]]   ;;  %s3031_s7 = smov 14  }
   0xd   :  { %3769 = sst [smem:[#allocation34_spill]] %s3118_s29  ;;  %s3032_s15 = smov 15  }
   0xe   :  { %s3143_s24 = sld [smem:[%s3758_s0 + %s3028_s20]]   ;;  %s3033_s22 = smov 16  }
   0xf   :  { %3770 = sst [smem:[#allocation35_spill]] %s3123_s3  ;;  %s3034_s28 = smov 17  }
  0x10   :  { %3771 = sst [smem:[#allocation36_spill]] %s3128_s8  ;;  %s3051_s10 = smov 34  }
  0x11   :  { %s3148_s30 = sld [smem:[%s3758_s0 + %s3029_s26]]   ;;  %s3052_s16 = smov 35  }
  0x12   :  { %3772 = sst [smem:[#allocation37_spill]] %s3138_s19  ;;  %s3053_s23 = smov 36  }
  0x13   :  { %s3153_s6 = sld [smem:[%s3758_s0 + %s3030_s1]]  }
  0x14   :  { %3773 = sst [smem:[#allocation38_spill]] %s3143_s24 }
  0x15   :  { %s3158_s12 = sld [smem:[%s3758_s0 + %s3031_s7]]   ;;  %s3035_s7 = smov 18  }
  0x16   :  { %s3163_s20 = sld [smem:[%s3758_s0 + %s3032_s15]]   ;;  %s3036_s15 = smov 19  }
  0x17   :  { %3774 = sst [smem:[#allocation39_spill]] %s3148_s30 }
  0x18   :  { %s3168_s27 = sld [smem:[%s3758_s0 + %s3033_s22]]   ;;  %s3037_s22 = smov 20  }
  0x19   :  { %3775 = sst [smem:[#allocation40_spill]] %s3153_s6 }
  0x1a   :  { %s3173_s4 = sld [smem:[%s3758_s0 + %s3034_s28]]   ;;  %s3038_s28 = smov 21  }
  0x1b   :  { %3776 = sst [smem:[#allocation41_spill]] %s3158_s12 }
  0x1c   :  { %3777 = sst [smem:[#allocation42_spill]] %s3163_s20 }
  0x1d   :  { %s3178_s12 = sld [smem:[%s3758_s0 + %s3035_s7]]   ;;  %s3039_s7 = smov 22  }
  0x1e   :  { %3778 = sst [smem:[#allocation43_spill]] %s3168_s27 }
  0x1f   :  { %s3183_s20 = sld [smem:[%s3758_s0 + %s3036_s15]]   ;;  %s3040_s15 = smov 23  }
  0x20   :  { %3779 = sst [smem:[#allocation44_spill]] %s3173_s4 }
  0x21   :  { %s3188_s27 = sld [smem:[%s3758_s0 + %s3037_s22]]   ;;  %s3041_s22 = smov 24  }
  0x22   :  { %s3193_s4 = sld [smem:[%s3758_s0 + %s3038_s28]]   ;;  %s3042_s28 = smov 25  }
  0x23   :  { %3780 = sst [smem:[#allocation45_spill]] %s3178_s12 }
  0x24   :  { %s3198_s12 = sld [smem:[%s3758_s0 + %s3039_s7]]   ;;  %s3043_s7 = smov 26  }
  0x25   :  { %3781 = sst [smem:[#allocation46_spill]] %s3183_s20 }
  0x26   :  { %s3203_s20 = sld [smem:[%s3758_s0 + %s3040_s15]]   ;;  %s3044_s15 = smov 27  }
  0x27   :  { %s3208_s6 = sld [smem:[%s3758_s0 + %s3041_s22]]   ;;  %s3045_s22 = smov 28  }
  0x28   :  { %s3213_s24 = sld [smem:[%s3758_s0 + %s3042_s28]]   ;;  %s3046_s28 = smov 29  }
  0x29   :  { %s3223_s30 = sld [smem:[%s3758_s0 + %s3044_s15]]   ;;  %s3048_s15 = smov 31  }
  0x2a   :  { %3782 = sst [smem:[#allocation47_spill]] %s3198_s12 }
  0x2b   :  { %s3218_s12 = sld [smem:[%s3758_s0 + %s3043_s7]]   ;;  %s3047_s7 = smov 30  }
  0x2c   :  { %s3233_s8 = sld [smem:[%s3758_s0 + %s3046_s28]]   ;;  %s3050_s28 = smov 33  }
  0x2d   :  { %3783 = sst [smem:[#allocation48_spill]] %s3208_s6 }
  0x2e   :  { %s3228_s6 = sld [smem:[%s3758_s0 + %s3045_s22]]   ;;  %s3049_s22 = smov 32  }
  0x2f   :  { %s3238_s19 = sld [smem:[%s3758_s0 + %s3047_s7]]  }
  0x30   :  { %s3243_s3 = sld [smem:[%s3758_s0 + %s3048_s15]]  }
  0x31   :  { %s3248_s29 = sld [smem:[%s3758_s0 + %s3049_s22]]  }
  0x32   :  { %3784 = sst [smem:[#allocation49_spill]] %s3233_s8 }
  0x33   :  { %s2379_s8 = sld [smem:[%s3758_s0 + %s3050_s28]]  }
  0x34   :  { %s3261_s9 = sld [smem:[%s3758_s0 + %s3052_s16]]  }
  0x35   :  { %3785 = sst [smem:[#allocation50_spill]] %s3238_s19 }
  0x36   :  { %s3256_s19 = sld [smem:[%s3758_s0 + %s3051_s10]]  }
  0x37   :  { %3786 = sst [smem:[#allocation51_spill]] %s3248_s29 }
  0x38   :  { %s3266_s29 = sld [smem:[%s3758_s0 + %s3053_s23]]  }
  0x39   :  { %v79_v0 = vstv %s2379_s8 }
  0x3a   :  { %80 = vst [vmem:[#allocation2] sm:$0x1] %v79_v0 }
  0x3b   :  { %81 = vsyncpa [#allocation4], 0 }
  0x3c   :  { %82 = vsyncpa [#allocation7], 0 }
  0x3d   :  { %83 = vsyncpa [#allocation10], 0 }
  0x3e   :  { %84 = vsyncpa [#allocation13], 0 }
  0x3f   :  { %85 = vsyncpa [#allocation16], 0 }
  0x40   :  { %86 = vsyncpa [#allocation19], 0 }
  0x41   :  { %87 = vsyncpa [#allocation5], 0  ;;  %s109_s28 = sshll.u32 %s3103_s17, 4  ;;  %s110_s28 = int_to_ptr.hbm [resolvable:$true] %s109_s28 }
  0x42   :  { %88 = vsyncpa [#allocation23], 0  ;;  %s3054_s1 = smov [#allocation6]   ;;  %s161_s0 = sshll.u32 %s3188_s27, 4  ;;  %s162_s0 = int_to_ptr.hbm [resolvable:$true] %s161_s0 }
  0x43   :  { %s111_s2 = sshll.u32 %s3054_s1, 4  ;;  %s2666_s8 = sshra.s32 %s110_s28, 4  ;;  %s112_s2 = int_to_ptr.vmem [resolvable:$true] %s111_s2  ;;  %s2667_s8 = int_to_ptr.hbm [resolvable:$true] %s2666_s8 }
  0x44   :  { %s2668_s10 = scalar_lea.hbm %s2667_s8, 1  ;;  %s2670_s7 = scalar_lea.hbm %s3103_s17, 1 }
  0x45   :  { %p2669_p0 = scmp.ne.s32.totalorder %s2667_s8, %s2668_s10  ;;  %p2671_p1 = scmp.lt.s32.totalorder %s2667_s8, %s3103_s17 }
  0x46   :  { %p2672_p2 = scmp.lt.s32.totalorder %s2670_s7, %s2668_s10 }
  0x48   :  { %p2673_p3 = por %p2672_p2, %p2671_p1 }
  0x4a   :  { %p2674_p4 = pnand %p2673_p3, %p2669_p0 }
  0x4c   :  { %2677 = shalt.err (!%p2674_p4)
}
  0x4d   :  { %114 = dma.hbm_to_vmem [thread:$0]  %s110_s28, 16, %s112_s2, [#allocation7]  }
  0x4e   :  { %s3055_s11 = smov [#allocation9]   ;;  %s185_s15 = sshll.u32 %s3203_s20, 4  ;;  %s186_s15 = int_to_ptr.hbm [resolvable:$true] %s185_s15 }
  0x4f   :  { %s163_s16 = sshll.u32 %s3055_s11, 4  ;;  %s2690_s18 = sshra.s32 %s162_s0, 4  ;;  %s164_s16 = int_to_ptr.vmem [resolvable:$true] %s163_s16  ;;  %s2691_s18 = int_to_ptr.hbm [resolvable:$true] %s2690_s18 }
  0x50   :  { %s2692_s23 = scalar_lea.hbm %s2691_s18, 1  ;;  %s2694_s22 = scalar_lea.hbm %s3188_s27, 1 }
  0x51   :  { %p2693_p5 = scmp.ne.s32.totalorder %s2691_s18, %s2692_s23  ;;  %p2695_p6 = scmp.lt.s32.totalorder %s2691_s18, %s3188_s27 }
  0x52   :  { %p2696_p7 = scmp.lt.s32.totalorder %s2694_s22, %s2692_s23 }
  0x54   :  { %p2697_p8 = por %p2696_p7, %p2695_p6 }
  0x56   :  { %p2698_p9 = pnand %p2697_p8, %p2693_p5 }
  0x58   :  { %2701 = shalt.err (!%p2698_p9)
}
  0x59   :  { %166 = dma.hbm_to_vmem [thread:$0]  %s162_s0, 16, %s164_s16, [#allocation10]  }
  0x5a   :  { %s209_s17 = sshll.u32 %s3218_s12, 4  ;;  %s3056_s26 = smov [#allocation12]   ;;  %s210_s17 = int_to_ptr.hbm [resolvable:$true] %s209_s17 }
  0x5b   :  { %s187_s28 = sshll.u32 %s3056_s26, 4  ;;  %s2714_s1 = sshra.s32 %s186_s15, 4  ;;  %s188_s28 = int_to_ptr.vmem [resolvable:$true] %s187_s28  ;;  %s2715_s1 = int_to_ptr.hbm [resolvable:$true] %s2714_s1 }
  0x5c   :  { %s2716_s2 = scalar_lea.hbm %s2715_s1, 1  ;;  %s2718_s8 = scalar_lea.hbm %s3203_s20, 1 }
  0x5d   :  { %p2717_p10 = scmp.ne.s32.totalorder %s2715_s1, %s2716_s2  ;;  %p2719_p11 = scmp.lt.s32.totalorder %s2715_s1, %s3203_s20 }
  0x5e   :  { %p2720_p12 = scmp.lt.s32.totalorder %s2718_s8, %s2716_s2 }
  0x60   :  { %p2721_p13 = por %p2720_p12, %p2719_p11 }
  0x62   :  { %p2722_p0 = pnand %p2721_p13, %p2717_p10 }
  0x64   :  { %2725 = shalt.err (!%p2722_p0)
}
  0x65   :  { %190 = dma.hbm_to_vmem [thread:$0]  %s186_s15, 16, %s188_s28, [#allocation13]  }
  0x66   :  { %s3057_s27 = smov [#allocation15]   ;;  %s230_s10 = sshll.u32 %s3228_s6, 4  ;;  %s3279_s10 = int_to_ptr.hbm [resolvable:$true] %s230_s10 }
  0x67   :  { %s211_s0 = sshll.u32 %s3057_s27, 4  ;;  %s2738_s7 = sshra.s32 %s210_s17, 4  ;;  %s212_s0 = int_to_ptr.vmem [resolvable:$true] %s211_s0  ;;  %s2739_s7 = int_to_ptr.hbm [resolvable:$true] %s2738_s7 }
  0x68   :  { %s2740_s11 = scalar_lea.hbm %s2739_s7, 1  ;;  %s2742_s16 = scalar_lea.hbm %s3218_s12, 1 }
  0x69   :  { %p2741_p1 = scmp.ne.s32.totalorder %s2739_s7, %s2740_s11  ;;  %p2743_p2 = scmp.lt.s32.totalorder %s2739_s7, %s3218_s12 }
  0x6a   :  { %p2744_p3 = scmp.lt.s32.totalorder %s2742_s16, %s2740_s11 }
  0x6c   :  { %p2745_p4 = por %p2744_p3, %p2743_p2 }
  0x6e   :  { %p2746_p5 = pnand %p2745_p4, %p2741_p1 }
  0x70   :  { %2749 = shalt.err (!%p2746_p5)
}
  0x71   :  { %214 = dma.hbm_to_vmem [thread:$0]  %s210_s17, 16, %s212_s0, [#allocation16]  }
  0x72   :  { %s3058_s20 = smov [#allocation18]   ;;  %s98_s18 = sshll.u32 %s3098_s13, 4  ;;  %s99_s18 = int_to_ptr.hbm [resolvable:$true] %s98_s18 }
  0x73   :  { %s232_s15 = sshll.u32 %s3058_s20, 4  ;;  %s2762_s23 = sshra.s32 %s3279_s10, 4  ;;  %s233_s15 = int_to_ptr.vmem [resolvable:$true] %s232_s15  ;;  %s2763_s23 = int_to_ptr.hbm [resolvable:$true] %s2762_s23 }
  0x74   :  { %s2764_s22 = scalar_lea.hbm %s2763_s23, 32  ;;  %s2766_s26 = scalar_lea.hbm %s3228_s6, 32 }
  0x75   :  { %p2765_p6 = scmp.ne.s32.totalorder %s2763_s23, %s2764_s22  ;;  %p2767_p7 = scmp.lt.s32.totalorder %s2763_s23, %s3228_s6 }
  0x76   :  { %p2768_p8 = scmp.lt.s32.totalorder %s2766_s26, %s2764_s22 }
  0x78   :  { %p2769_p9 = por %p2768_p8, %p2767_p7 }
  0x7a   :  { %p2770_p10 = pnand %p2769_p9, %p2765_p6 }
  0x7c   :  { %2773 = shalt.err (!%p2770_p10)
}
  0x7d   :  { %s3059_s12 = smov 128   ;;  %s3060_s17 = smov 8  }
  0x7e   :  { %238 = dma.hbm_to_vmem [thread:$0]  %s3279_s10, 512, %s233_s15, [#allocation19], %s3059_s12, %s3059_s12, %s3060_s17  }
  0x7f   :  { %s3061_s28 = smov [#allocation3]   ;;  %s130_s2 = sshll.u32 %s3133_s14, 4  ;;  %s131_s2 = int_to_ptr.hbm [resolvable:$true] %s130_s2 }
  0x80   :  { %s100_s1 = sshll.u32 %s3061_s28, 4  ;;  %s2786_s6 = sshra.s32 %s99_s18, 4  ;;  %s101_s1 = int_to_ptr.vmem [resolvable:$true] %s100_s1  ;;  %s2787_s6 = int_to_ptr.hbm [resolvable:$true] %s2786_s6 }
  0x81   :  { %s2788_s8 = scalar_lea.hbm %s2787_s6, 1  ;;  %s2790_s27 = scalar_lea.hbm %s3098_s13, 1 }
  0x82   :  { %p2789_p11 = scmp.ne.s32.totalorder %s2787_s6, %s2788_s8  ;;  %p2791_p12 = scmp.lt.s32.totalorder %s2787_s6, %s3098_s13 }
  0x83   :  { %p2792_p13 = scmp.lt.s32.totalorder %s2790_s27, %s2788_s8 }
  0x85   :  { %p2793_p0 = por %p2792_p13, %p2791_p12 }
  0x87   :  { %p2794_p1 = pnand %p2793_p0, %p2789_p11 }
  0x89   :  { %2797 = shalt.err (!%p2794_p1)
}
  0x8a   :  { %103 = dma.hbm_to_vmem [thread:$0]  %s99_s18, 16, %s101_s1, [#allocation4]  }
  0x8b   :  { %s172_s0 = sshll.u32 %s3193_s4, 4  ;;  %s3062_s10 = smov [#allocation8]   ;;  %s173_s0 = int_to_ptr.hbm [resolvable:$true] %s172_s0 }
  0x8c   :  { %s132_s7 = sshll.u32 %s3062_s10, 4  ;;  %s2810_s11 = sshra.s32 %s131_s2, 4  ;;  %s133_s7 = int_to_ptr.vmem [resolvable:$true] %s132_s7  ;;  %s2811_s11 = int_to_ptr.hbm [resolvable:$true] %s2810_s11 }
  0x8d   :  { %s2812_s16 = scalar_lea.hbm %s2811_s11, 1  ;;  %s2814_s20 = scalar_lea.hbm %s3133_s14, 1 }
  0x8e   :  { %p2813_p2 = scmp.ne.s32.totalorder %s2811_s11, %s2812_s16  ;;  %p2815_p3 = scmp.lt.s32.totalorder %s2811_s11, %s3133_s14 }
  0x8f   :  { %p2816_p4 = scmp.lt.s32.totalorder %s2814_s20, %s2812_s16 }
  0x91   :  { %p2817_p5 = por %p2816_p4, %p2815_p3 }
  0x93   :  { %p2818_p6 = pnand %p2817_p5, %p2813_p2 }
  0x95   :  { %2821 = shalt.err (!%p2818_p6)
}
  0x96   :  { %135 = dma.hbm_to_vmem [thread:$0]  %s131_s2, 16, %s133_s7, [#allocation7]  }
  0x97   :  { %s3063_s13 = smov [#allocation11]   ;;  %s198_s18 = sshll.u32 %s3213_s24, 4  ;;  %s199_s18 = int_to_ptr.hbm [resolvable:$true] %s198_s18 }
  0x98   :  { %s174_s15 = sshll.u32 %s3063_s13, 4  ;;  %s2834_s23 = sshra.s32 %s173_s0, 4  ;;  %s175_s15 = int_to_ptr.vmem [resolvable:$true] %s174_s15  ;;  %s2835_s23 = int_to_ptr.hbm [resolvable:$true] %s2834_s23 }
  0x99   :  { %s2836_s22 = scalar_lea.hbm %s2835_s23, 1  ;;  %s2838_s26 = scalar_lea.hbm %s3193_s4, 1 }
  0x9a   :  { %p2837_p7 = scmp.ne.s32.totalorder %s2835_s23, %s2836_s22  ;;  %p2839_p8 = scmp.lt.s32.totalorder %s2835_s23, %s3193_s4 }
  0x9b   :  { %p2840_p9 = scmp.lt.s32.totalorder %s2838_s26, %s2836_s22 }
  0x9d   :  { %p2841_p10 = por %p2840_p9, %p2839_p8 }
  0x9f   :  { %p2842_p11 = pnand %p2841_p10, %p2837_p7 }
  0xa1   :  { %2845 = shalt.err (!%p2842_p11)
}
  0xa2   :  { %177 = dma.hbm_to_vmem [thread:$0]  %s173_s0, 16, %s175_s15, [#allocation10]  }
  0xa3   :  { %s220_s14 = sshll.u32 %s3223_s30, 4  ;;  %s3064_s28 = smov [#allocation14]   ;;  %s221_s14 = int_to_ptr.hbm [resolvable:$true] %s220_s14 }
  0xa4   :  { %s200_s1 = sshll.u32 %s3064_s28, 4  ;;  %s2858_s2 = sshra.s32 %s199_s18, 4  ;;  %s201_s1 = int_to_ptr.vmem [resolvable:$true] %s200_s1  ;;  %s2859_s2 = int_to_ptr.hbm [resolvable:$true] %s2858_s2 }
  0xa5   :  { %s2860_s6 = scalar_lea.hbm %s2859_s2, 1  ;;  %s2862_s8 = scalar_lea.hbm %s3213_s24, 1 }
  0xa6   :  { %p2861_p12 = scmp.ne.s32.totalorder %s2859_s2, %s2860_s6  ;;  %p2863_p13 = scmp.lt.s32.totalorder %s2859_s2, %s3213_s24 }
  0xa7   :  { %p2864_p0 = scmp.lt.s32.totalorder %s2862_s8, %s2860_s6 }
  0xa9   :  { %p2865_p1 = por %p2864_p0, %p2863_p13 }
  0xab   :  { %p2866_p2 = pnand %p2865_p1, %p2861_p12 }
  0xad   :  { %2869 = shalt.err (!%p2866_p2)
}
  0xae   :  { %203 = dma.hbm_to_vmem [thread:$0]  %s199_s18, 16, %s201_s1, [#allocation13]  }
  0xaf   :  { %s3065_s4 = smov [#allocation17]   ;;  %s247_s0 = sshll.u32 %s3243_s3, 4  ;;  %s248_s0 = int_to_ptr.hbm [resolvable:$true] %s247_s0 }
  0xb0   :  { %s222_s27 = sshll.u32 %s3065_s4, 4  ;;  %s2882_s10 = sshra.s32 %s221_s14, 4  ;;  %s223_s27 = int_to_ptr.vmem [resolvable:$true] %s222_s27  ;;  %s2883_s10 = int_to_ptr.hbm [resolvable:$true] %s2882_s10 }
  0xb1   :  { %s2884_s7 = scalar_lea.hbm %s2883_s10, 1  ;;  %s2886_s11 = scalar_lea.hbm %s3223_s30, 1 }
  0xb2   :  { %p2885_p3 = scmp.ne.s32.totalorder %s2883_s10, %s2884_s7  ;;  %p2887_p4 = scmp.lt.s32.totalorder %s2883_s10, %s3223_s30 }
  0xb3   :  { %p2888_p5 = scmp.lt.s32.totalorder %s2886_s11, %s2884_s7 }
  0xb5   :  { %p2889_p6 = por %p2888_p5, %p2887_p4 }
  0xb7   :  { %p2890_p7 = pnand %p2889_p6, %p2885_p3 }
  0xb9   :  { %2893 = shalt.err (!%p2890_p7)
}
  0xba   :  { %225 = dma.hbm_to_vmem [thread:$0]  %s221_s14, 16, %s223_s27, [#allocation16]  }
  0xbb   :  { %s3066_s24 = smov [#allocation20]   ;;  %s2906_s20 = sshra.s32 %s248_s0, 4  ;;  %s2907_s20 = int_to_ptr.hbm [resolvable:$true] %s2906_s20 }
  0xbc   :  { %s249_s16 = sshll.u32 %s3066_s24, 4  ;;  %s2908_s13 = scalar_lea.hbm %s2907_s20, 32  ;;  %s250_s16 = int_to_ptr.vmem [resolvable:$true] %s249_s16 }
  0xbd   :  { %p2909_p8 = scmp.ne.s32.totalorder %s2907_s20, %s2908_s13  ;;  %s2910_s15 = scalar_lea.hbm %s3243_s3, 32 }
  0xbe   :  { %p2911_p9 = scmp.lt.s32.totalorder %s2907_s20, %s3243_s3  ;;  %p2912_p10 = scmp.lt.s32.totalorder %s2910_s15, %s2908_s13 }
  0xc0   :  { %p2913_p11 = por %p2912_p10, %p2911_p9 }
  0xc2   :  { %p2914_p12 = pnand %p2913_p11, %p2909_p8 }
  0xc4   :  { %2917 = shalt.err (!%p2914_p12)
}
  0xc5   :  { %255 = dma.hbm_to_vmem [thread:$0]  %s248_s0, 512, %s250_s16, [#allocation19], %s3059_s12, %s3059_s12, %s3060_s17  }
  0xc6   :  { %3002 = dma.done.wait [#allocation4], 16  }
  0xc7   :  { %3003 = vsyncadd [#allocation4], 4294967280 }
  0xc8   :  { %3004 = dma.done.wait [#allocation7], 32  }
  0xc9   :  { %3005 = vsyncadd [#allocation7], 4294967264 }
  0xca   :  { %3006 = dma.done.wait [#allocation10], 32  }
  0xcb   :  { %3007 = vsyncadd [#allocation10], 4294967264 }
  0xcc   :  { %3008 = dma.done.wait [#allocation13], 32  }
  0xcd   :  { %3009 = vsyncadd [#allocation13], 4294967264 }
  0xce   :  { %3010 = dma.done.wait [#allocation16], 32  }
  0xcf   :  { %3011 = vsyncadd [#allocation16], 4294967264 }
  0xd0   :  { %3012 = dma.done.wait [#allocation19], 1024  }
  0xd1   :  { %3013 = vsyncadd [#allocation19], 4294966272  ;;  %vm308_vm0 = vcmask 261120   ;;  %v304_v1 = vld [vmem:[%s3088_s5] sm:$0xff]  ;;  %v305_v3 = vld [vmem:[%s3088_s5 + $0x8] sm:$0xff]  ;;  %v3067_v5 = vmov 32.0  }
  0xd2   :  { %v309_v2 = vsel %vm308_vm0, %v304_v1, 0.0  ;;  %v312_v4 = vsel %vm308_vm0, %v305_v3, 0.0  ;;  %2564 = vrcp.f32 %v3067_v5  ;;  %v380_v22 = vld [vmem:[%s3108_s21 + $0x18] sm:$0xff]  ;;  %v379_v23 = vld [vmem:[%s3108_s21 + $0x10] sm:$0xff]  ;;  %v378_v24 = vld [vmem:[%s3108_s21 + $0x8] sm:$0xff]  ;;  %s3068_s5 = smov 120  }
  0xd3   :  { %310 = vadd.xlane.f32.xlu0 %v309_v2  ;;  %403 = vmatpush.msra.mxu0 %v380_v22  ;;  %v377_v25 = vld [vmem:[%s3108_s21] sm:$0xff]  ;;  %s3069_s21 = smov 112   ;;  %s3070_s3 = smov 104   ;;  %vm430_vm8 = vcmask 64512   ;;  %vm968_vm9 = vcmask 130048   ;;  %vm970_vm10 = vcmask 195584  }
  0xd4   :  { %v2546_v40 = vld [vmem:[#allocation3] ss:$0 sm:$0xff]  ;;  %v2547_v44 = vld [vmem:[#allocation6] ss:$0 sm:$0xff]  ;;  %v2548_v54 = vld [vmem:[%s3113_s25] ss:$0 sm:$0xff] }
  0xd5   :  { %404 = vmatpush.msra.mxu0 %v379_v23  ;;  %s3071_s25 = smov 96   ;;  %s3787_s30 = sld [smem:[#allocation33_spill]] }
  0xd6   :  { %s3072_s12 = smov 64   ;;  %s3788_s18 = sld [smem:[#allocation34_spill]] }
  0xd7   :  { %405 = vmatpush.msra.mxu0 %v378_v24  ;;  %s3073_s23 = smov 24   ;;  %s3074_s22 = smov 16  }
  0xd8   :  { %v2565_v6 = vpop.eup %2564  ;;  %s3789_s26 = sld [smem:[#allocation35_spill]]  ;;  %s2312_s13 = sshll.u32 %s3261_s9, 4  ;;  %s2313_s13 = int_to_ptr.hbm [resolvable:$true] %s2312_s13 }
  0xd9   :  { %v316_v7 = vmul.f32 32.0, %v2565_v6  ;;  %vm320_vm1 = vweird.f32 %v2565_v6  ;;  %406 = vmatpush.msra.mxu0 %v377_v25  ;;  %s3790_s14 = sld [smem:[#allocation37_spill]]  ;;  %s3077_s15 = smov [#allocation22]  }
  0xda   :  { %s3791_s28 = sld [smem:[#allocation36_spill]] }
  0xdb   :  { %313 = vadd.xlane.f32.xlu0 %v312_v4  ;;  %v317_v8 = vsub.f32 1.0, %v316_v7  ;;  %s3792_s1 = sld [smem:[#allocation39_spill]] }
  0xdc   :  { %s3793_s2 = sld [smem:[#allocation38_spill]] }
  0xdd   :  { %v318_v9 = vmul.f32 %v2565_v6, %v317_v8  ;;  %v370_v8 = vld [vmem:[%s3787_s30] sm:$0x3]  ;;  %s3794_s6 = sld [smem:[#allocation40_spill]] }
  0xde   :  { %s3795_s8 = sld [smem:[#allocation43_spill]] }
  0xdf   :  { %v319_v10 = vadd.f32 %v2565_v6, %v318_v9  ;;  %v371_v9 = vsub.f32 1.0, %v370_v8  ;;  %s3796_s4 = sld [smem:[#allocation41_spill]] }
  0xe0   :  { %s3797_s27 = sld [smem:[#allocation42_spill]] }
  0xe1   :  { %v3315_v11 = vsel %vm320_vm1, %v2565_v6, %v319_v10  ;;  %s3798_s0 = sld [smem:[#allocation44_spill]] }
  0xe2   :  { %s3799_s10 = sld [smem:[#allocation45_spill]] }
  0xe3   :  { %s3800_s7 = sld [smem:[#allocation46_spill]] }
  0xe4   :  { %s3802_s11 = sld [smem:[#allocation48_spill]] }
  0xe5   :  { %s3803_s24 = sld [smem:[#allocation50_spill]] }
  0xe6   :  { %s3804_s16 = sld [smem:[#allocation51_spill]] }
  0xe7   :  { %s3805_s20 = sld [smem:[#allocation49_spill]] }
 0x146   :  { %v311_v12 = vpop.xlane.xlu0 %310 }
 0x147   :  { %v322_v13 = vmul.f32 %v3315_v11, %v311_v12  ;;  %v373_v12 = vrot.slane %v371_v9, 1 }
 0x149   :  { %v324_v14 = vsub.f32 %v304_v1, %v322_v13  ;;  %v376_v13 = vmul.f32 -1e+09, %v373_v12 }
 0x14b   :  { %v326_v15 = vmul.f32 %v324_v14, %v324_v14 }
 0x14d   :  { %v328_v16 = vsel %vm308_vm0, %v326_v15, 0.0  ;;  %v3405_v15 = vperm.slane %v376_v13, 0 }
 0x14e   :  { %329 = vadd.xlane.f32.xlu1 %v328_v16  ;;  %v314_v17 = vpop.xlane.xlu0 %313 }
 0x14f   :  { %v323_v18 = vmul.f32 %v3315_v11, %v314_v17 }
 0x151   :  { %v325_v19 = vsub.f32 %v305_v3, %v323_v18 }
 0x153   :  { %v327_v20 = vmul.f32 %v325_v19, %v325_v19 }
 0x155   :  { %v331_v21 = vsel %vm308_vm0, %v327_v20, 0.0 }
 0x156   :  { %332 = vadd.xlane.f32.xlu1 %v331_v21 }
 0x1c1   :  { %v330_v26 = vpop.xlane.xlu1 %329 }
 0x1c2   :  { %v334_v27 = vmul.f32 %v330_v26, %v3315_v11 }
 0x1c4   :  { %v336_v28 = vadd.f32 1e-12, %v334_v27 }
 0x1c6   :  { %2566 = vrsqrt.f32 %v336_v28  ;;  %vm344_vm3 = vweird.f32 %v336_v28 }
 0x1c9   :  { %v333_v29 = vpop.xlane.xlu1 %332 }
 0x1ca   :  { %v335_v30 = vmul.f32 %v333_v29, %v3315_v11 }
 0x1cc   :  { %v2567_v31 = vpop.eup %2566  ;;  %v337_v32 = vadd.f32 1e-12, %v335_v30 }
 0x1cd   :  { %v339_v33 = vmul.f32 %v2567_v31, %v336_v28  ;;  %vm345_vm2 = vweird.f32 %v2567_v31 }
 0x1ce   :  { %2568 = vrsqrt.f32 %v337_v32  ;;  %vm346_vm4 = vmor %vm344_vm3, %vm345_vm2  ;;  %vm354_vm6 = vweird.f32 %v337_v32  ;;  %vm1149_vm2 = vcmask 523264  }
 0x1cf   :  { %v340_v34 = vmul.f32 %v2567_v31, %v339_v33 }
 0x1d1   :  { %v341_v35 = vmul.f32 0.5, %v340_v34 }
 0x1d3   :  { %v342_v36 = vsub.f32 1.5, %v341_v35 }
 0x1d4   :  { %v2569_v37 = vpop.eup %2568 }
 0x1d5   :  { %v343_v38 = vmul.f32 %v2567_v31, %v342_v36  ;;  %v349_v39 = vmul.f32 %v2569_v37, %v337_v32  ;;  %vm355_vm5 = vweird.f32 %v2569_v37 }
 0x1d6   :  { %vm356_vm7 = vmor %vm354_vm6, %vm355_vm5 }
 0x1d7   :  { %v347_v41 = vsel %vm346_vm4, %v2567_v31, %v343_v38  ;;  %v350_v42 = vmul.f32 %v2569_v37, %v349_v39 }
 0x1d8   :  { %v358_v43 = vmul.f32 %v347_v41, %v324_v14  ;;  %v375_v14 = vmul.f32 -1e+09, %v371_v9 }
 0x1d9   :  { %v351_v45 = vmul.f32 0.5, %v350_v42 }
 0x1da   :  { %v363_v46 = vmul.f32 %v2546_v40, %v358_v43  ;;  %v3407_v18 = vperm.slane %v375_v14, 0 }
 0x1db   :  { %v352_v47 = vsub.f32 1.5, %v351_v45 }
 0x1dc   :  { %v3327_v48 = vadd.f32 %v2547_v44, %v363_v46 }
 0x1dd   :  { %v353_v49 = vmul.f32 %v2569_v37, %v352_v47 }
 0x1de   :  { %2383 = vmatmul.msk.f32.vlgmr.msra.gmra.mxu0 %vm308_vm0, %v3327_v48 }
 0x1df   :  { %v357_v50 = vsel %vm356_vm7, %v2569_v37, %v353_v49 }
 0x1e0   :  { %v359_v51 = vmul.f32 %v357_v50, %v325_v19 }
 0x1e2   :  { %v364_v52 = vmul.f32 %v2546_v40, %v359_v51 }
 0x1e4   :  { %v3331_v53 = vadd.f32 %v2547_v44, %v364_v52 }
 0x1e6   :  { %2384 = vmatmul.msk.f32.gmra.mxu0 %vm308_vm0, %v3331_v53 }
 0x25b   :  { %v408_v55 = vpop.f32.mrf.mxu0 }
 0x25c   :  { %v3336_v56 = vadd.f32 %v2548_v54, %v408_v55 }
 0x25e   :  { %415 = vrot.lane.b32.xlu2 %v3336_v56, %s3068_s5 }
 0x263   :  { %v411_v57 = vpop.f32.mrf.mxu0 }
 0x264   :  { %v3340_v58 = vadd.f32 %v2548_v54, %v411_v57 }
 0x266   :  { %420 = vrot.lane.b32.xlu2 %v3336_v56, %s3069_s21  ;;  %426 = vrot.lane.b32.xlu1 %v3340_v58, %s3070_s3 }
 0x267   :  { %418 = vrot.lane.b32.xlu0 %v3340_v58, %s3068_s5 }
 0x26e   :  { %424 = vrot.lane.b32.xlu2 %v3336_v56, %s3070_s3 }
 0x26f   :  { %428 = vrot.lane.b32.xlu0 %v3336_v56, %s3071_s25 }
 0x276   :  { %422 = vrot.lane.b32.xlu2 %v3340_v58, %s3069_s21 }
 0x27e   :  { %455 = vrot.lane.b32.xlu2 %v3340_v58, %s3071_s25 }
 0x2b8   :  { %v3356_v59 = vpop.permute.xlu2 %415 }
 0x2b9   :  { %481 = vrot.lane.b32.xlu2 %v3356_v59, %s3071_s25 }
 0x2c0   :  { %v3360_v60 = vpop.permute.xlu2 %420 }
 0x2c1   :  { %533 = vrot.lane.b32.xlu1 %v3360_v60, %s3071_s25 }
 0x2c8   :  { %v3364_v61 = vpop.permute.xlu2 %424 }
 0x2c9   :  { %585 = vrot.lane.b32.xlu1 %v3364_v61, %s3071_s25  ;;  %v2525_v14 = vpack.i.bf16 %v3364_v61, %v3340_v58 }
 0x2d0   :  { %v3368_v62 = vpop.permute.xlu2 %422 }
 0x2d8   :  { %v456_v63 = vpop.permute.xlu2 %455  ;;  %v3370_v0 = vpop.permute.xlu1 %426 }
 0x2d9   :  { %v3372_v1 = vpop.permute.xlu0 %418  ;;  %2387 = vmatpush.xpose.msk.msra.mxu2 %vm430_vm8, %v456_v63  ;;  %611 = vrot.lane.b32.xlu2 %v3370_v0, %s3071_s25 }
 0x2da   :  { %507 = vrot.lane.b32.xlu0 %v3372_v1, %s3071_s25 }
 0x2dc   :  { %2388 = vmatmul.msk.f32.vlgmr.msra.gmra.mxu2 %vm430_vm8, %v3340_v58 }
 0x2e1   :  { %v429_v2 = vpop.permute.xlu0 %428 }
 0x2e2   :  { %559 = vrot.lane.b32.xlu0 %v3368_v62, %s3071_s25  ;;  %2385 = vmatpush.xpose.msk.msra.mxu1 %vm430_vm8, %v429_v2 }
 0x2e5   :  { %2386 = vmatmul.msk.f32.vlgmr.msra.gmra.mxu1 %vm430_vm8, %v3336_v56 }
 0x313   :  { %v482_v3 = vpop.permute.xlu2 %481 }
 0x314   :  { %2389 = vmatpush.xpose.msk.msra.mxu3 %vm430_vm8, %v482_v3 }
 0x317   :  { %2390 = vmatmul.msk.f32.vlgmr.msra.gmra.mxu3 %vm430_vm8, %v3356_v59 }
 0x333   :  { %v612_v4 = vpop.permute.xlu2 %611  ;;  %v534_v5 = vpop.permute.xlu1 %533 }
 0x334   :  { %2393 = vmatpush.xpose.msk.msrb.mxu2 %vm430_vm8, %v534_v5  ;;  %v2515_v5 = vpack.i.bf16 %v3356_v59, %v3336_v56 }
 0x337   :  { %2394 = vmatmul.msk.f32.vlgmr.msrb.gmra.mxu2 %vm430_vm8, %v3360_v60 }
 0x338   :  { %2399 = vmatpush.xpose.msk.msra.mxu2 %vm430_vm8, %v612_v4 }
 0x33b   :  { %v586_v7 = vpop.permute.xlu1 %585 }
 0x33f   :  { %2400 = vmatmul.msk.f32.vlgmr.msra.gmra.mxu2 %vm430_vm8, %v3370_v0 }
 0x34c   :  { %v508_v6 = vpop.permute.xlu0 %507 }
 0x34d   :  { %2391 = vmatpush.xpose.msk.msrb.mxu1 %vm430_vm8, %v508_v6 }
 0x350   :  { %2392 = vmatmul.msk.f32.vlgmr.msrb.gmra.mxu1 %vm430_vm8, %v3372_v1 }
 0x351   :  { %2397 = vmatpush.xpose.msk.msra.mxu1 %vm430_vm8, %v586_v7 }
 0x354   :  { %v560_v10 = vpop.permute.xlu0 %559 }
 0x355   :  { %2395 = vmatpush.xpose.msk.msrb.mxu3 %vm430_vm8, %v560_v10 }
 0x358   :  { %2396 = vmatmul.msk.f32.vlgmr.msrb.gmra.mxu3 %vm430_vm8, %v3368_v62  ;;  %2398 = vmatmul.msk.f32.vlgmr.msra.gmra.mxu1 %vm430_vm8, %v3364_v61 }
 0x35f   :  { %v478_v16 = vpop.f32.mrf.mxu2 }
 0x360   :  { %v638_v17 = vmul.f32 0.35355338, %v478_v16 }
 0x362   :  { %v452_v19 = vpop.f32.mrf.mxu1  ;;  %v652_v20 = vadd.f32 %v3405_v15, %v638_v17 }
 0x363   :  { %v637_v21 = vmul.f32 0.35355338, %v452_v19 }
 0x364   :  { %v662_v22 = vsel %vm430_vm8, %v652_v20, -inf }
 0x365   :  { %663 = vmax.xlane.f32.xlu1 %v662_v22  ;;  %v651_v23 = vadd.f32 %v3407_v18, %v637_v21 }
 0x367   :  { %v659_v24 = vsel %vm430_vm8, %v651_v23, -inf }
 0x368   :  { %660 = vmax.xlane.f32.xlu2 %v659_v24 }
 0x39a   :  { %v504_v25 = vpop.f32.mrf.mxu3 }
 0x39b   :  { %v639_v26 = vmul.f32 0.35355338, %v504_v25 }
 0x39d   :  { %v653_v27 = vadd.f32 %v3407_v18, %v639_v26 }
 0x39f   :  { %v665_v28 = vsel %vm430_vm8, %v653_v27, -inf }
 0x3a0   :  { %666 = vmax.xlane.f32.xlu1 %v665_v28 }
 0x3ba   :  { %v556_v29 = vpop.f32.mrf.mxu2 }
 0x3bb   :  { %v641_v30 = vmul.f32 0.35355338, %v556_v29 }
 0x3bd   :  { %v655_v31 = vadd.f32 %v3407_v18, %v641_v30 }
 0x3bf   :  { %v671_v32 = vsel %vm430_vm8, %v655_v31, -inf }
 0x3c0   :  { %672 = vmax.xlane.f32.xlu0 %v671_v32 }
 0x3c2   :  { %v634_v35 = vpop.f32.mrf.mxu2 }
 0x3c3   :  { %v644_v37 = vmul.f32 0.35355338, %v634_v35 }
 0x3c5   :  { %v658_v39 = vadd.f32 %v3405_v15, %v644_v37 }
 0x3c7   :  { %v680_v42 = vsel %vm430_vm8, %v658_v39, -inf }
 0x3cd   :  { %v530_v33 = vpop.f32.mrf.mxu1 }
 0x3ce   :  { %v640_v34 = vmul.f32 0.35355338, %v530_v33 }
 0x3d0   :  { %v654_v36 = vadd.f32 %v3405_v15, %v640_v34 }
 0x3d2   :  { %v668_v38 = vsel %vm430_vm8, %v654_v36, -inf }
 0x3d3   :  { %669 = vmax.xlane.f32.xlu2 %v668_v38 }
 0x3d5   :  { %v608_v52 = vpop.f32.mrf.mxu1 }
 0x3d6   :  { %v643_v57 = vmul.f32 0.35355338, %v608_v52 }
 0x3d8   :  { %v664_v40 = vpop.xlane.xlu1 %663  ;;  %v657_v3 = vadd.f32 %v3407_v18, %v643_v57 }
 0x3d9   :  { %v684_v41 = vsub.f32 %v652_v20, %v664_v40 }
 0x3da   :  { %v677_v4 = vsel %vm430_vm8, %v657_v3, -inf }
 0x3db   :  { %v693_v43 = vmul.f32 1.442695, %v684_v41  ;;  %v661_v44 = vpop.xlane.xlu2 %660  ;;  %681 = vmax.xlane.f32.xlu2 %v680_v42  ;;  %v582_v45 = vpop.f32.mrf.mxu3  ;;  %v2520_v41 = vpack.i.bf16 %v3372_v1, %v3360_v60 }
 0x3dc   :  { %v683_v46 = vsub.f32 %v651_v23, %v661_v44  ;;  %v642_v47 = vmul.f32 0.35355338, %v582_v45 }
 0x3dd   :  { %2570 = vpow2.f32 %v693_v43 }
 0x3de   :  { %v691_v49 = vmul.f32 1.442695, %v683_v46  ;;  %v656_v50 = vadd.f32 %v3405_v15, %v642_v47 }
 0x3e0   :  { %2572 = vpow2.f32 %v691_v49  ;;  %v674_v51 = vsel %vm430_vm8, %v656_v50, -inf }
 0x3e1   :  { %675 = vmax.xlane.f32.xlu1 %v674_v51 }
 0x3e3   :  { %v3423_v54 = vpop.eup %2570 }
 0x3e4   :  { %v710_v2 = vsel %vm430_vm8, %v3423_v54, 0.0 }
 0x3e6   :  { %v2573_v55 = vpop.eup %2572 }
 0x3e7   :  { %v707_v63 = vsel %vm430_vm8, %v2573_v55, 0.0 }
 0x3e8   :  { %708 = vadd.xlane.f32.xlu0 %v707_v63 }
 0x3e9   :  { %711 = vadd.xlane.f32.xlu1 %v710_v2 }
 0x3f0   :  { %678 = vmax.xlane.f32.xlu0 %v677_v4 }
 0x3f3   :  { %2516 = vrot.lane.b32.xlu2 %v2515_v5, %s3072_s12 }
 0x413   :  { %v667_v6 = vpop.xlane.xlu1 %666 }
 0x414   :  { %v685_v7 = vsub.f32 %v653_v27, %v667_v6 }
 0x416   :  { %v695_v8 = vmul.f32 1.442695, %v685_v7 }
 0x418   :  { %2574 = vpow2.f32 %v695_v8 }
 0x41e   :  { %v2575_v9 = vpop.eup %2574 }
 0x41f   :  { %v713_v10 = vsel %vm430_vm8, %v2575_v9, 0.0 }
 0x420   :  { %714 = vadd.xlane.f32.xlu2 %v713_v10 }
 0x433   :  { %v673_v12 = vpop.xlane.xlu0 %672 }
 0x434   :  { %v687_v13 = vsub.f32 %v655_v31, %v673_v12 }
 0x436   :  { %v699_v16 = vmul.f32 1.442695, %v687_v13 }
 0x438   :  { %2576 = vpow2.f32 %v699_v16  ;;  %2526 = vrot.lane.b32.xlu2 %v2525_v14, %s3072_s12 }
 0x43e   :  { %v3437_v56 = vpop.eup %2576 }
 0x43f   :  { %v719_v59 = vsel %vm430_vm8, %v3437_v56, 0.0 }
 0x440   :  { %877 = vrot.lane.b32.xlu2 %v3368_v62, %s3072_s12  ;;  %720 = vadd.xlane.f32.xlu1 %v719_v59 }
 0x446   :  { %v670_v17 = vpop.xlane.xlu2 %669 }
 0x447   :  { %v686_v19 = vsub.f32 %v654_v36, %v670_v17  ;;  %v990_v17 = vld [vmem:[%s3788_s18 + $0x18] sm:$0xff] }
 0x449   :  { %v697_v20 = vmul.f32 1.442695, %v686_v19 }
 0x44b   :  { %2578 = vpow2.f32 %v697_v20 }
 0x44e   :  { %v682_v21 = vpop.xlane.xlu2 %681 }
 0x44f   :  { %v690_v22 = vsub.f32 %v658_v39, %v682_v21 }
 0x451   :  { %v3443_v58 = vpop.eup %2578  ;;  %v705_v61 = vmul.f32 1.442695, %v690_v22 }
 0x452   :  { %v716_v23 = vsel %vm430_vm8, %v3443_v58, 0.0 }
 0x453   :  { %2580 = vpow2.f32 %v705_v61  ;;  %717 = vadd.xlane.f32.xlu0 %v716_v23  ;;  %v989_v61 = vld [vmem:[%s3788_s18 + $0x10] sm:$0xff]  ;;  %v988_v23 = vld [vmem:[%s3788_s18 + $0x8] sm:$0xff] }
 0x454   :  { %v676_v24 = vpop.xlane.xlu1 %675 }
 0x455   :  { %v688_v25 = vsub.f32 %v656_v50, %v676_v24  ;;  %v987_v24 = vld [vmem:[%s3788_s18] sm:$0xff] }
 0x456   :  { %v2517_v26 = vpop.permute.xlu2 %2516 }
 0x457   :  { %v701_v27 = vmul.f32 1.442695, %v688_v25  ;;  %v2519_v62 = vunpack.i.h.bf16 %v2517_v26  ;;  %v2518_v28 = vunpack.i.l.bf16 %v2517_v26 }
 0x459   :  { %v3447_v29 = vpop.eup %2580  ;;  %2582 = vpow2.f32 %v701_v27  ;;  %768 = vmatpush.msra.mxu3 %v2518_v28  ;;  %820 = vmatpush.msrb.mxu1 %v2519_v62 }
 0x45a   :  { %v728_v30 = vsel %vm430_vm8, %v3447_v29, 0.0 }
 0x45b   :  { %729 = vadd.xlane.f32.xlu1 %v728_v30  ;;  %v709_v31 = vpop.xlane.xlu0 %708 }
 0x45c   :  { %2584 = vrcp.f32 %v709_v31  ;;  %v712_v42 = vpop.xlane.xlu1 %711 }
 0x45f   :  { %v2583_v32 = vpop.eup %2582 }
 0x460   :  { %v722_v34 = vsel %vm430_vm8, %v2583_v32, 0.0 }
 0x462   :  { %v2585_v33 = vpop.eup %2584 }
 0x463   :  { %v739_v35 = vmul.f32 %v2585_v33, %v2573_v55  ;;  %723 = vadd.xlane.f32.xlu1 %v722_v34  ;;  %v679_v36 = vpop.xlane.xlu0 %678 }
 0x464   :  { %v689_v37 = vsub.f32 %v657_v3, %v679_v36  ;;  %v2549_v36 = vld [vmem:[%s3789_s26] ss:$0 sm:$0xff] }
 0x465   :  { %2401 = vmatmul.msk.f32.vlgmr.msra.gmra.mxu3 %vm430_vm8, %v739_v35 }
 0x466   :  { %v703_v38 = vmul.f32 1.442695, %v689_v37 }
 0x468   :  { %2586 = vpow2.f32 %v703_v38 }
 0x469   :  { %2588 = vrcp.f32 %v712_v42 }
 0x46e   :  { %v2587_v39 = vpop.eup %2586 }
 0x46f   :  { %v725_v40 = vsel %vm430_vm8, %v2587_v39, 0.0  ;;  %v2589_v44 = vpop.eup %2588 }
 0x470   :  { %726 = vadd.xlane.f32.xlu0 %v725_v40  ;;  %v740_v51 = vmul.f32 %v2589_v44, %v3423_v54 }
 0x47c   :  { %929 = vrot.lane.b32.xlu1 %v3370_v0, %s3072_s12 }
 0x484   :  { %2521 = vrot.lane.b32.xlu0 %v2520_v41, %s3072_s12 }
 0x493   :  { %v715_v43 = vpop.xlane.xlu2 %714 }
 0x494   :  { %2590 = vrcp.f32 %v715_v43 }
 0x49a   :  { %v2591_v45 = vpop.eup %2590 }
 0x49b   :  { %v741_v46 = vmul.f32 %v2591_v45, %v2575_v9  ;;  %v2527_v47 = vpop.permute.xlu2 %2526 }
 0x49c   :  { %v2529_v49 = vunpack.i.h.bf16 %v2527_v47  ;;  %v2528_v50 = vunpack.i.l.bf16 %v2527_v47 }
 0x49d   :  { %2403 = vmatmul.msk.f32.vlgmr.msrb.gmra.mxu1 %vm430_vm8, %v741_v46 }
 0x49e   :  { %794 = vmatpush.msrb.mxu0 %v2528_v50  ;;  %924 = vmatpush.msra.mxu1 %v2529_v49 }
 0x49f   :  { %2402 = vmatmul.msk.f32.vlgmr.msrb.gmra.mxu0 %vm430_vm8, %v740_v51 }
 0x4a3   :  { %v878_v60 = vpop.permute.xlu2 %877 }
 0x4a4   :  { %898 = vmatpush.msra.mxu0 %v878_v60 }
 0x4b3   :  { %v721_v0 = vpop.xlane.xlu1 %720 }
 0x4c6   :  { %v718_v55 = vpop.xlane.xlu0 %717 }
 0x4ce   :  { %v730_v1 = vpop.xlane.xlu1 %729 }
 0x4d6   :  { %v724_v52 = vpop.xlane.xlu1 %723 }
 0x4d7   :  { %2592 = vrcp.f32 %v724_v52  ;;  %v1084_v52 = vld [vmem:[%s3790_s14 + $0x10] sm:$0xff] }
 0x4dd   :  { %v2593_v57 = vpop.eup %2592 }
 0x4de   :  { %v744_v63 = vmul.f32 %v2593_v57, %v2583_v32  ;;  %v1082_v57 = vld [vmem:[%s3790_s14] sm:$0xff] }
 0x4e0   :  { %2406 = vmatmul.msk.f32.vlgmr.msra.gmra.mxu0 %vm430_vm8, %v744_v63 }
 0x4e3   :  { %v727_v2 = vpop.xlane.xlu0 %726 }
 0x4e4   :  { %2594 = vrcp.f32 %v727_v2 }
 0x4e5   :  { %2596 = vrcp.f32 %v721_v0 }
 0x4e6   :  { %2598 = vrcp.f32 %v718_v55  ;;  %v1083_v55 = vld [vmem:[%s3790_s14 + $0x8] sm:$0xff] }
 0x4e7   :  { %2600 = vrcp.f32 %v730_v1  ;;  %v1085_v1 = vld [vmem:[%s3790_s14 + $0x18] sm:$0xff] }
 0x4e8   :  { %v770_v20 = vpop.f32.mrf.mxu3  ;;  %1108 = vmatpush.msrb.mxu0 %v1085_v1 }
 0x4ea   :  { %v2595_v3 = vpop.eup %2594  ;;  %1109 = vmatpush.msrb.mxu0 %v1084_v52 }
 0x4eb   :  { %v745_v4 = vmul.f32 %v2595_v3, %v2587_v39  ;;  %v2597_v54 = vpop.eup %2596 }
 0x4ec   :  { %v2599_v5 = vpop.eup %2598  ;;  %v743_v9 = vmul.f32 %v2597_v54, %v3437_v56  ;;  %1110 = vmatpush.msrb.mxu0 %v1083_v55  ;;  %v2553_v55 = vld [vmem:[%s3794_s6] ss:$0 sm:$0xff] }
 0x4ed   :  { %2407 = vmatmul.msk.f32.vlgmr.msra.gmra.mxu1 %vm430_vm8, %v745_v4  ;;  %v742_v10 = vmul.f32 %v2599_v5, %v3443_v58  ;;  %v2601_v13 = vpop.eup %2600 }
 0x4ee   :  { %v930_v12 = vpop.permute.xlu1 %929  ;;  %v746_v14 = vmul.f32 %v2601_v13, %v3447_v29  ;;  %1111 = vmatpush.msrb.mxu0 %v1082_v57  ;;  %v2551_v13 = vld [vmem:[#allocation8] ss:$0 sm:$0xff] }
 0x4f6   :  { %v2522_v6 = vpop.permute.xlu0 %2521 }
 0x4f7   :  { %v2524_v7 = vunpack.i.h.bf16 %v2522_v6  ;;  %v2523_v8 = vunpack.i.l.bf16 %v2522_v6 }
 0x4f9   :  { %846 = vmatpush.msrb.mxu2 %v2524_v7  ;;  %872 = vmatpush.msrb.mxu3 %v2523_v8 }
 0x4fa   :  { %2404 = vmatmul.msk.f32.vlgmr.msrb.gmra.mxu2 %vm430_vm8, %v742_v10  ;;  %2405 = vmatmul.msk.f32.vlgmr.msrb.gmra.mxu3 %vm430_vm8, %v743_v9  ;;  %v2550_v9 = vld [vmem:[%s3791_s28] ss:$0 sm:$0xff] }
 0x4fb   :  { %950 = vmatpush.msra.mxu2 %v930_v12  ;;  %1013 = vmatpush.msra.mxu3 %v990_v17 }
 0x4fd   :  { %1014 = vmatpush.msra.mxu3 %v989_v61 }
 0x4ff   :  { %1015 = vmatpush.msra.mxu3 %v988_v23 }
 0x501   :  { %1016 = vmatpush.msra.mxu3 %v987_v24 }
 0x502   :  { %2408 = vmatmul.msk.f32.vlgmr.msra.gmra.mxu2 %vm430_vm8, %v746_v14 }
 0x51a   :  { %v822_v16 = vpop.f32.mrf.mxu1 }
 0x51b   :  { %956 = vrot.lane.b32.xlu0 %v822_v16, %s3060_s17 }
 0x51c   :  { %v796_v56 = vpop.f32.mrf.mxu0 }
 0x55d   :  { %v900_v19 = vpop.f32.mrf.mxu0 }
 0x56a   :  { %v926_v59 = vpop.f32.mrf.mxu1 }
 0x56b   :  { %964 = vrot.lane.b32.xlu0 %v926_v59, %s3073_s23 }
 0x573   :  { %977 = vrot.lane.b32.xlu0 %v900_v19, %s3074_s22 }
 0x57d   :  { %v848_v21 = vpop.f32.mrf.mxu2  ;;  %v874_v22 = vpop.f32.mrf.mxu3 }
 0x57e   :  { %960 = vrot.lane.b32.xlu2 %v874_v22, %s3074_s22 }
 0x585   :  { %v952_v58 = vpop.f32.mrf.mxu2 }
 0x586   :  { %981 = vrot.lane.b32.xlu1 %v952_v58, %s3073_s23  ;;  %973 = vrot.lane.b32.xlu2 %v848_v21, %s3060_s17 }
 0x58d   :  { %v957_v25 = vpop.permute.xlu0 %956 }
 0x58e   :  { %v967_v27 = vsel %vm430_vm8, %v770_v20, %v957_v25 }
 0x5d8   :  { %v961_v26 = vpop.permute.xlu2 %960 }
 0x5d9   :  { %v969_v62 = vsel %vm968_vm9, %v967_v27, %v961_v26  ;;  %v1144_v27 = vld [vmem:[%s3792_s1 + $0x38] sm:$0xff] }
 0x5da   :  { %1164 = vmatpush.msrb.mxu1 %v1144_v27 }
 0x5dd   :  { %v965_v28 = vpop.permute.xlu0 %964 }
 0x5de   :  { %v971_v29 = vsel %vm970_vm10, %v969_v62, %v965_v28  ;;  %v1143_v62 = vld [vmem:[%s3792_s1 + $0x30] sm:$0xff]  ;;  %v1142_v28 = vld [vmem:[%s3792_s1 + $0x28] sm:$0xff] }
 0x5df   :  { %2409 = vmatmul.msk.f32.vlgmr.msra.gmra.mxu3 %vm308_vm0, %v971_v29  ;;  %1165 = vmatpush.msrb.mxu1 %v1143_v62  ;;  %v1141_v29 = vld [vmem:[%s3792_s1 + $0x20] sm:$0xff] }
 0x5e0   :  { %v974_v30 = vpop.permute.xlu2 %973 }
 0x5e1   :  { %v984_v32 = vsel %vm430_vm8, %v796_v56, %v974_v30  ;;  %1166 = vmatpush.msrb.mxu1 %v1142_v28  ;;  %v1140_v30 = vld [vmem:[%s3792_s1 + $0x18] sm:$0xff]  ;;  %v2554_v28 = vld [vmem:[%s3796_s4] ss:$0 sm:$0xff] }
 0x5e3   :  { %1167 = vmatpush.msrb.mxu1 %v1141_v29 }
 0x5e5   :  { %v978_v31 = vpop.permute.xlu0 %977  ;;  %1168 = vmatpush.msrb.mxu1 %v1140_v30 }
 0x5e6   :  { %v985_v33 = vsel %vm968_vm9, %v984_v32, %v978_v31  ;;  %v1139_v31 = vld [vmem:[%s3792_s1 + $0x10] sm:$0xff]  ;;  %v1138_v32 = vld [vmem:[%s3792_s1 + $0x8] sm:$0xff] }
 0x5e7   :  { %1169 = vmatpush.msrb.mxu1 %v1139_v31  ;;  %v2555_v31 = vld [vmem:[%s3797_s27] ss:$0 sm:$0xff] }
 0x5e9   :  { %1170 = vmatpush.msrb.mxu1 %v1138_v32 }
 0x5f8   :  { %v982_v34 = vpop.permute.xlu1 %981 }
 0x5f9   :  { %v986_v35 = vsel %vm970_vm10, %v985_v33, %v982_v34  ;;  %v1137_v33 = vld [vmem:[%s3792_s1] sm:$0xff] }
 0x5fa   :  { %2410 = vmatmul.msk.f32.gmra.mxu3 %vm308_vm0, %v986_v35  ;;  %1171 = vmatpush.msrb.mxu1 %v1137_v33  ;;  %v2552_v34 = vld [vmem:[%s3793_s2] ss:$0 sm:$0xff] }
 0x662   :  { %v1018_v37 = vpop.f32.mrf.mxu3 }
 0x663   :  { %v1019_v38 = vadd.f32 %v2549_v36, %v1018_v37 }
 0x665   :  { %v1024_v39 = vadd.f32 %v1019_v38, %v3327_v48 }
 0x667   :  { %v1028_v40 = vsel %vm308_vm0, %v1024_v39, 0.0 }
 0x668   :  { %1029 = vadd.xlane.f32.xlu2 %v1028_v40 }
 0x67d   :  { %v1021_v41 = vpop.f32.mrf.mxu3 }
 0x67e   :  { %v1022_v42 = vadd.f32 %v2549_v36, %v1021_v41 }
 0x680   :  { %v1025_v43 = vadd.f32 %v1022_v42, %v3331_v53 }
 0x682   :  { %v1031_v44 = vsel %vm308_vm0, %v1025_v43, 0.0 }
 0x683   :  { %1032 = vadd.xlane.f32.xlu0 %v1031_v44 }
 0x6db   :  { %v1030_v45 = vpop.xlane.xlu2 %1029 }
 0x6dc   :  { %v1034_v46 = vmul.f32 %v1030_v45, %v3315_v11 }
 0x6de   :  { %v1036_v47 = vsub.f32 %v1024_v39, %v1034_v46 }
 0x6e0   :  { %v1038_v49 = vmul.f32 %v1036_v47, %v1036_v47 }
 0x6e2   :  { %v1040_v48 = vsel %vm308_vm0, %v1038_v49, 0.0 }
 0x6e3   :  { %1041 = vadd.xlane.f32.xlu1 %v1040_v48 }
 0x6f6   :  { %v1033_v50 = vpop.xlane.xlu0 %1032 }
 0x6f7   :  { %v1035_v51 = vmul.f32 %v1033_v50, %v3315_v11 }
 0x6f9   :  { %v1037_v60 = vsub.f32 %v1025_v43, %v1035_v51 }
 0x6fb   :  { %v1039_v0 = vmul.f32 %v1037_v60, %v1037_v60 }
 0x6fd   :  { %v1043_v53 = vsel %vm308_vm0, %v1039_v0, 0.0 }
 0x6fe   :  { %1044 = vadd.xlane.f32.xlu2 %v1043_v53 }
 0x756   :  { %v1042_v63 = vpop.xlane.xlu1 %1041 }
 0x757   :  { %v1046_v2 = vmul.f32 %v1042_v63, %v3315_v11 }
 0x759   :  { %v1048_v3 = vadd.f32 1e-12, %v1046_v2 }
 0x75b   :  { %2602 = vrsqrt.f32 %v1048_v3  ;;  %vm1056_vm12 = vweird.f32 %v1048_v3 }
 0x761   :  { %v2603_v4 = vpop.eup %2602 }
 0x762   :  { %v1051_v54 = vmul.f32 %v2603_v4, %v1048_v3  ;;  %vm1057_vm11 = vweird.f32 %v2603_v4 }
 0x763   :  { %vm1058_vm13 = vmor %vm1056_vm12, %vm1057_vm11 }
 0x764   :  { %v1052_v5 = vmul.f32 %v2603_v4, %v1051_v54 }
 0x766   :  { %v1053_v6 = vmul.f32 0.5, %v1052_v5 }
 0x768   :  { %v1054_v7 = vsub.f32 1.5, %v1053_v6 }
 0x76a   :  { %v1055_v8 = vmul.f32 %v2603_v4, %v1054_v7 }
 0x76c   :  { %v1059_v10 = vsel %vm1058_vm13, %v2603_v4, %v1055_v8 }
 0x76d   :  { %v1070_v12 = vmul.f32 %v1059_v10, %v1036_v47 }
 0x76f   :  { %v1075_v14 = vmul.f32 %v2550_v9, %v1070_v12 }
 0x771   :  { %v1045_v16 = vpop.xlane.xlu2 %1044  ;;  %v3503_v56 = vadd.f32 %v2551_v13, %v1075_v14 }
 0x772   :  { %v1047_v59 = vmul.f32 %v1045_v16, %v3315_v11 }
 0x773   :  { %2411 = vmatmul.msk.f32.vlgmr.msrb.gmra.mxu0 %vm308_vm0, %v3503_v56 }
 0x774   :  { %v1049_v17 = vadd.f32 1e-12, %v1047_v59 }
 0x776   :  { %2604 = vrsqrt.f32 %v1049_v17  ;;  %vm1066_vm15 = vweird.f32 %v1049_v17 }
 0x77c   :  { %v2605_v19 = vpop.eup %2604 }
 0x77d   :  { %v1061_v20 = vmul.f32 %v2605_v19, %v1049_v17  ;;  %vm1067_vm14 = vweird.f32 %v2605_v19  ;;  %v1240_v17 = vld [vmem:[%s3795_s8 + $0x18] sm:$0xff] }
 0x77e   :  { %vm1068_vm1 = vmor %vm1066_vm15, %vm1067_vm14  ;;  %1263 = vmatpush.msrb.mxu2 %v1240_v17 }
 0x77f   :  { %v1062_v21 = vmul.f32 %v2605_v19, %v1061_v20  ;;  %v1238_v20 = vld [vmem:[%s3795_s8 + $0x8] sm:$0xff] }
 0x781   :  { %v1063_v22 = vmul.f32 0.5, %v1062_v21  ;;  %v1237_v21 = vld [vmem:[%s3795_s8] sm:$0xff] }
 0x783   :  { %v1064_v58 = vsub.f32 1.5, %v1063_v22 }
 0x785   :  { %v1065_v61 = vmul.f32 %v2605_v19, %v1064_v58 }
 0x787   :  { %v1069_v23 = vsel %vm1068_vm1, %v2605_v19, %v1065_v61  ;;  %v1239_v19 = vld [vmem:[%s3795_s8 + $0x10] sm:$0xff] }
 0x788   :  { %v1071_v24 = vmul.f32 %v1069_v23, %v1037_v60  ;;  %1264 = vmatpush.msrb.mxu2 %v1239_v19 }
 0x78a   :  { %v1076_v25 = vmul.f32 %v2550_v9, %v1071_v24  ;;  %1265 = vmatpush.msrb.mxu2 %v1238_v20 }
 0x78c   :  { %v1081_v26 = vadd.f32 %v2551_v13, %v1076_v25  ;;  %1266 = vmatpush.msrb.mxu2 %v1237_v21 }
 0x78e   :  { %2412 = vmatmul.msk.f32.gmra.mxu0 %vm308_vm0, %v1081_v26 }
 0x7f0   :  { %v1113_v35 = vpop.f32.mrf.mxu0 }
 0x7f1   :  { %v1114_v36 = vadd.f32 %v2552_v34, %v1113_v35 }
 0x7f3   :  { %v1121_v37 = vmul.f32 0.044715, %v1114_v36  ;;  %v1119_v43 = vmul.f32 0.5, %v1114_v36 }
 0x7f5   :  { %v1123_v38 = vmul.f32 %v1121_v37, %v1114_v36 }
 0x7f7   :  { %v1125_v39 = vmul.f32 %v1123_v38, %v1114_v36 }
 0x7f9   :  { %v1127_v40 = vadd.f32 %v1125_v39, %v1114_v36 }
 0x7fb   :  { %v1129_v41 = vmul.f32 0.7978846, %v1127_v40 }
 0x7fd   :  { %2606 = vtanh.f32 %v1129_v41 }
 0x803   :  { %v2607_v42 = vpop.eup %2606 }
 0x804   :  { %v1133_v44 = vadd.f32 1.0, %v2607_v42 }
 0x806   :  { %v1135_v45 = vmul.f32 %v1133_v44, %v1119_v43 }
 0x808   :  { %2413 = vmatmul.msk.f32.vlgmr.msrb.gmra.mxu1 %vm1149_vm2, %v1135_v45 }
 0x80b   :  { %v1116_v46 = vpop.f32.mrf.mxu0 }
 0x80c   :  { %v1117_v47 = vadd.f32 %v2552_v34, %v1116_v46 }
 0x80e   :  { %v1122_v49 = vmul.f32 0.044715, %v1117_v47  ;;  %v1120_v53 = vmul.f32 0.5, %v1117_v47 }
 0x810   :  { %v1124_v48 = vmul.f32 %v1122_v49, %v1117_v47 }
 0x812   :  { %v1126_v50 = vmul.f32 %v1124_v48, %v1117_v47 }
 0x814   :  { %v1128_v51 = vadd.f32 %v1126_v50, %v1117_v47  ;;  %v2556_v47 = vld [vmem:[%s3798_s0] ss:$0 sm:$0xff] }
 0x816   :  { %v1130_v60 = vmul.f32 0.7978846, %v1128_v51 }
 0x818   :  { %2608 = vtanh.f32 %v1130_v60 }
 0x81e   :  { %v2609_v0 = vpop.eup %2608 }
 0x81f   :  { %v1134_v1 = vadd.f32 1.0, %v2609_v0 }
 0x821   :  { %v1136_v52 = vmul.f32 %v1134_v1, %v1120_v53 }
 0x823   :  { %2414 = vmatmul.msk.f32.gmra.mxu1 %vm1149_vm2, %v1136_v52 }
 0x885   :  { %v1173_v57 = vpop.f32.mrf.mxu1 }
 0x886   :  { %v1174_v63 = vadd.f32 %v2553_v55, %v1173_v57 }
 0x888   :  { %v1179_v2 = vadd.f32 %v1174_v63, %v3503_v56 }
 0x88a   :  { %v1183_v3 = vsel %vm308_vm0, %v1179_v2, 0.0 }
 0x88b   :  { %1184 = vadd.xlane.f32.xlu0 %v1183_v3 }
 0x8a0   :  { %v1176_v4 = vpop.f32.mrf.mxu1 }
 0x8a1   :  { %v1177_v54 = vadd.f32 %v2553_v55, %v1176_v4 }
 0x8a3   :  { %v1180_v5 = vadd.f32 %v1177_v54, %v1081_v26 }
 0x8a5   :  { %v1186_v6 = vsel %vm308_vm0, %v1180_v5, 0.0 }
 0x8a6   :  { %1187 = vadd.xlane.f32.xlu1 %v1186_v6 }
 0x8fe   :  { %v1185_v7 = vpop.xlane.xlu0 %1184 }
 0x8ff   :  { %v1189_v8 = vmul.f32 %v1185_v7, %v3315_v11 }
 0x901   :  { %v1191_v9 = vsub.f32 %v1179_v2, %v1189_v8 }
 0x903   :  { %v1193_v10 = vmul.f32 %v1191_v9, %v1191_v9 }
 0x905   :  { %v1195_v12 = vsel %vm308_vm0, %v1193_v10, 0.0 }
 0x906   :  { %1196 = vadd.xlane.f32.xlu2 %v1195_v12 }
 0x919   :  { %v1188_v13 = vpop.xlane.xlu1 %1187 }
 0x91a   :  { %v1190_v14 = vmul.f32 %v1188_v13, %v3315_v11 }
 0x91c   :  { %v1192_v16 = vsub.f32 %v1180_v5, %v1190_v14 }
 0x91e   :  { %v1194_v56 = vmul.f32 %v1192_v16, %v1192_v16 }
 0x920   :  { %v1198_v59 = vsel %vm308_vm0, %v1194_v56, 0.0 }
 0x921   :  { %1199 = vadd.xlane.f32.xlu0 %v1198_v59 }
 0x979   :  { %v1197_v22 = vpop.xlane.xlu2 %1196 }
 0x97a   :  { %v1201_v58 = vmul.f32 %v1197_v22, %v3315_v11 }
 0x97c   :  { %v1203_v61 = vadd.f32 1e-12, %v1201_v58 }
 0x97e   :  { %2610 = vrsqrt.f32 %v1203_v61  ;;  %vm1211_vm4 = vweird.f32 %v1203_v61 }
 0x984   :  { %v2611_v23 = vpop.eup %2610 }
 0x985   :  { %v1206_v24 = vmul.f32 %v2611_v23, %v1203_v61  ;;  %vm1212_vm3 = vweird.f32 %v2611_v23 }
 0x986   :  { %vm1213_vm5 = vmor %vm1211_vm4, %vm1212_vm3 }
 0x987   :  { %v1207_v25 = vmul.f32 %v2611_v23, %v1206_v24 }
 0x989   :  { %v1208_v26 = vmul.f32 0.5, %v1207_v25 }
 0x98b   :  { %v1209_v27 = vsub.f32 1.5, %v1208_v26 }
 0x98d   :  { %v1210_v62 = vmul.f32 %v2611_v23, %v1209_v27 }
 0x98f   :  { %v1214_v29 = vsel %vm1213_vm5, %v2611_v23, %v1210_v62 }
 0x990   :  { %v1225_v30 = vmul.f32 %v1214_v29, %v1191_v9 }
 0x992   :  { %v1230_v32 = vmul.f32 %v2554_v28, %v1225_v30 }
 0x994   :  { %v1200_v33 = vpop.xlane.xlu0 %1199  ;;  %v3535_v34 = vadd.f32 %v2555_v31, %v1230_v32 }
 0x995   :  { %v1202_v35 = vmul.f32 %v1200_v33, %v3315_v11 }
 0x996   :  { %2415 = vmatmul.msk.f32.vlgmr.msrb.gmra.mxu2 %vm308_vm0, %v3535_v34 }
 0x997   :  { %v1204_v36 = vadd.f32 1e-12, %v1202_v35 }
 0x999   :  { %2612 = vrsqrt.f32 %v1204_v36  ;;  %vm1221_vm7 = vweird.f32 %v1204_v36 }
 0x99f   :  { %v2613_v37 = vpop.eup %2612 }
 0x9a0   :  { %v1216_v38 = vmul.f32 %v2613_v37, %v1204_v36  ;;  %vm1222_vm6 = vweird.f32 %v2613_v37 }
 0x9a1   :  { %vm1223_vm11 = vmor %vm1221_vm7, %vm1222_vm6 }
 0x9a2   :  { %v1217_v39 = vmul.f32 %v2613_v37, %v1216_v38 }
 0x9a4   :  { %v1218_v40 = vmul.f32 0.5, %v1217_v39 }
 0x9a6   :  { %v1219_v41 = vsub.f32 1.5, %v1218_v40 }
 0x9a8   :  { %v1220_v42 = vmul.f32 %v2613_v37, %v1219_v41 }
 0x9aa   :  { %v1224_v43 = vsel %vm1223_vm11, %v2613_v37, %v1220_v42  ;;  %vm2110_vm11 = vcmask 1040384  }
 0x9ab   :  { %v1226_v44 = vmul.f32 %v1224_v43, %v1192_v16 }
 0x9ad   :  { %v1231_v45 = vmul.f32 %v2554_v28, %v1226_v44 }
 0x9af   :  { %v3540_v46 = vadd.f32 %v2555_v31, %v1231_v45 }
 0x9b1   :  { %2416 = vmatmul.msk.f32.gmra.mxu2 %vm308_vm0, %v3540_v46 }
 0xa19   :  { %v1268_v49 = vpop.f32.mrf.mxu2 }
 0xa1a   :  { %v3545_v48 = vadd.f32 %v2556_v47, %v1268_v49 }
 0xa1c   :  { %1284 = vrot.lane.b32.xlu0 %v3545_v48, %s3070_s3  ;;  %1275 = vrot.lane.b32.xlu1 %v3545_v48, %s3068_s5 }
 0xa24   :  { %1280 = vrot.lane.b32.xlu0 %v3545_v48, %s3069_s21 }
 0xa34   :  { %v1271_v50 = vpop.f32.mrf.mxu2 }
 0xa35   :  { %v3553_v51 = vadd.f32 %v2556_v47, %v1271_v50 }
 0xa37   :  { %1278 = vrot.lane.b32.xlu2 %v3553_v51, %s3068_s5  ;;  %1286 = vrot.lane.b32.xlu1 %v3553_v51, %s3070_s3  ;;  %s2310_s5 = sshll.u32 %s3077_s15, 4  ;;  %s2311_s5 = int_to_ptr.vmem [resolvable:$true] %s2310_s5 }
 0xa3f   :  { %1282 = vrot.lane.b32.xlu2 %v3553_v51, %s3069_s21  ;;  %1288 = vrot.lane.b32.xlu1 %v3545_v48, %s3071_s25  ;;  %s2942_s21 = sshra.s32 %s2313_s13, 4  ;;  %s2943_s21 = int_to_ptr.hbm [resolvable:$true] %s2942_s21 }
 0xa40   :  { %s2944_s3 = scalar_lea.hbm %s2943_s21, 2  ;;  %p2947_p0 = scmp.lt.s32.totalorder %s2943_s21, %s3261_s9 }
 0xa41   :  { %p2945_p13 = scmp.ne.s32.totalorder %s2943_s21, %s2944_s3 }
 0xa8e   :  { %v3563_v60 = vpop.permute.xlu0 %1284  ;;  %v3565_v0 = vpop.permute.xlu1 %1275 }
 0xa8f   :  { %1444 = vrot.lane.b32.xlu1 %v3563_v60, %s3071_s25  ;;  %1340 = vrot.lane.b32.xlu0 %v3565_v0, %s3071_s25  ;;  %v2530_v42 = vpack.i.bf16 %v3545_v48, %v3565_v0 }
 0xa91   :  { %v3571_v53 = vpop.permute.xlu2 %1278 }
 0xa92   :  { %1366 = vrot.lane.b32.xlu2 %v3571_v53, %s3071_s25 }
 0xa96   :  { %v3575_v1 = vpop.permute.xlu0 %1280 }
 0xa97   :  { %1392 = vrot.lane.b32.xlu1 %v3575_v1, %s3071_s25  ;;  %1314 = vrot.lane.b32.xlu0 %v3553_v51, %s3071_s25 }
 0xa99   :  { %v3581_v52 = vpop.permute.xlu2 %1282 }
 0xa9f   :  { %1418 = vrot.lane.b32.xlu0 %v3581_v52, %s3071_s25 }
 0xaa9   :  { %v3585_v55 = vpop.permute.xlu1 %1286 }
 0xaaa   :  { %1470 = vrot.lane.b32.xlu2 %v3585_v55, %s3071_s25  ;;  %s2946_s25 = scalar_lea.hbm %s3261_s9, 2 }
 0xaab   :  { %p2948_p1 = scmp.lt.s32.totalorder %s2946_s25, %s2944_s3 }
 0xaad   :  { %p2949_p2 = por %p2948_p1, %p2947_p0 }
 0xaaf   :  { %p2950_p3 = pnand %p2949_p2, %p2945_p13 }
 0xab1   :  { %v1289_v57 = vpop.permute.xlu1 %1288 }
 0xab2   :  { %2417 = vmatpush.xpose.msk.msrb.mxu3 %vm430_vm8, %v1289_v57 }
 0xab5   :  { %2418 = vmatmul.msk.f32.vlgmr.msrb.gmra.mxu3 %vm430_vm8, %v3545_v48 }
 0xaec   :  { %v1367_v63 = vpop.permute.xlu2 %1366 }
 0xaed   :  { %2423 = vmatpush.xpose.msk.msra.mxu3 %vm430_vm8, %v1367_v63 }
 0xaf0   :  { %2424 = vmatmul.msk.f32.vlgmr.msra.gmra.mxu3 %vm430_vm8, %v3571_v53 }
 0xb01   :  { %v1341_v2 = vpop.permute.xlu0 %1340  ;;  %v1445_v3 = vpop.permute.xlu1 %1444 }
 0xb02   :  { %2421 = vmatpush.xpose.msk.msra.mxu2 %vm430_vm8, %v1341_v2 }
 0xb04   :  { %v1471_v4 = vpop.permute.xlu2 %1470 }
 0xb05   :  { %2422 = vmatmul.msk.f32.vlgmr.msra.gmra.mxu2 %vm430_vm8, %v3565_v0  ;;  %2431 = vmatpush.xpose.msk.msrb.mxu3 %vm430_vm8, %v1471_v4 }
 0xb06   :  { %2429 = vmatpush.xpose.msk.msrb.mxu2 %vm430_vm8, %v1445_v3 }
 0xb08   :  { %2432 = vmatmul.msk.f32.vlgmr.msrb.gmra.mxu3 %vm430_vm8, %v3585_v55 }
 0xb09   :  { %v1315_v54 = vpop.permute.xlu0 %1314  ;;  %v1393_v5 = vpop.permute.xlu1 %1392 }
 0xb0a   :  { %2419 = vmatpush.xpose.msk.msra.mxu0 %vm430_vm8, %v1315_v54 }
 0xb0d   :  { %2420 = vmatmul.msk.f32.vlgmr.msra.gmra.mxu0 %vm430_vm8, %v3553_v51  ;;  %2430 = vmatmul.msk.f32.vlgmr.msrb.gmra.mxu2 %vm430_vm8, %v3563_v60 }
 0xb0e   :  { %2425 = vmatpush.xpose.msk.msrb.mxu0 %vm430_vm8, %v1393_v5 }
 0xb11   :  { %v1419_v6 = vpop.permute.xlu0 %1418 }
 0xb12   :  { %2427 = vmatpush.xpose.msk.msra.mxu1 %vm430_vm8, %v1419_v6 }
 0xb15   :  { %2426 = vmatmul.msk.f32.vlgmr.msrb.gmra.mxu0 %vm430_vm8, %v3575_v1  ;;  %2428 = vmatmul.msk.f32.vlgmr.msra.gmra.mxu1 %vm430_vm8, %v3581_v52 }
 0xb38   :  { %v1311_v7 = vpop.f32.mrf.mxu3 }
 0xb39   :  { %v1496_v8 = vmul.f32 0.35355338, %v1311_v7 }
 0xb3b   :  { %v1504_v9 = vadd.f32 %v1496_v8, %v3407_v18 }
 0xb3d   :  { %v1512_v10 = vsel %vm430_vm8, %v1504_v9, -inf }
 0xb3e   :  { %1513 = vmax.xlane.f32.xlu1 %v1512_v10 }
 0xb73   :  { %v1389_v13 = vpop.f32.mrf.mxu3 }
 0xb74   :  { %v1499_v30 = vmul.f32 0.35355338, %v1389_v13 }
 0xb76   :  { %v1507_v35 = vadd.f32 %v1499_v30, %v3405_v15 }
 0xb78   :  { %v1521_v37 = vsel %vm430_vm8, %v1507_v35, -inf }
 0xb88   :  { %v1363_v12 = vpop.f32.mrf.mxu2 }
 0xb89   :  { %v1498_v14 = vmul.f32 0.35355338, %v1363_v12 }
 0xb8a   :  { %v1337_v16 = vpop.f32.mrf.mxu0 }
 0xb8b   :  { %v1497_v56 = vmul.f32 0.35355338, %v1337_v16  ;;  %v1506_v59 = vadd.f32 %v1498_v14, %v3407_v18  ;;  %v1493_v22 = vpop.f32.mrf.mxu3 }
 0xb8c   :  { %v1503_v27 = vmul.f32 0.35355338, %v1493_v22 }
 0xb8d   :  { %v1518_v17 = vsel %vm430_vm8, %v1506_v59, -inf  ;;  %v1505_v19 = vadd.f32 %v1497_v56, %v3405_v15 }
 0xb8e   :  { %1519 = vmax.xlane.f32.xlu2 %v1518_v17  ;;  %v1511_v33 = vadd.f32 %v1503_v27, %v3405_v15 }
 0xb8f   :  { %v1515_v20 = vsel %vm430_vm8, %v1505_v19, -inf }
 0xb90   :  { %1516 = vmax.xlane.f32.xlu1 %v1515_v20  ;;  %v1467_v21 = vpop.f32.mrf.mxu2  ;;  %v1533_v36 = vsel %vm430_vm8, %v1511_v33, -inf }
 0xb91   :  { %v1502_v58 = vmul.f32 0.35355338, %v1467_v21 }
 0xb92   :  { %v1415_v61 = vpop.f32.mrf.mxu0  ;;  %v1441_v23 = vpop.f32.mrf.mxu1 }
 0xb93   :  { %v1500_v24 = vmul.f32 0.35355338, %v1415_v61  ;;  %v1501_v25 = vmul.f32 0.35355338, %v1441_v23  ;;  %v1510_v26 = vadd.f32 %v1502_v58, %v3407_v18 }
 0xb95   :  { %v1530_v62 = vsel %vm430_vm8, %v1510_v26, -inf  ;;  %v1509_v28 = vadd.f32 %v1501_v25, %v3405_v15  ;;  %v1508_v29 = vadd.f32 %v1500_v24, %v3407_v18  ;;  %v2540_v15 = vpack.i.bf16 %v3575_v1, %v3553_v51 }
 0xb96   :  { %1531 = vmax.xlane.f32.xlu2 %v1530_v62  ;;  %v2535_v25 = vpack.i.bf16 %v3563_v60, %v3571_v53 }
 0xb97   :  { %v1527_v31 = vsel %vm430_vm8, %v1509_v28, -inf  ;;  %v1524_v32 = vsel %vm430_vm8, %v1508_v29, -inf }
 0xb98   :  { %1528 = vmax.xlane.f32.xlu1 %v1527_v31  ;;  %1525 = vmax.xlane.f32.xlu0 %v1524_v32 }
 0xb9e   :  { %1534 = vmax.xlane.f32.xlu2 %v1533_v36 }
 0xba0   :  { %1522 = vmax.xlane.f32.xlu0 %v1521_v37 }
 0xbb1   :  { %v1514_v38 = vpop.xlane.xlu1 %1513 }
 0xbb2   :  { %v1536_v18 = vsub.f32 %v1504_v9, %v1514_v38 }
 0xbb4   :  { %v1544_v39 = vmul.f32 1.442695, %v1536_v18 }
 0xbb6   :  { %2614 = vpow2.f32 %v1544_v39 }
 0xbbc   :  { %v3629_v40 = vpop.eup %2614 }
 0xbbd   :  { %v1560_v41 = vsel %vm430_vm8, %v3629_v40, 0.0 }
 0xbbe   :  { %1561 = vadd.xlane.f32.xlu2 %v1560_v41 }
 0xbd6   :  { %2531 = vrot.lane.b32.xlu2 %v2530_v42, %s3072_s12 }
 0xbde   :  { %2541 = vrot.lane.b32.xlu2 %v2540_v15, %s3072_s12 }
 0xbe6   :  { %1730 = vrot.lane.b32.xlu2 %v3581_v52, %s3072_s12 }
 0xc01   :  { %v1520_v47 = vpop.xlane.xlu2 %1519 }
 0xc02   :  { %v1538_v48 = vsub.f32 %v1506_v59, %v1520_v47 }
 0xc03   :  { %v1517_v43 = vpop.xlane.xlu1 %1516 }
 0xc04   :  { %v1537_v44 = vsub.f32 %v1505_v19, %v1517_v43  ;;  %v1548_v1 = vmul.f32 1.442695, %v1538_v48 }
 0xc06   :  { %v1546_v45 = vmul.f32 1.442695, %v1537_v44 }
 0xc08   :  { %2616 = vpow2.f32 %v1546_v45 }
 0xc09   :  { %v1532_v51 = vpop.xlane.xlu2 %1531 }
 0xc0a   :  { %v1542_v4 = vsub.f32 %v1510_v26, %v1532_v51 }
 0xc0b   :  { %v1526_v49 = vpop.xlane.xlu0 %1525  ;;  %v1529_v2 = vpop.xlane.xlu1 %1528 }
 0xc0c   :  { %v1540_v50 = vsub.f32 %v1508_v29, %v1526_v49  ;;  %v1541_v5 = vsub.f32 %v1509_v28, %v1529_v2  ;;  %v1556_v8 = vmul.f32 1.442695, %v1542_v4 }
 0xc0e   :  { %v3641_v57 = vpop.eup %2616  ;;  %v1552_v0 = vmul.f32 1.442695, %v1540_v50  ;;  %v1554_v9 = vmul.f32 1.442695, %v1541_v5 }
 0xc0f   :  { %v1563_v63 = vsel %vm430_vm8, %v3641_v57, 0.0 }
 0xc10   :  { %2618 = vpow2.f32 %v1552_v0  ;;  %1564 = vadd.xlane.f32.xlu1 %v1563_v63 }
 0xc11   :  { %2620 = vpow2.f32 %v1548_v1  ;;  %v1535_v10 = vpop.xlane.xlu2 %1534 }
 0xc12   :  { %v1543_v14 = vsub.f32 %v1511_v33, %v1535_v10 }
 0xc13   :  { %v1523_v52 = vpop.xlane.xlu0 %1522 }
 0xc14   :  { %v1539_v3 = vsub.f32 %v1507_v35, %v1523_v52  ;;  %v1558_v59 = vmul.f32 1.442695, %v1543_v14 }
 0xc16   :  { %v2619_v54 = vpop.eup %2618  ;;  %v1550_v6 = vmul.f32 1.442695, %v1539_v3 }
 0xc17   :  { %v1572_v7 = vsel %vm430_vm8, %v2619_v54, 0.0  ;;  %v2621_v12 = vpop.eup %2620 }
 0xc18   :  { %2622 = vpow2.f32 %v1550_v6  ;;  %1573 = vadd.xlane.f32.xlu0 %v1572_v7  ;;  %v1566_v16 = vsel %vm430_vm8, %v2621_v12, 0.0  ;;  %v1841_v6 = vld [vmem:[%s3799_s10 + $0x18] sm:$0xff]  ;;  %v1840_v7 = vld [vmem:[%s3799_s10 + $0x10] sm:$0xff] }
 0xc19   :  { %2624 = vpow2.f32 %v1556_v8  ;;  %v1839_v8 = vld [vmem:[%s3799_s10 + $0x8] sm:$0xff] }
 0xc1a   :  { %2626 = vpow2.f32 %v1554_v9  ;;  %v1838_v9 = vld [vmem:[%s3799_s10] sm:$0xff] }
 0xc1b   :  { %2628 = vpow2.f32 %v1558_v59 }
 0xc1e   :  { %v3646_v13 = vpop.eup %2622 }
 0xc1f   :  { %v1569_v56 = vsel %vm430_vm8, %v3646_v13, 0.0  ;;  %v2625_v17 = vpop.eup %2624 }
 0xc20   :  { %1567 = vadd.xlane.f32.xlu0 %v1566_v16  ;;  %1570 = vadd.xlane.f32.xlu1 %v1569_v56  ;;  %v2627_v19 = vpop.eup %2626  ;;  %v1578_v20 = vsel %vm430_vm8, %v2625_v17, 0.0 }
 0xc21   :  { %v1575_v21 = vsel %vm430_vm8, %v2627_v19, 0.0  ;;  %v2629_v22 = vpop.eup %2628 }
 0xc22   :  { %v1581_v58 = vsel %vm430_vm8, %v2629_v22, 0.0 }
 0xc28   :  { %1579 = vadd.xlane.f32.xlu0 %v1578_v20  ;;  %1576 = vadd.xlane.f32.xlu1 %v1575_v21 }
 0xc30   :  { %1582 = vadd.xlane.f32.xlu1 %v1581_v58  ;;  %v2557_v58 = vld [vmem:[%s3800_s7] ss:$0 sm:$0xff] }
 0xc31   :  { %v1562_v61 = vpop.xlane.xlu2 %1561 }
 0xc32   :  { %2630 = vrcp.f32 %v1562_v61 }
 0xc38   :  { %v2631_v23 = vpop.eup %2630 }
 0xc39   :  { %v2532_v24 = vpop.permute.xlu2 %2531  ;;  %v1592_v62 = vmul.f32 %v2631_v23, %v3629_v40 }
 0xc3a   :  { %v2534_v26 = vunpack.i.h.bf16 %v2532_v24  ;;  %v2533_v27 = vunpack.i.l.bf16 %v2532_v24 }
 0xc3c   :  { %2536 = vrot.lane.b32.xlu0 %v2535_v25, %s3072_s12  ;;  %1621 = vmatpush.msra.mxu0 %v2534_v26 }
 0xc3d   :  { %1673 = vmatpush.msra.mxu2 %v2533_v27  ;;  %2433 = vmatmul.msk.f32.vlgmr.msra.gmra.mxu0 %vm430_vm8, %v1592_v62 }
 0xc41   :  { %v2542_v28 = vpop.permute.xlu2 %2541 }
 0xc42   :  { %v2544_v29 = vunpack.i.h.bf16 %v2542_v28  ;;  %v2543_v30 = vunpack.i.l.bf16 %v2542_v28 }
 0xc44   :  { %1647 = vmatpush.msrb.mxu1 %v2543_v30  ;;  %1725 = vmatpush.msrb.mxu0 %v2544_v29 }
 0xc46   :  { %1864 = vmatpush.msra.mxu0 %v1841_v6 }
 0xc48   :  { %1865 = vmatpush.msra.mxu0 %v1840_v7 }
 0xc49   :  { %v1731_v31 = vpop.permute.xlu2 %1730  ;;  %1782 = vrot.lane.b32.xlu1 %v3585_v55, %s3072_s12 }
 0xc4a   :  { %1751 = vmatpush.msra.mxu1 %v1731_v31  ;;  %1866 = vmatpush.msra.mxu0 %v1839_v8 }
 0xc4c   :  { %1867 = vmatpush.msra.mxu0 %v1838_v9 }
 0xc83   :  { %v1565_v60 = vpop.xlane.xlu1 %1564 }
 0xc84   :  { %2632 = vrcp.f32 %v1565_v60 }
 0xc8a   :  { %v2633_v53 = vpop.eup %2632 }
 0xc8b   :  { %v1593_v32 = vmul.f32 %v2633_v53, %v3641_v57  ;;  %v1574_v33 = vpop.xlane.xlu0 %1573 }
 0xc8c   :  { %2634 = vrcp.f32 %v1574_v33 }
 0xc8d   :  { %2434 = vmatmul.msk.f32.vlgmr.msrb.gmra.mxu1 %vm430_vm8, %v1593_v32 }
 0xc92   :  { %v2635_v35 = vpop.eup %2634 }
 0xc93   :  { %v1596_v36 = vmul.f32 %v2635_v35, %v2619_v54  ;;  %v1568_v37 = vpop.xlane.xlu0 %1567  ;;  %v1571_v38 = vpop.xlane.xlu1 %1570 }
 0xc94   :  { %2636 = vrcp.f32 %v1568_v37 }
 0xc95   :  { %2437 = vmatmul.msk.f32.vlgmr.msrb.gmra.mxu0 %vm430_vm8, %v1596_v36 }
 0xc9a   :  { %v2637_v18 = vpop.eup %2636 }
 0xc9b   :  { %v1594_v39 = vmul.f32 %v2637_v18, %v2621_v12  ;;  %v1577_v55 = vpop.xlane.xlu1 %1576  ;;  %v1580_v41 = vpop.xlane.xlu0 %1579 }
 0xc9c   :  { %2638 = vrcp.f32 %v1577_v55 }
 0xc9d   :  { %2435 = vmatmul.msk.f32.vlgmr.msra.gmra.mxu2 %vm430_vm8, %v1594_v39  ;;  %2640 = vrcp.f32 %v1571_v38 }
 0xc9e   :  { %2642 = vrcp.f32 %v1580_v41 }
 0xca2   :  { %v2639_v40 = vpop.eup %2638 }
 0xca3   :  { %v1597_v42 = vmul.f32 %v2639_v40, %v2627_v19  ;;  %v2641_v15 = vpop.eup %2640  ;;  %v1583_v45 = vpop.xlane.xlu1 %1582 }
 0xca4   :  { %v2643_v43 = vpop.eup %2642  ;;  %v1595_v50 = vmul.f32 %v2641_v15, %v3646_v13  ;;  %2644 = vrcp.f32 %v1583_v45 }
 0xca5   :  { %2438 = vmatmul.msk.f32.vlgmr.msra.gmra.mxu1 %vm430_vm8, %v1597_v42  ;;  %v1598_v57 = vmul.f32 %v2643_v43, %v2625_v17 }
 0xcaa   :  { %v2645_v48 = vpop.eup %2644 }
 0xcab   :  { %v1599_v0 = vmul.f32 %v2645_v48, %v2629_v22 }
 0xcae   :  { %v2537_v44 = vpop.permute.xlu0 %2536 }
 0xcaf   :  { %v2539_v47 = vunpack.i.h.bf16 %v2537_v44  ;;  %v2538_v49 = vunpack.i.l.bf16 %v2537_v44 }
 0xcb1   :  { %1699 = vmatpush.msra.mxu3 %v2538_v49  ;;  %1777 = vmatpush.msrb.mxu2 %v2539_v47 }
 0xcb2   :  { %2436 = vmatmul.msk.f32.vlgmr.msra.gmra.mxu3 %vm430_vm8, %v1595_v50  ;;  %2439 = vmatmul.msk.f32.vlgmr.msrb.gmra.mxu2 %vm430_vm8, %v1598_v57  ;;  %v2558_v57 = vld [vmem:[#allocation9] ss:$0 sm:$0xff] }
 0xcba   :  { %v1623_v51 = vpop.f32.mrf.mxu0 }
 0xcbb   :  { %v1783_v63 = vpop.permute.xlu1 %1782 }
 0xcbc   :  { %1803 = vmatpush.msrb.mxu3 %v1783_v63 }
 0xcbd   :  { %2440 = vmatmul.msk.f32.vlgmr.msrb.gmra.mxu3 %vm430_vm8, %v1599_v0 }
 0xd0a   :  { %v1649_v52 = vpop.f32.mrf.mxu1 }
 0xd12   :  { %v1727_v1 = vpop.f32.mrf.mxu0 }
 0xd13   :  { %1813 = vrot.lane.b32.xlu2 %v1727_v1, %s3074_s22  ;;  %v2559_v1 = vld [vmem:[#allocation11] ss:$0 sm:$0xff] }
 0xd20   :  { %v1675_v2 = vpop.f32.mrf.mxu2 }
 0xd21   :  { %1809 = vrot.lane.b32.xlu0 %v1675_v2, %s3060_s17 }
 0xd22   :  { %v1753_v54 = vpop.f32.mrf.mxu1 }
 0xd35   :  { %v1701_v3 = vpop.f32.mrf.mxu3  ;;  %v1779_v4 = vpop.f32.mrf.mxu2 }
 0xd36   :  { %1817 = vrot.lane.b32.xlu0 %v1779_v4, %s3073_s23  ;;  %1824 = vrot.lane.b32.xlu2 %v1701_v3, %s3060_s17  ;;  %s3801_s17 = sld [smem:[#allocation47_spill]] }
 0xd3c   :  { %v1936_v36 = vld [vmem:[%s3801_s17 + $0x18] sm:$0xff]  ;;  %v1935_v37 = vld [vmem:[%s3801_s17 + $0x10] sm:$0xff]  ;;  %v1934_v38 = vld [vmem:[%s3801_s17 + $0x8] sm:$0xff] }
 0xd3d   :  { %1959 = vmatpush.msrb.mxu1 %v1936_v36  ;;  %v1933_v18 = vld [vmem:[%s3801_s17] sm:$0xff]  ;;  %v2561_v36 = vld [vmem:[#allocation14] ss:$0 sm:$0xff] }
 0xd3e   :  { %1828 = vrot.lane.b32.xlu0 %v1753_v54, %s3074_s22 }
 0xd3f   :  { %1960 = vmatpush.msrb.mxu1 %v1935_v37 }
 0xd40   :  { %v1805_v5 = vpop.f32.mrf.mxu3 }
 0xd41   :  { %1832 = vrot.lane.b32.xlu1 %v1805_v5, %s3073_s23  ;;  %1961 = vmatpush.msrb.mxu1 %v1934_v38 }
 0xd43   :  { %1962 = vmatpush.msrb.mxu1 %v1933_v18 }
 0xd6d   :  { %v1814_v13 = vpop.permute.xlu2 %1813 }
 0xd90   :  { %v1825_v59 = vpop.permute.xlu2 %1824 }
 0xd91   :  { %v1835_v19 = vsel %vm430_vm8, %v1649_v52, %v1825_v59  ;;  %v1989_v59 = vld [vmem:[%s3802_s11 + $0x8] sm:$0xff] }
 0xd93   :  { %v1810_v10 = vpop.permute.xlu0 %1809 }
 0xd94   :  { %v1820_v12 = vsel %vm430_vm8, %v1623_v51, %v1810_v10  ;;  %v1995_v10 = vld [vmem:[%s3802_s11 + $0x38] sm:$0xff] }
 0xd95   :  { %v1821_v14 = vsel %vm968_vm9, %v1820_v12, %v1814_v13  ;;  %2014 = vmatpush.msra.mxu2 %v1995_v10  ;;  %v1994_v12 = vld [vmem:[%s3802_s11 + $0x30] sm:$0xff]  ;;  %v1993_v13 = vld [vmem:[%s3802_s11 + $0x28] sm:$0xff] }
 0xd97   :  { %2015 = vmatpush.msra.mxu2 %v1994_v12 }
 0xd99   :  { %2016 = vmatpush.msra.mxu2 %v1993_v13  ;;  %v2112_v13 = vld [vmem:[#allocation18] sm:$0xff] }
 0xda8   :  { %v1818_v16 = vpop.permute.xlu0 %1817 }
 0xda9   :  { %v1822_v56 = vsel %vm970_vm10, %v1821_v14, %v1818_v16  ;;  %v1992_v14 = vld [vmem:[%s3802_s11 + $0x20] sm:$0xff]  ;;  %v1991_v16 = vld [vmem:[%s3802_s11 + $0x18] sm:$0xff] }
 0xdaa   :  { %2441 = vmatmul.msk.f32.vlgmr.msra.gmra.mxu0 %vm308_vm0, %v1822_v56  ;;  %2017 = vmatpush.msra.mxu2 %v1992_v14  ;;  %v1990_v56 = vld [vmem:[%s3802_s11 + $0x10] sm:$0xff] }
 0xdac   :  { %2018 = vmatpush.msra.mxu2 %v1991_v16 }
 0xdae   :  { %2019 = vmatpush.msra.mxu2 %v1990_v56 }
 0xdb0   :  { %v1829_v17 = vpop.permute.xlu0 %1828  ;;  %2020 = vmatpush.msra.mxu2 %v1989_v59  ;;  %v2199_v59 = vld [vmem:[%s3804_s16 + $0x18] sm:$0xff] }
 0xdb1   :  { %v1836_v20 = vsel %vm968_vm9, %v1835_v19, %v1829_v17  ;;  %v1988_v17 = vld [vmem:[%s3802_s11] sm:$0xff]  ;;  %v2560_v19 = vld [vmem:[#allocation12] ss:$0 sm:$0xff]  ;;  %2215 = vmatpush.msra.mxu1 %v2199_v59 }
 0xdb2   :  { %2021 = vmatpush.msra.mxu2 %v1988_v17 }
 0xdb3   :  { %v1833_v21 = vpop.permute.xlu1 %1832 }
 0xdb4   :  { %v1837_v22 = vsel %vm970_vm10, %v1836_v20, %v1833_v21 }
 0xdb5   :  { %2442 = vmatmul.msk.f32.gmra.mxu0 %vm308_vm0, %v1837_v22 }
 0xe27   :  { %v1869_v61 = vpop.f32.mrf.mxu0 }
 0xe28   :  { %v1870_v23 = vadd.f32 %v2557_v58, %v1869_v61 }
 0xe2a   :  { %v1875_v24 = vadd.f32 %v1870_v23, %v3535_v34 }
 0xe2c   :  { %v1879_v25 = vsel %vm308_vm0, %v1875_v24, 0.0 }
 0xe2d   :  { %1880 = vadd.xlane.f32.xlu2 %v1879_v25 }
 0xe32   :  { %v1872_v26 = vpop.f32.mrf.mxu0 }
 0xe33   :  { %v1873_v27 = vadd.f32 %v2557_v58, %v1872_v26 }
 0xe35   :  { %v1876_v62 = vadd.f32 %v1873_v27, %v3540_v46 }
 0xe37   :  { %v1882_v28 = vsel %vm308_vm0, %v1876_v62, 0.0 }
 0xe38   :  { %1883 = vadd.xlane.f32.xlu0 %v1882_v28 }
 0xea0   :  { %v1881_v29 = vpop.xlane.xlu2 %1880 }
 0xea1   :  { %v1885_v30 = vmul.f32 %v1881_v29, %v3315_v11 }
 0xea3   :  { %v1887_v31 = vsub.f32 %v1875_v24, %v1885_v30 }
 0xea5   :  { %v1889_v60 = vmul.f32 %v1887_v31, %v1887_v31 }
 0xea7   :  { %v1891_v34 = vsel %vm308_vm0, %v1889_v60, 0.0 }
 0xea8   :  { %1892 = vadd.xlane.f32.xlu1 %v1891_v34 }
 0xeab   :  { %v1884_v53 = vpop.xlane.xlu0 %1883 }
 0xeac   :  { %v1886_v32 = vmul.f32 %v1884_v53, %v3315_v11 }
 0xeae   :  { %v1888_v33 = vsub.f32 %v1876_v62, %v1886_v32 }
 0xeb0   :  { %v1890_v35 = vmul.f32 %v1888_v33, %v1888_v33 }
 0xeb2   :  { %v1894_v46 = vsel %vm308_vm0, %v1890_v35, 0.0 }
 0xeb3   :  { %1895 = vadd.xlane.f32.xlu2 %v1894_v46 }
 0xf1b   :  { %v1893_v39 = vpop.xlane.xlu1 %1892 }
 0xf1c   :  { %v1897_v55 = vmul.f32 %v1893_v39, %v3315_v11 }
 0xf1e   :  { %v1899_v40 = vadd.f32 1e-12, %v1897_v55 }
 0xf20   :  { %2646 = vrsqrt.f32 %v1899_v40  ;;  %vm1907_vm10 = vweird.f32 %v1899_v40 }
 0xf26   :  { %v2647_v41 = vpop.eup %2646  ;;  %v1896_v42 = vpop.xlane.xlu2 %1895 }
 0xf27   :  { %v1902_v15 = vmul.f32 %v2647_v41, %v1899_v40  ;;  %v1898_v43 = vmul.f32 %v1896_v42, %v3315_v11  ;;  %vm1908_vm8 = vweird.f32 %v2647_v41 }
 0xf28   :  { %vm1909_vm12 = vmor %vm1907_vm10, %vm1908_vm8  ;;  %vm2224_vm8 = vcmask 123904  }
 0xf29   :  { %v1903_v44 = vmul.f32 %v2647_v41, %v1902_v15  ;;  %v1900_v45 = vadd.f32 1e-12, %v1898_v43  ;;  %v2171_v15 = vld [vmem:[#allocation20 + $0x18] sm:$0xff]  ;;  %v2170_v43 = vld [vmem:[#allocation20 + $0x10] sm:$0xff] }
 0xf2a   :  { %2187 = vmatpush.msrb.mxu0 %v2171_v15 }
 0xf2b   :  { %v1904_v47 = vmul.f32 0.5, %v1903_v44  ;;  %2648 = vrsqrt.f32 %v1900_v45  ;;  %vm1917_vm14 = vweird.f32 %v1900_v45  ;;  %v2169_v44 = vld [vmem:[#allocation20 + $0x8] sm:$0xff] }
 0xf2c   :  { %2188 = vmatpush.msrb.mxu0 %v2170_v43 }
 0xf2d   :  { %v1905_v49 = vsub.f32 1.5, %v1904_v47  ;;  %v2167_v47 = vld [vmem:[%s3803_s24] sm:$0x3] }
 0xf2e   :  { %2189 = vmatpush.msrb.mxu0 %v2169_v44 }
 0xf2f   :  { %v1906_v50 = vmul.f32 %v2647_v41, %v1905_v49 }
 0xf31   :  { %v2649_v48 = vpop.eup %2648  ;;  %v1910_v0 = vsel %vm1909_vm12, %v2647_v41, %v1906_v50 }
 0xf32   :  { %v1921_v63 = vmul.f32 %v1910_v0, %v1887_v31  ;;  %v1912_v51 = vmul.f32 %v2649_v48, %v1900_v45  ;;  %vm1918_vm13 = vweird.f32 %v2649_v48  ;;  %v2168_v45 = vld [vmem:[#allocation20] sm:$0xff] }
 0xf33   :  { %vm1919_vm15 = vmor %vm1917_vm14, %vm1918_vm13  ;;  %2190 = vmatpush.msrb.mxu0 %v2168_v45 }
 0xf34   :  { %v1926_v2 = vmul.f32 %v2558_v57, %v1921_v63  ;;  %v1913_v52 = vmul.f32 %v2649_v48, %v1912_v51  ;;  %2449 = vmatmul.msk.f32.vlgmr.msrb.gmra.mxu0 %vm308_vm0, %v2167_v47 }
 0xf36   :  { %v1914_v3 = vmul.f32 0.5, %v1913_v52  ;;  %v1931_v4 = vadd.f32 %v2559_v1, %v1926_v2 }
 0xf38   :  { %v1915_v54 = vsub.f32 1.5, %v1914_v3  ;;  %2443 = vmatmul.msk.f32.vlgmr.msrb.gmra.mxu1 %vm308_vm0, %v1931_v4 }
 0xf3a   :  { %v1916_v5 = vmul.f32 %v2649_v48, %v1915_v54 }
 0xf3c   :  { %v1920_v6 = vsel %vm1919_vm15, %v2649_v48, %v1916_v5  ;;  %v2115_v5 = vld [vmem:[#allocation18 + $0x18] sm:$0xff] }
 0xf3d   :  { %v1922_v7 = vmul.f32 %v1920_v6, %v1888_v33  ;;  %v2114_v6 = vld [vmem:[#allocation18 + $0x10] sm:$0xff]  ;;  %2131 = vmatpush.msra.mxu3 %v2115_v5 }
 0xf3e   :  { %v2141_v5 = vld [vmem:[%s3805_s20 + $0x8] sm:$0xff] }
 0xf3f   :  { %v1927_v8 = vmul.f32 %v2558_v57, %v1922_v7  ;;  %2132 = vmatpush.msra.mxu3 %v2114_v6  ;;  %v2140_v6 = vld [vmem:[%s3805_s20] sm:$0xff] }
 0xf41   :  { %v1932_v9 = vadd.f32 %v2559_v1, %v1927_v8 }
 0xf43   :  { %2444 = vmatmul.msk.f32.gmra.mxu1 %vm308_vm0, %v1932_v9 }
 0xfb5   :  { %v1964_v20 = vpop.f32.mrf.mxu1 }
 0xfb6   :  { %v1965_v21 = vadd.f32 %v2560_v19, %v1964_v20 }
 0xfb8   :  { %v1972_v22 = vmul.f32 0.044715, %v1965_v21  ;;  %v1970_v30 = vmul.f32 0.5, %v1965_v21 }
 0xfba   :  { %v1974_v58 = vmul.f32 %v1972_v22, %v1965_v21 }
 0xfbc   :  { %v1976_v61 = vmul.f32 %v1974_v58, %v1965_v21 }
 0xfbe   :  { %v1978_v23 = vadd.f32 %v1976_v61, %v1965_v21  ;;  %v2197_v21 = vld [vmem:[%s3804_s16 + $0x8] sm:$0xff]  ;;  %v2192_v61 = vpop.f32.mrf.mxu0 }
 0xfc0   :  { %v1980_v24 = vmul.f32 0.7978846, %v1978_v23  ;;  %v1967_v25 = vpop.f32.mrf.mxu1  ;;  %v2563_v23 = vld [vmem:[#allocation17] ss:$0 sm:$0xff] }
 0xfc1   :  { %v1968_v26 = vadd.f32 %v2560_v19, %v1967_v25  ;;  %v2198_v19 = vld [vmem:[%s3804_s16 + $0x10] sm:$0xff] }
 0xfc2   :  { %2650 = vtanh.f32 %v1980_v24  ;;  %2216 = vmatpush.msra.mxu1 %v2198_v19 }
 0xfc3   :  { %v1973_v27 = vmul.f32 0.044715, %v1968_v26  ;;  %v1971_v33 = vmul.f32 0.5, %v1968_v26 }
 0xfc4   :  { %2217 = vmatpush.msra.mxu1 %v2197_v21  ;;  %v2280_v21 = vld [vmem:[#allocation2] sm:$0x1] }
 0xfc5   :  { %v1975_v62 = vmul.f32 %v1973_v27, %v1968_v26  ;;  %v2196_v27 = vld [vmem:[%s3804_s16] sm:$0xff] }
 0xfc6   :  { %2218 = vmatpush.msra.mxu1 %v2196_v27 }
 0xfc7   :  { %v1977_v28 = vmul.f32 %v1975_v62, %v1968_v26  ;;  %v2143_v62 = vld [vmem:[%s3805_s20 + $0x18] sm:$0xff] }
 0xfc8   :  { %v2651_v29 = vpop.eup %2650 }
 0xfc9   :  { %v1984_v31 = vadd.f32 1.0, %v2651_v29  ;;  %v1979_v60 = vadd.f32 %v1977_v28, %v1968_v26  ;;  %v2195_v26 = vmax.f32 %v2192_v61, 0.0  ;;  %v2142_v28 = vld [vmem:[%s3805_s20 + $0x10] sm:$0xff] }
 0xfcb   :  { %v1986_v34 = vmul.f32 %v1984_v31, %v1970_v30  ;;  %v1981_v53 = vmul.f32 0.7978846, %v1979_v60  ;;  %v3075_v31 = vmov 8.0   ;;  %2450 = vmatmul.msk.f32.vlgmr.msra.gmra.mxu1 %vm308_vm0, %v2195_v26 }
 0xfcd   :  { %2445 = vmatmul.msk.f32.vlgmr.msra.gmra.mxu2 %vm1149_vm2, %v1986_v34  ;;  %2652 = vtanh.f32 %v1981_v53 }
 0xfd3   :  { %v2653_v32 = vpop.eup %2652 }
 0xfd4   :  { %v1985_v35 = vadd.f32 1.0, %v2653_v32 }
 0xfd6   :  { %v1987_v46 = vmul.f32 %v1985_v35, %v1971_v33 }
 0xfd8   :  { %2446 = vmatmul.msk.f32.gmra.mxu2 %vm1149_vm2, %v1987_v46 }
0x1050   :  { %v2023_v37 = vpop.f32.mrf.mxu2 }
0x1051   :  { %v2024_v38 = vadd.f32 %v2561_v36, %v2023_v37 }
0x1053   :  { %v2029_v18 = vadd.f32 %v2024_v38, %v1931_v4 }
0x1055   :  { %v2033_v39 = vsel %vm308_vm0, %v2029_v18, 0.0 }
0x1056   :  { %2034 = vadd.xlane.f32.xlu0 %v2033_v39 }
0x105b   :  { %v2026_v55 = vpop.f32.mrf.mxu2 }
0x105c   :  { %v2027_v40 = vadd.f32 %v2561_v36, %v2026_v55 }
0x105e   :  { %v2030_v41 = vadd.f32 %v2027_v40, %v1932_v9  ;;  %v2113_v9 = vld [vmem:[#allocation18 + $0x8] sm:$0xff] }
0x105f   :  { %2133 = vmatpush.msra.mxu3 %v2113_v9 }
0x1060   :  { %v2036_v42 = vsel %vm308_vm0, %v2030_v41, 0.0 }
0x1061   :  { %2037 = vadd.xlane.f32.xlu1 %v2036_v42  ;;  %2134 = vmatpush.msra.mxu3 %v2112_v13 }
0x1063   :  { %2159 = vmatpush.msrb.mxu3 %v2143_v62 }
0x1065   :  { %2160 = vmatpush.msrb.mxu3 %v2142_v28 }
0x1067   :  { %2161 = vmatpush.msrb.mxu3 %v2141_v5 }
0x1069   :  { %2162 = vmatpush.msrb.mxu3 %v2140_v6 }
0x10c9   :  { %v2035_v49 = vpop.xlane.xlu0 %2034 }
0x10ca   :  { %v2039_v50 = vmul.f32 %v2035_v49, %v3315_v11 }
0x10cc   :  { %v2041_v57 = vsub.f32 %v2029_v18, %v2039_v50 }
0x10ce   :  { %v2043_v48 = vmul.f32 %v2041_v57, %v2041_v57 }
0x10d0   :  { %v2045_v0 = vsel %vm308_vm0, %v2043_v48, 0.0 }
0x10d1   :  { %2046 = vadd.xlane.f32.xlu2 %v2045_v0 }
0x10d4   :  { %v2038_v63 = vpop.xlane.xlu1 %2037 }
0x10d5   :  { %v2040_v51 = vmul.f32 %v2038_v63, %v3315_v11 }
0x10d7   :  { %v3722_v1 = vsub.f32 %v2030_v41, %v2040_v51 }
0x10d9   :  { %v2044_v2 = vmul.f32 %v3722_v1, %v3722_v1 }
0x10db   :  { %v2048_v52 = vsel %vm308_vm0, %v2044_v2, 0.0 }
0x10dc   :  { %2049 = vadd.xlane.f32.xlu0 %v2048_v52 }
0x1144   :  { %v2047_v3 = vpop.xlane.xlu2 %2046 }
0x1145   :  { %v2051_v4 = vmul.f32 %v2047_v3, %v3315_v11  ;;  %v2220_v3 = vpop.f32.mrf.mxu1 }
0x1147   :  { %v2053_v54 = vadd.f32 1e-12, %v2051_v4  ;;  %v2239_v4 = vmul.f32 %v2220_v3, %v2220_v3 }
0x1149   :  { %2654 = vrsqrt.f32 %v2053_v54  ;;  %vm2061_vm2 = vweird.f32 %v2053_v54 }
0x114f   :  { %v2655_v7 = vpop.eup %2654  ;;  %v2050_v8 = vpop.xlane.xlu0 %2049 }
0x1150   :  { %v2056_v10 = vmul.f32 %v2655_v7, %v2053_v54  ;;  %v2052_v12 = vmul.f32 %v2050_v8, %v3315_v11  ;;  %vm2062_vm1 = vweird.f32 %v2655_v7  ;;  %v2562_v11 = vld [vmem:[#allocation15] ss:$0 sm:$0xff]  ;;  %v2240_v54 = vsel %vm2224_vm8, %v2239_v4, 0.0 }
0x1151   :  { %vm2063_vm3 = vmor %vm2061_vm2, %vm2062_vm1  ;;  %2241 = vadd.xlane.f32.xlu1 %v2240_v54 }
0x1152   :  { %v2057_v14 = vmul.f32 %v2655_v7, %v2056_v10  ;;  %v2054_v16 = vadd.f32 1e-12, %v2052_v12 }
0x1154   :  { %v2058_v56 = vmul.f32 0.5, %v2057_v14  ;;  %2656 = vrsqrt.f32 %v2054_v16  ;;  %vm2071_vm5 = vweird.f32 %v2054_v16 }
0x1155   :  { %2658 = vrcp.f32 %v3075_v31 }
0x1156   :  { %v2059_v17 = vsub.f32 1.5, %v2058_v56 }
0x1158   :  { %v2060_v20 = vmul.f32 %v2655_v7, %v2059_v17 }
0x115a   :  { %v2657_v22 = vpop.eup %2656  ;;  %v2064_v58 = vsel %vm2063_vm3, %v2655_v7, %v2060_v20 }
0x115b   :  { %v2075_v24 = vmul.f32 %v2064_v58, %v2041_v57  ;;  %v2066_v25 = vmul.f32 %v2657_v22, %v2054_v16  ;;  %vm2072_vm4 = vweird.f32 %v2657_v22  ;;  %v2659_v35 = vpop.eup %2658  ;;  %v2281_v58 = vmul.f32 1.442695, %v2280_v21 }
0x115c   :  { %vm2073_vm6 = vmor %vm2071_vm5, %vm2072_vm4  ;;  %v2095_v18 = vmul.f32 8.0, %v2659_v35  ;;  %vm2099_vm7 = vweird.f32 %v2659_v35 }
0x115d   :  { %v2080_v29 = vmul.f32 %v2562_v11, %v2075_v24  ;;  %v2067_v30 = vmul.f32 %v2657_v22, %v2066_v25 }
0x115e   :  { %v2096_v41 = vsub.f32 1.0, %v2095_v18 }
0x115f   :  { %v2085_v60 = vadd.f32 %v2563_v23, %v2080_v29  ;;  %v2068_v34 = vmul.f32 0.5, %v2067_v30 }
0x1160   :  { %v2097_v44 = vmul.f32 %v2659_v35, %v2096_v41 }
0x1161   :  { %v2087_v53 = vsel %vm308_vm0, %v2085_v60, 0.0  ;;  %v2069_v32 = vsub.f32 1.5, %v2068_v34 }
0x1162   :  { %v2088_v33 = vrot.slane %v2087_v53, 4  ;;  %v2098_v50 = vadd.f32 %v2659_v35, %v2097_v44 }
0x1163   :  { %v2070_v46 = vmul.f32 %v2657_v22, %v2069_v32 }
0x1164   :  { %v2089_v37 = vadd.f32 %v2088_v33, %v2087_v53  ;;  %v2100_v63 = vsel %vm2099_vm7, %v2659_v35, %v2098_v50 }
0x1165   :  { %v2074_v36 = vsel %vm2073_vm6, %v2657_v22, %v2070_v46  ;;  %v3076_v22 = vmov 0  }
0x1166   :  { %v2076_v38 = vmul.f32 %v2074_v36, %v3722_v1  ;;  %v2090_v55 = vrot.slane %v2089_v37, 2  ;;  %2545 = vset.pattern.permute.xlu0 %v3076_v22 }
0x1168   :  { %v2081_v39 = vmul.f32 %v2562_v11, %v2076_v38  ;;  %v2091_v43 = vadd.f32 %v2090_v55, %v2089_v37 }
0x116a   :  { %v2086_v40 = vadd.f32 %v2563_v23, %v2081_v39  ;;  %v2092_v47 = vrot.slane %v2091_v43, 1 }
0x116c   :  { %v2102_v42 = vsel %vm308_vm0, %v2086_v40, 0.0  ;;  %v2093_v48 = vadd.f32 %v2092_v47, %v2091_v43 }
0x116d   :  { %v2103_v15 = vrot.slane %v2102_v42, 4 }
0x116e   :  { %v2101_v1 = vmul.f32 %v2100_v63, %v2093_v48 }
0x116f   :  { %v2104_v45 = vadd.f32 %v2103_v15, %v2102_v42 }
0x1171   :  { %v2105_v49 = vrot.slane %v2104_v45, 2 }
0x1173   :  { %v2106_v57 = vadd.f32 %v2105_v49, %v2104_v45 }
0x1175   :  { %v2107_v0 = vrot.slane %v2106_v57, 1 }
0x1177   :  { %v2108_v51 = vadd.f32 %v2107_v0, %v2106_v57 }
0x1179   :  { %v2109_v2 = vmul.f32 %v2108_v51, %v2100_v63 }
0x117b   :  { %v2111_v52 = vsel %vm2110_vm11, %v2101_v1, %v2109_v2 }
0x117c   :  { %2447 = vmatmul.msk.f32.vlgmr.msra.gmra.mxu3 %vm308_vm0, %v2111_v52 }
0x11c4   :  { %v2242_v9 = vpop.xlane.xlu1 %2241 }
0x11c5   :  { %2660 = vrsqrt.f32 %v2242_v9  ;;  %vm2249_vm10 = vweird.f32 %v2242_v9 }
0x11c6   :  { %2662 = vpow2.f32 %v2281_v58 }
0x11cb   :  { %v2661_v10 = vpop.eup %2660 }
0x11cc   :  { %v2244_v12 = vmul.f32 %v2661_v10, %v2242_v9  ;;  %vm2250_vm12 = vweird.f32 %v2661_v10  ;;  %v2663_v61 = vpop.eup %2662 }
0x11cd   :  { %vm2251_vm13 = vmor %vm2249_vm10, %vm2250_vm12  ;;  %v2284_v23 = vperm.slane %v2663_v61, 0 }
0x11ce   :  { %v2245_v13 = vmul.f32 %v2661_v10, %v2244_v12 }
0x11cf   :  { %2286 = vperm.xlu0 %2545, %v2284_v23  }
0x11d0   :  { %v2246_v14 = vmul.f32 0.5, %v2245_v13 }
0x11d2   :  { %v2247_v16 = vsub.f32 1.5, %v2246_v14 }
0x11d4   :  { %v2248_v56 = vmul.f32 %v2661_v10, %v2247_v16 }
0x11d6   :  { %v2252_v59 = vsel %vm2251_vm13, %v2661_v10, %v2248_v56 }
0x11d7   :  { %v2253_v17 = vmul.f32 %v2252_v59, %v2220_v3 }
0x11d9   :  { %2293 = vst.msk [vmem:[#allocation24] sm:$0x3] %vm2224_vm8, %v2253_v17  ;;  %2451 = vmatpush.xpose.msk.msra.mxu3 %vm968_vm9, %v2253_v17 }
0x11ff   :  { %v2136_v7 = vpop.f32.mrf.mxu3 }
0x1200   :  { %v2139_v8 = vmax.f32 %v2136_v7, 0.0 }
0x1202   :  { %2448 = vmatmul.msk.f32.vlgmr.msrb.gmra.mxu3 %vm308_vm0, %v2139_v8 }
0x1285   :  { %v2164_v19 = vpop.f32.mrf.mxu3 }
0x1286   :  { %v2223_v20 = vmul.f32 %v2164_v19, %v2164_v19 }
0x1288   :  { %v2225_v11 = vsel %vm2224_vm8, %v2223_v20, 0.0 }
0x1289   :  { %2226 = vadd.xlane.f32.xlu2 %v2225_v11 }
0x12fc   :  { %v2227_v24 = vpop.xlane.xlu2 %2226 }
0x12fd   :  { %2664 = vrsqrt.f32 %v2227_v24  ;;  %vm2234_vm14 = vweird.f32 %v2227_v24 }
0x1303   :  { %v2665_v25 = vpop.eup %2664 }
0x1304   :  { %v2229_v26 = vmul.f32 %v2665_v25, %v2227_v24  ;;  %vm2235_vm0 = vweird.f32 %v2665_v25 }
0x1305   :  { %vm2236_vm15 = vmor %vm2234_vm14, %vm2235_vm0 }
0x1306   :  { %v2230_v27 = vmul.f32 %v2665_v25, %v2229_v26 }
0x1308   :  { %v2231_v62 = vmul.f32 0.5, %v2230_v27 }
0x130a   :  { %v2232_v28 = vsub.f32 1.5, %v2231_v62 }
0x130c   :  { %v2233_v29 = vmul.f32 %v2665_v25, %v2232_v28 }
0x130e   :  { %v2237_v30 = vsel %vm2236_vm15, %v2665_v25, %v2233_v29 }
0x130f   :  { %v2238_v31 = vmul.f32 %v2237_v30, %v2164_v19 }
0x1311   :  { %2292 = vst.msk [vmem:[#allocation22] sm:$0x3] %vm2224_vm8, %v2238_v31  ;;  %2452 = vmatmul.msk.f32.vlgmr.msra.gmra.mxu3 %vm968_vm9, %v2238_v31 }
0x1312   :  { %2953 = shalt.err (!%p2950_p3)
}
0x1313   :  { %2315 = dma.vmem_to_hbm [thread:$0]  %s2311_s5, 32, %s2313_s13, [#allocation23]  }
0x1314   :  { %s2323_s30 = sshll.u32 %s3266_s29, 4  ;;  %s3078_s12 = smov [#allocation24]   ;;  %s2324_s30 = int_to_ptr.hbm [resolvable:$true] %s2323_s30 }
0x1315   :  { %s2321_s18 = sshll.u32 %s3078_s12, 4  ;;  %s2966_s23 = sshra.s32 %s2324_s30, 4  ;;  %s2322_s18 = int_to_ptr.vmem [resolvable:$true] %s2321_s18  ;;  %s2967_s23 = int_to_ptr.hbm [resolvable:$true] %s2966_s23 }
0x1316   :  { %s2968_s22 = scalar_lea.hbm %s2967_s23, 2  ;;  %s2970_s26 = scalar_lea.hbm %s3266_s29, 2 }
0x1317   :  { %p2969_p4 = scmp.ne.s32.totalorder %s2967_s23, %s2968_s22  ;;  %p2971_p5 = scmp.lt.s32.totalorder %s2967_s23, %s3266_s29 }
0x1318   :  { %p2972_p6 = scmp.lt.s32.totalorder %s2970_s26, %s2968_s22 }
0x131a   :  { %p2973_p7 = por %p2972_p6, %p2971_p5 }
0x131c   :  { %p2974_p8 = pnand %p2973_p7, %p2969_p4 }
0x131e   :  { %2977 = shalt.err (!%p2974_p8)
}
0x131f   :  { %2326 = dma.vmem_to_hbm [thread:$0]  %s2322_s18, 32, %s2324_s30, [#allocation23]   ;;  %v2287_v60 = vpop.permute.xlu0 %2286  ;;  %vm2290_vm9 = vcmask 9216  }
0x1320   :  { %s3079_s9 = smov [#allocation21]   ;;  %s2301_s28 = sshll.u32 %s3256_s19, 4  ;;  %s2302_s28 = int_to_ptr.hbm [resolvable:$true] %s2301_s28 }
0x1321   :  { %s2299_s14 = sshll.u32 %s3079_s9, 4  ;;  %s2990_s1 = sshra.s32 %s2302_s28, 4  ;;  %s2300_s14 = int_to_ptr.vmem [resolvable:$true] %s2299_s14  ;;  %s2991_s1 = int_to_ptr.hbm [resolvable:$true] %s2990_s1 }
0x1322   :  { %s2992_s29 = scalar_lea.hbm %s2991_s1, 2  ;;  %s2994_s2 = scalar_lea.hbm %s3256_s19, 2 }
0x1323   :  { %p2993_p9 = scmp.ne.s32.totalorder %s2991_s1, %s2992_s29  ;;  %p2995_p10 = scmp.lt.s32.totalorder %s2991_s1, %s3256_s19 }
0x1324   :  { %p2996_p11 = scmp.lt.s32.totalorder %s2994_s2, %s2992_s29 }
0x1326   :  { %p2997_p12 = por %p2996_p11, %p2995_p10 }
0x1328   :  { %p2998_p13 = pnand %p2997_p12, %p2993_p9 }
0x1394   :  { %v2277_v34 = vpop.f32.mrf.mxu3 }
0x1395   :  { %v2289_v53 = vmul.f32 %v2287_v60, %v2277_v34 }
0x1397   :  { %2291 = vst.msk [vmem:[#allocation21] sm:$0x3] %vm2290_vm9, %v2289_v53 }
0x1398   :  { %3001 = shalt.err (!%p2998_p13)
}
0x1399   :  { %2304 = dma.vmem_to_hbm [thread:$0]  %s2300_s14, 32, %s2302_s28, [#allocation5]  }
0x139a   :  { %3014 = dma.done.wait [#allocation5], 32  }
0x139b   :  { %3015 = vsyncadd [#allocation5], 4294967264 }
0x139c   :  { %3016 = dma.done.wait [#allocation23], 64  }
0x139d   :  { %3017 = vsyncadd [#allocation23], 4294967232 }
0x139e   :  { %2339 = vsyncpa [#allocation4], 1 }
0x139f   :  { %2340 = vsyncpa [#allocation7], 1 }
0x13a0   :  { %2341 = vsyncpa [#allocation10], 1 }
0x13a1   :  { %2342 = vsyncpa [#allocation13], 1 }
0x13a2   :  { %2343 = vsyncpa [#allocation16], 1 }
0x13a3   :  { %2344 = vsyncpa [#allocation19], 1 }
0x13a4   :  { %2345 = vsyncpa [#allocation5], 1 }
0x13a5   :  { %2346 = vsyncpa [#allocation23], 1 }

</bundles_post_ra>
